<compile_context>
chip_gen: v7x
topology: tpu7x:2x2x1
jax: 0.10.0
libtpu: 0.0.40
codegen_flags: <defaults>
</compile_context>

<pallas_src>
import numpy as np
import jax
import jax.numpy as jnp
from jax.experimental import pallas as pl
from jax.experimental.pallas import tpu as pltpu


# -----------------------------------------------------------------------------
# Model configuration (reduced bandwidths so the demo shapes stay small).
# -----------------------------------------------------------------------------
N_FEATURES = 4
FEATURES = [N_FEATURES, 10, 20, 60, 100, 200]
# original: [100, 50, 40, 30, 20, 5]  -> reduced for a small runnable example
BANDWIDTHS = [8, 4, 4, 2, 2, 2]
# layers 1-3: conv -> PReLU -> BN ; layers 4-5: conv -> BN -> PReLU
PRELU_BEFORE_BN = [True, True, True, False, False]
BN_EPS = 1e-5

_VMEM_LIMIT = 32 * 1024 * 1024          # safe scoped-VMEM request on v5e/v6e/v7x
_TILE_BUDGET = 8 * 1024 * 1024          # conservative double-buffered tile budget


# -----------------------------------------------------------------------------
# Pallas kernels
# -----------------------------------------------------------------------------
def _stage12_kernel(x_ref, w1_ref, w2_ref, alpha_ref, o_ref):
    """Fused layers 1-2: two chained channel-mix matmuls + PReLU.

    x_ref:  [C0+1, TN]  (last row is ones; bias folded into the weight matrix)
    w1_ref: [C1+1, C0+1]  BN/bias-folded augmented weights (+ ones-propagation row)
    w2_ref: [C2+1, C1+1]  BN/bias-folded augmented weights (+ ones-propagation row)
    alpha_ref: [2] (SMEM)  PReLU slopes.
    """
    h = jnp.dot(w1_ref[...], x_ref[...], preferred_element_type=jnp.float32)
    h = jnp.where(h >= 0, h, alpha_ref[0] * h)
    h = jnp.dot(w2_ref[...], h, preferred_element_type=jnp.float32)
    h = jnp.where(h >= 0, h, alpha_ref[1] * h)
    o_ref[...] = h.astype(o_ref.dtype)


def _stage345_kernel(x_ref, w3_ref, w4_ref, w5_ref, alpha_ref, o_ref):
    """Fused layers 3-5: three chained channel-mix matmuls + PReLU.

    x_ref:  [C2+1, TN]  (last row is ones)
    w3_ref: [C3+1, C2+1] ; w4_ref: [C4+1, C3+1] ; w5_ref: [C5, C4+1]
    alpha_ref: [3] (SMEM)  PReLU slopes.
    Intermediates stay in registers/VMEM; only the final [C5, TN] is written.
    """
    h = jnp.dot(w3_ref[...], x_ref[...], preferred_element_type=jnp.float32)
    h = jnp.where(h >= 0, h, alpha_ref[0] * h)
    h = jnp.dot(w4_ref[...], h, preferred_element_type=jnp.float32)
    h = jnp.where(h >= 0, h, alpha_ref[1] * h)
    h = jnp.dot(w5_ref[...], h, preferred_element_type=jnp.float32)
    h = jnp.where(h >= 0, h, alpha_ref[2] * h)
    o_ref[...] = h.astype(o_ref.dtype)


def _tail_kernel(alpha_ref, x_ref, r_ref, w1_ref, b1_ref, w2_ref, b2_ref,
                 w3_ref, b3_ref, o_ref):
    """Fused SO(3) integration + linear head, batch-major (lane-dense).

    x_ref: [C5, N]   last conv activations (channel-major, flattened spatial)
    r_ref: [N, 3B]   block-diagonal quadrature integration matrix
    w*_ref: [in, out] BN-folded weights ; b*_ref: [1, out] folded biases
    alpha_ref: [2] (SMEM) PReLU slopes.  Dropout(p=0.4) is identity (eval).
    """
    v = jnp.dot(x_ref[...], r_ref[...], preferred_element_type=jnp.float32)   # [C5, 3B]
    h = jnp.dot(v.T, w1_ref[...], preferred_element_type=jnp.float32) + b1_ref[...]
    h = jnp.where(h >= 0, h, alpha_ref[0] * h)                                 # [3B, 512]
    h = jnp.dot(h, w2_ref[...], preferred_element_type=jnp.float32) + b2_ref[...]
    h = jnp.where(h >= 0, h, alpha_ref[1] * h)                                 # [3B, 256]
    o_ref[...] = (jnp.dot(h, w3_ref[...], preferred_element_type=jnp.float32)
                  + b3_ref[...]).astype(o_ref.dtype)                           # [3B, 256]


# -----------------------------------------------------------------------------
# Pallas wrappers
# -----------------------------------------------------------------------------
def _pick_tile(n, rows_total, budget_bytes=_TILE_BUDGET):
    """Largest lane tile TN (divisor of n) whose double-buffered f32 footprint
    fits the budget; prefers a single grid step (per-step overhead dominates)."""
    def fits(tn):
        return 2 * rows_total * tn * 4 <= budget_bytes
    if fits(n) or n % 128 != 0:
        return n
    tn = n - (n % 128)
    while tn > 128:
        if n % tn == 0 and fits(tn):
            return tn
        tn -= 128
    return 128


def fused_stage12(x_aug, w1a, w2a, alphas):
    """x_aug: [C0+1, N] (ones row appended) -> [C2+1, N] (ones row preserved)."""
    cin_a, n = x_aug.shape
    cout_a = w2a.shape[0]
    rows_total = cin_a + w1a.shape[0] + cout_a
    tn = _pick_tile(n, rows_total)
    assert n % tn == 0
    return pl.pallas_call(
        _stage12_kernel,
        out_shape=jax.ShapeDtypeStruct((cout_a, n), jnp.float32),
        grid=(n // tn,),
        in_specs=[
            pl.BlockSpec((cin_a, tn), lambda i: (0, i)),
            pl.BlockSpec(w1a.shape, lambda i: (0, 0)),
            pl.BlockSpec(w2a.shape, lambda i: (0, 0)),
            pl.BlockSpec(memory_space=pltpu.MemorySpace.SMEM),
        ],
        out_specs=pl.BlockSpec((cout_a, tn), lambda i: (0, i)),
        compiler_params=pltpu.CompilerParams(
            dimension_semantics=("parallel",),
            vmem_limit_bytes=_VMEM_LIMIT),
    )(x_aug, w1a, w2a, alphas)


def fused_stage345(x_aug, w3a, w4a, w5a, alphas):
    """x_aug: [C2+1, N] (ones row) -> [C5, N]."""
    cin_a, n = x_aug.shape
    cout = w5a.shape[0]
    rows_total = cin_a + w3a.shape[0] + w4a.shape[0] + cout
    tn = _pick_tile(n, rows_total)
    assert n % tn == 0
    return pl.pallas_call(
        _stage345_kernel,
        out_shape=jax.ShapeDtypeStruct((cout, n), jnp.float32),
        grid=(n // tn,),
        in_specs=[
            pl.BlockSpec((cin_a, tn), lambda i: (0, i)),
            pl.BlockSpec(w3a.shape, lambda i: (0, 0)),
            pl.BlockSpec(w4a.shape, lambda i: (0, 0)),
            pl.BlockSpec(w5a.shape, lambda i: (0, 0)),
            pl.BlockSpec(memory_space=pltpu.MemorySpace.SMEM),
        ],
        out_specs=pl.BlockSpec((cout, tn), lambda i: (0, i)),
        compiler_params=pltpu.CompilerParams(
            dimension_semantics=("parallel",),
            vmem_limit_bytes=_VMEM_LIMIT),
    )(x_aug, w3a, w4a, w5a, alphas)


def linear_tail(x, R, head_params):
    """Fused SO(3) integrate + BN->Linear->PReLU x2 -> BN->Linear, batch-major out."""
    alphas, w1, b1, w2, b2, w3, b3 = head_params
    bt = R.shape[1]
    out_dim = w3.shape[1]
    vmem = pl.BlockSpec(memory_space=pltpu.MemorySpace.VMEM)
    smem = pl.BlockSpec(memory_space=pltpu.MemorySpace.SMEM)
    return pl.pallas_call(
        _tail_kernel,
        out_shape=jax.ShapeDtypeStruct((bt, out_dim), jnp.float32),
        in_specs=[smem, vmem, vmem, vmem, vmem, vmem, vmem, vmem, vmem],
        out_specs=vmem,
        compiler_params=pltpu.CompilerParams(vmem_limit_bytes=_VMEM_LIMIT),
    )(alphas, x, R, w1, b1, w2, b2, w3, b3)


# -----------------------------------------------------------------------------
# SO(3) quadrature helpers (host-side constants, built ONCE outside the trace)
# -----------------------------------------------------------------------------
def s3_quadrature_weights_np(b):
    """Driscoll-Healy / SOFT quadrature weights over beta (as in lie_learn S3)."""
    k = np.arange(b)
    w = np.array([
        (2.0 / b) * np.sin(np.pi * (2.0 * j + 1.0) / (4.0 * b)) *
        np.sum((1.0 / (2.0 * k + 1.0)) *
               np.sin((2.0 * j + 1.0) * (2.0 * k + 1.0) * np.pi / (4.0 * b)))
        for j in range(2 * b)
    ])
    w = w * (2.0 * np.pi ** 2) / ((2.0 * b) ** 2)
    return w.astype(np.float32)


def make_integration_matrix(n_batch, b):
    """Block-diagonal R = kron(I_{n_batch}, w_beta): with x channel-major and the
    spatial axis flattened as (batch, beta, alpha, gamma), v = x @ R performs the
    per-batch quadrature-weighted SO(3) integral -> [C, n_batch]."""
    D = 2 * b
    w = s3_quadrature_weights_np(b)                      # [D], depends on beta only
    per = np.repeat(w, D * D).astype(np.float32)         # [D^3]
    R = np.kron(np.eye(n_batch, dtype=np.float32), per[:, None]).astype(np.float32)
    return jnp.asarray(R)                                # [n_batch*D^3, n_batch]


# -----------------------------------------------------------------------------
# Forward pass glue (reshapes / tiny strided slices stay in XLA)
# -----------------------------------------------------------------------------
def model_forward(x1, x2, x3, params, R):
    stage12, stage345, head = params
    B = x1.shape[0]
    BT = 3 * B
    x = jnp.concatenate([x1, x2, x3], axis=0)            # [3B, C0, 2b0, 2b0]
    x = jnp.transpose(x, (1, 0, 2, 3))                   # [C0, 3B, 2b0, 2b0]

    # ---- S2 bandwidth reduction 8 -> 4 (spatial subsample approximation) ----
    d1 = 2 * BANDWIDTHS[1]
    st = x.shape[-1] // d1
    xs = x[:, :, ::st, ::st]                             # [C0, 3B, 8, 8]
    c0 = xs.shape[0]
    x2d = xs.reshape(c0, BT * d1 * d1)                   # [C0, N1], N1 = 3B*64
    ones = jnp.ones((1, x2d.shape[1]), x2d.dtype)
    x_aug = jnp.concatenate([x2d, ones], axis=0)         # bias ones-row appended

    # ---- layers 1-2 fused, on the 2D grid (before gamma replication) --------
    h12 = fused_stage12(x_aug, *stage12)                 # [C2+1, N1], last row = 1

    # ---- layer-3 bandwidth reduction 4 -> 2 on the 2D grid, then gamma rep ---
    d2 = 2 * BANDWIDTHS[3]
    c2a = h12.shape[0]
    h = h12.reshape(c2a, BT, d1, d1)[:, :, ::d1 // d2, ::d1 // d2]   # [C2+1, 3B, 4, 4]
    h = jnp.broadcast_to(h[..., None], (c2a, BT, d2, d2, d2))
    h2d = h.reshape(c2a, BT * d2 ** 3)                   # [C2+1, N2], ones row kept

    # ---- layers 3-5 fused (all share bandwidth 2 / spatial extent) ----------
    h5 = fused_stage345(h2d, *stage345)                  # [C5, N2]

    # ---- fused SO(3) integration + linear head (batch-major output) ---------
    out = linear_tail(h5, R, head)                       # [3B, 256]
    return out[:B], out[B:2 * B], out[2 * B:]


# -----------------------------------------------------------------------------
# Deterministic parameter init (host-side BN / bias constant folding)
# -----------------------------------------------------------------------------
def init_params(key):
    keys = iter(jax.random.split(key, 16))

    def bn_scale_shift(c):
        # inference-mode BN, default init: weight=1, bias=0, mean=0, var=1
        scale = np.full((c,), 1.0 / np.sqrt(1.0 + BN_EPS), np.float32)
        shift = np.zeros((c,), np.float32)
        return scale, shift

    # ---- conv stack: augmented, BN/bias-folded weight matrices ---------------
    aug_ws = []
    for i in range(5):
        cin, cout = FEATURES[i], FEATURES[i + 1]
        W = np.asarray(jax.random.normal(next(keys), (cin, cout), jnp.float32))
        W = W / np.sqrt(cin)
        bias = np.zeros((cout,), np.float32)
        scale, shift = bn_scale_shift(cout)
        assert np.all(scale > 0.0), "BN-through-PReLU fold requires positive scale"
        if PRELU_BEFORE_BN[i]:
            # conv -> PReLU -> BN:  BN(PReLU(z)) = PReLU(scale*z) + shift (scale>0)
            assert np.all(shift == 0.0), \
                "post-PReLU BN shift must be re-added (unfused path) for trained BN"
            wt_f = (W * scale[None, :]).T                # [cout, cin]
            b_f = bias * scale
        else:
            # conv -> BN -> PReLU: pure affine fold, always exact.
            wt_f = (W * scale[None, :]).T
            b_f = bias * scale + shift
        need_prop = i < 4                                # propagate the ones row onward
        rows = cout + (1 if need_prop else 0)
        W_aug = np.zeros((rows, cin + 1), np.float32)
        W_aug[:cout, :cin] = wt_f
        W_aug[:cout, cin] = b_f                          # bias rides in the matmul
        if need_prop:
            W_aug[cout, cin] = 1.0                       # keeps the ones row (PReLU(1)=1)
        aug_ws.append(jnp.asarray(W_aug))

    alphas12 = jnp.full((2,), 0.25, jnp.float32)         # nn.PReLU() default
    alphas345 = jnp.full((3,), 0.25, jnp.float32)
    stage12 = (aug_ws[0], aug_ws[1], alphas12)
    stage345 = (aug_ws[2], aug_ws[3], aug_ws[4], alphas345)

    # ---- linear head (batch-major W [in, out]), BN folded --------------------
    def linear(cin, cout):
        W = np.asarray(jax.random.normal(next(keys), (cin, cout), jnp.float32))
        return W / np.sqrt(cin), np.zeros((cout,), np.float32)

    def fold_bn_into_linear(W, b, s, t):
        # (h*s + t) @ W + b == h @ (diag(s) W) + (t @ W + b)
        return W * s[:, None], (t @ W + b)[None, :]

    s0, t0 = bn_scale_shift(FEATURES[5])
    W1, b1 = linear(FEATURES[5], 512)
    s1, t1 = bn_scale_shift(512)
    W2, b2 = linear(512, 256)
    s2, t2 = bn_scale_shift(256)
    W3, b3 = linear(256, 256)
    w1f, b1f = fold_bn_into_linear(W1, b1, s0, t0)
    w2f, b2f = fold_bn_into_linear(W2, b2, s1, t1)
    w3f, b3f = fold_bn_into_linear(W3, b3, s2, t2)
    alphas_head = jnp.full((2,), 0.25, jnp.float32)
    head = (alphas_head,
            jnp.asarray(w1f), jnp.asarray(b1f),
            jnp.asarray(w2f), jnp.asarray(b2f),
            jnp.asarray(w3f), jnp.asarray(b3f))

    return stage12, stage345, head


# -----------------------------------------------------------------------------
# Demo
# -----------------------------------------------------------------------------
if __name__ == "__main__":
    key = jax.random.PRNGKey(0)
    kp, k1, k2, k3 = jax.random.split(key, 4)
    params = init_params(kp)

    B = 2
    spatial = 2 * BANDWIDTHS[0]   # 16
    x1 = jax.random.normal(k1, (B, N_FEATURES, spatial, spatial), jnp.float32)
    x2 = jax.random.normal(k2, (B, N_FEATURES, spatial, spatial), jnp.float32)
    x3 = jax.random.normal(k3, (B, N_FEATURES, spatial, spatial), jnp.float32)

    # integration matrix built once, outside the traced forward
    R = make_integration_matrix(3 * B, BANDWIDTHS[5])

    fwd = jax.jit(lambda a, b, c: model_forward(a, b, c, params, R))
    o1, o2, o3 = fwd(x1, x2, x3)
    jax.block_until_ready((o1, o2, o3))

    assert o1.shape == (B, 256) and o2.shape == (B, 256) and o3.shape == (B, 256)
    assert all(bool(jnp.all(jnp.isfinite(o))) for o in (o1, o2, o3))
    print("KERNEL_OK")
</pallas_src>

<mosaic_0001>
module attributes {stable_mosaic.version = 11 : i64} {
  func.func @_stage12_kernel(%arg0: i32, %arg1: memref<5x384xf32, #tpu.memory_space<vmem>>, %arg2: memref<11x5xf32, #tpu.memory_space<vmem>>, %arg3: memref<21x11xf32, #tpu.memory_space<vmem>>, %arg4: memref<2xf32, #tpu.memory_space<smem>>, %arg5: memref<21x384xf32, #tpu.memory_space<vmem>>) attributes {dimension_semantics = [#tpu.dimension_semantics<parallel>], iteration_bounds = array<i64: 1>, scalar_prefetch = 0 : i64, scratch_operands = 0 : i64, tpu.core_type = #tpu.core_type<tc>, window_params = [{transform_indices = @transform_0, window_bounds = array<i64: 5, 384>}, {pipeline_mode = #tpu.pipeline_mode<synchronous>, transform_indices = @transform_1, window_bounds = array<i64: 11, 5>}, {pipeline_mode = #tpu.pipeline_mode<synchronous>, transform_indices = @transform_2, window_bounds = array<i64: 21, 11>}, {transform_indices = @transform_3, window_bounds = array<i64: 2>}, {transform_indices = @transform_4, window_bounds = array<i64: 21, 384>}]} {
    %c0 = arith.constant 0 : index
    %c0_0 = arith.constant 0 : index
    %0 = vector.load %arg2[%c0, %c0_0] : memref<11x5xf32, #tpu.memory_space<vmem>>, vector<11x5xf32>
    %c0_1 = arith.constant 0 : index
    %c0_2 = arith.constant 0 : index
    %1 = vector.load %arg1[%c0_1, %c0_2] : memref<5x384xf32, #tpu.memory_space<vmem>>, vector<5x384xf32>
    %cst = arith.constant dense<0.000000e+00> : vector<11x384xf32>
    %2 = tpu.matmul %0, %1, %cst {dimension_numbers = #tpu.dot_dimension_numbers<[1], [0], [0], [1], [0, 0, 1, 1], [], []>} : vector<11x5xf32>, vector<5x384xf32>, vector<11x384xf32> -> vector<11x384xf32>
    %cst_3 = arith.constant 0.000000e+00 : f32
    %3 = vector.broadcast %cst_3 : f32 to vector<11x384xf32>
    %4 = arith.cmpf oge, %2, %3 : vector<11x384xf32>
    %c0_4 = arith.constant 0 : index
    %5 = memref.load %arg4[%c0_4] : memref<2xf32, #tpu.memory_space<smem>>
    %6 = vector.broadcast %5 : f32 to vector<11x384xf32>
    %7 = arith.mulf %6, %2 : vector<11x384xf32>
    %8 = arith.select %4, %2, %7 : vector<11x384xi1>, vector<11x384xf32>
    %c0_5 = arith.constant 0 : index
    %c0_6 = arith.constant 0 : index
    %9 = vector.load %arg3[%c0_5, %c0_6] : memref<21x11xf32, #tpu.memory_space<vmem>>, vector<21x11xf32>
    %cst_7 = arith.constant dense<0.000000e+00> : vector<21x384xf32>
    %10 = tpu.matmul %9, %8, %cst_7 {dimension_numbers = #tpu.dot_dimension_numbers<[1], [0], [0], [1], [0, 0, 1, 1], [], []>} : vector<21x11xf32>, vector<11x384xf32>, vector<21x384xf32> -> vector<21x384xf32>
    %cst_8 = arith.constant 0.000000e+00 : f32
    %11 = vector.broadcast %cst_8 : f32 to vector<21x384xf32>
    %12 = arith.cmpf oge, %10, %11 : vector<21x384xf32>
    %c1 = arith.constant 1 : index
    %13 = memref.load %arg4[%c1] : memref<2xf32, #tpu.memory_space<smem>>
    %14 = vector.broadcast %13 : f32 to vector<21x384xf32>
    %15 = arith.mulf %14, %10 : vector<21x384xf32>
    %16 = arith.select %12, %10, %15 : vector<21x384xi1>, vector<21x384xf32>
    %c0_9 = arith.constant 0 : index
    %c0_10 = arith.constant 0 : index
    %17 = vector.load %arg5[%c0_9, %c0_10] : memref<21x384xf32, #tpu.memory_space<vmem>>, vector<21x384xf32>
    tpu.vector_store %arg5[%c0_9, %c0_10], %16 {strides = array<i32>} : memref<21x384xf32, #tpu.memory_space<vmem>>, vector<21x384xf32>,
    return
  }
  func.func @transform_0(%arg0: i32) -> (i32, i32) {
    %c0_i32 = arith.constant 0 : i32
    %c0_i32_0 = arith.constant 0 : i32
    return %c0_i32, %arg0 : i32, i32
  }
  func.func @transform_1(%arg0: i32) -> (i32, i32) {
    %c0_i32 = arith.constant 0 : i32
    %c0_i32_0 = arith.constant 0 : i32
    %c0_i32_1 = arith.constant 0 : i32
    return %c0_i32, %c0_i32_0 : i32, i32
  }
  func.func @transform_2(%arg0: i32) -> (i32, i32) {
    %c0_i32 = arith.constant 0 : i32
    %c0_i32_0 = arith.constant 0 : i32
    %c0_i32_1 = arith.constant 0 : i32
    return %c0_i32, %c0_i32_0 : i32, i32
  }
  func.func @transform_3(%arg0: i32) -> i32 {
    %c0_i32 = arith.constant 0 : i32
    %c0_i32_0 = arith.constant 0 : i32
    return %c0_i32 : i32
  }
  func.func @transform_4(%arg0: i32) -> (i32, i32) {
    %c0_i32 = arith.constant 0 : i32
    %c0_i32_0 = arith.constant 0 : i32
    return %c0_i32, %arg0 : i32, i32
  }
}

module attributes {stable_mosaic.version = 11 : i64} {
  func.func @_stage345_kernel(%arg0: i32, %arg1: memref<21x384xf32, #tpu.memory_space<vmem>>, %arg2: memref<61x21xf32, #tpu.memory_space<vmem>>, %arg3: memref<101x61xf32, #tpu.memory_space<vmem>>, %arg4: memref<200x101xf32, #tpu.memory_space<vmem>>, %arg5: memref<3xf32, #tpu.memory_space<smem>>, %arg6: memref<200x384xf32, #tpu.memory_space<vmem>>) attributes {dimension_semantics = [#tpu.dimension_semantics<parallel>], iteration_bounds = array<i64: 1>, scalar_prefetch = 0 : i64, scratch_operands = 0 : i64, tpu.core_type = #tpu.core_type<tc>, window_params = [{transform_indices = @transform_0, window_bounds = array<i64: 21, 384>}, {pipeline_mode = #tpu.pipeline_mode<synchronous>, transform_indices = @transform_1, window_bounds = array<i64: 61, 21>}, {pipeline_mode = #tpu.pipeline_mode<synchronous>, transform_indices = @transform_2, window_bounds = array<i64: 101, 61>}, {pipeline_mode = #tpu.pipeline_mode<synchronous>, transform_indices = @transform_3, window_bounds = array<i64: 200, 101>}, {transform_indices = @transform_4, window_bounds = array<i64: 3>}, {transform_indices = @transform_5, window_bounds = array<i64: 200, 384>}]} {
    %c0 = arith.constant 0 : index
    %c0_0 = arith.constant 0 : index
    %0 = vector.load %arg2[%c0, %c0_0] : memref<61x21xf32, #tpu.memory_space<vmem>>, vector<61x21xf32>
    %c0_1 = arith.constant 0 : index
    %c0_2 = arith.constant 0 : index
    %1 = vector.load %arg1[%c0_1, %c0_2] : memref<21x384xf32, #tpu.memory_space<vmem>>, vector<21x384xf32>
    %cst = arith.constant dense<0.000000e+00> : vector<61x384xf32>
    %2 = tpu.matmul %0, %1, %cst {dimension_numbers = #tpu.dot_dimension_numbers<[1], [0], [0], [1], [0, 0, 1, 1], [], []>} : vector<61x21xf32>, vector<21x384xf32>, vector<61x384xf32> -> vector<61x384xf32>
    %cst_3 = arith.constant 0.000000e+00 : f32
    %3 = vector.broadcast %cst_3 : f32 to vector<61x384xf32>
    %4 = arith.cmpf oge, %2, %3 : vector<61x384xf32>
    %c0_4 = arith.constant 0 : index
    %5 = memref.load %arg5[%c0_4] : memref<3xf32, #tpu.memory_space<smem>>
    %6 = vector.broadcast %5 : f32 to vector<61x384xf32>
    %7 = arith.mulf %6, %2 : vector<61x384xf32>
    %8 = arith.select %4, %2, %7 : vector<61x384xi1>, vector<61x384xf32>
    %c0_5 = arith.constant 0 : index
    %c0_6 = arith.constant 0 : index
    %9 = vector.load %arg3[%c0_5, %c0_6] : memref<101x61xf32, #tpu.memory_space<vmem>>, vector<101x61xf32>
    %cst_7 = arith.constant dense<0.000000e+00> : vector<101x384xf32>
    %10 = tpu.matmul %9, %8, %cst_7 {dimension_numbers = #tpu.dot_dimension_numbers<[1], [0], [0], [1], [0, 0, 1, 1], [], []>} : vector<101x61xf32>, vector<61x384xf32>, vector<101x384xf32> -> vector<101x384xf32>
    %cst_8 = arith.constant 0.000000e+00 : f32
    %11 = vector.broadcast %cst_8 : f32 to vector<101x384xf32>
    %12 = arith.cmpf oge, %10, %11 : vector<101x384xf32>
    %c1 = arith.constant 1 : index
    %13 = memref.load %arg5[%c1] : memref<3xf32, #tpu.memory_space<smem>>
    %14 = vector.broadcast %13 : f32 to vector<101x384xf32>
    %15 = arith.mulf %14, %10 : vector<101x384xf32>
    %16 = arith.select %12, %10, %15 : vector<101x384xi1>, vector<101x384xf32>
    %c0_9 = arith.constant 0 : index
    %c0_10 = arith.constant 0 : index
    %17 = vector.load %arg4[%c0_9, %c0_10] : memref<200x101xf32, #tpu.memory_space<vmem>>, vector<200x101xf32>
    %cst_11 = arith.constant dense<0.000000e+00> : vector<200x384xf32>
    %18 = tpu.matmul %17, %16, %cst_11 {dimension_numbers = #tpu.dot_dimension_numbers<[1], [0], [0], [1], [0, 0, 1, 1], [], []>} : vector<200x101xf32>, vector<101x384xf32>, vector<200x384xf32> -> vector<200x384xf32>
    %cst_12 = arith.constant 0.000000e+00 : f32
    %19 = vector.broadcast %cst_12 : f32 to vector<200x384xf32>
    %20 = arith.cmpf oge, %18, %19 : vector<200x384xf32>
    %c2 = arith.constant 2 : index
    %21 = memref.load %arg5[%c2] : memref<3xf32, #tpu.memory_space<smem>>
    %22 = vector.broadcast %21 : f32 to vector<200x384xf32>
    %23 = arith.mulf %22, %18 : vector<200x384xf32>
    %24 = arith.select %20, %18, %23 : vector<200x384xi1>, vector<200x384xf32>
    %c0_13 = arith.constant 0 : index
    %c0_14 = arith.constant 0 : index
    %25 = vector.load %arg6[%c0_13, %c0_14] : memref<200x384xf32, #tpu.memory_space<vmem>>, vector<200x384xf32>
    tpu.vector_store %arg6[%c0_13, %c0_14], %24 {strides = array<i32>} : memref<200x384xf32, #tpu.memory_space<vmem>>, vector<200x384xf32>,
    return
  }
  func.func @transform_0(%arg0: i32) -> (i32, i32) {
    %c0_i32 = arith.constant 0 : i32
    %c0_i32_0 = arith.constant 0 : i32
    return %c0_i32, %arg0 : i32, i32
  }
  func.func @transform_1(%arg0: i32) -> (i32, i32) {
    %c0_i32 = arith.constant 0 : i32
    %c0_i32_0 = arith.constant 0 : i32
    %c0_i32_1 = arith.constant 0 : i32
    return %c0_i32, %c0_i32_0 : i32, i32
  }
  func.func @transform_2(%arg0: i32) -> (i32, i32) {
    %c0_i32 = arith.constant 0 : i32
    %c0_i32_0 = arith.constant 0 : i32
    %c0_i32_1 = arith.constant 0 : i32
    return %c0_i32, %c0_i32_0 : i32, i32
  }
  func.func @transform_3(%arg0: i32) -> (i32, i32) {
    %c0_i32 = arith.constant 0 : i32
    %c0_i32_0 = arith.constant 0 : i32
    %c0_i32_1 = arith.constant 0 : i32
    return %c0_i32, %c0_i32_0 : i32, i32
  }
  func.func @transform_4(%arg0: i32) -> i32 {
    %c0_i32 = arith.constant 0 : i32
    %c0_i32_0 = arith.constant 0 : i32
    return %c0_i32 : i32
  }
  func.func @transform_5(%arg0: i32) -> (i32, i32) {
    %c0_i32 = arith.constant 0 : i32
    %c0_i32_0 = arith.constant 0 : i32
    return %c0_i32, %arg0 : i32, i32
  }
}

module attributes {stable_mosaic.version = 11 : i64} {
  func.func @_tail_kernel(%arg0: memref<2xf32, #tpu.memory_space<smem>>, %arg1: memref<200x384xf32, #tpu.memory_space<vmem>>, %arg2: memref<384x6xf32, #tpu.memory_space<vmem>>, %arg3: memref<200x512xf32, #tpu.memory_space<vmem>>, %arg4: memref<1x512xf32, #tpu.memory_space<vmem>>, %arg5: memref<512x256xf32, #tpu.memory_space<vmem>>, %arg6: memref<1x256xf32, #tpu.memory_space<vmem>>, %arg7: memref<256x256xf32, #tpu.memory_space<vmem>>, %arg8: memref<1x256xf32, #tpu.memory_space<vmem>>, %arg9: memref<6x256xf32, #tpu.memory_space<vmem>>) attributes {dimension_semantics = [], scalar_prefetch = 0 : i64, scratch_operands = 0 : i64, tpu.core_type = #tpu.core_type<tc>} {
    %c0 = arith.constant 0 : index
    %c0_0 = arith.constant 0 : index
    %0 = vector.load %arg1[%c0, %c0_0] : memref<200x384xf32, #tpu.memory_space<vmem>>, vector<200x384xf32>
    %c0_1 = arith.constant 0 : index
    %c0_2 = arith.constant 0 : index
    %1 = vector.load %arg2[%c0_1, %c0_2] : memref<384x6xf32, #tpu.memory_space<vmem>>, vector<384x6xf32>
    %cst = arith.constant dense<0.000000e+00> : vector<200x6xf32>
    %2 = tpu.matmul %0, %1, %cst {dimension_numbers = #tpu.dot_dimension_numbers<[1], [0], [0], [1], [0, 0, 1, 1], [], []>} : vector<200x384xf32>, vector<384x6xf32>, vector<200x6xf32> -> vector<200x6xf32>
    %3 = tpu.transpose %2, [1, 0] : vector<200x6xf32> -> vector<6x200xf32>
    %c0_3 = arith.constant 0 : index
    %c0_4 = arith.constant 0 : index
    %4 = vector.load %arg3[%c0_3, %c0_4] : memref<200x512xf32, #tpu.memory_space<vmem>>, vector<200x512xf32>
    %cst_5 = arith.constant dense<0.000000e+00> : vector<6x512xf32>
    %5 = tpu.matmul %3, %4, %cst_5 {dimension_numbers = #tpu.dot_dimension_numbers<[1], [0], [0], [1], [0, 0, 1, 1], [], []>} : vector<6x200xf32>, vector<200x512xf32>, vector<6x512xf32> -> vector<6x512xf32>
    %c0_6 = arith.constant 0 : index
    %c0_7 = arith.constant 0 : index
    %6 = vector.load %arg4[%c0_6, %c0_7] : memref<1x512xf32, #tpu.memory_space<vmem>>, vector<1x512xf32>
    %7 = vector.broadcast %6 : vector<1x512xf32> to vector<6x512xf32>
    %8 = arith.addf %5, %7 : vector<6x512xf32>
    %cst_8 = arith.constant 0.000000e+00 : f32
    %9 = vector.broadcast %cst_8 : f32 to vector<6x512xf32>
    %10 = arith.cmpf oge, %8, %9 : vector<6x512xf32>
    %c0_9 = arith.constant 0 : index
    %11 = memref.load %arg0[%c0_9] : memref<2xf32, #tpu.memory_space<smem>>
    %12 = vector.broadcast %11 : f32 to vector<6x512xf32>
    %13 = arith.mulf %12, %8 : vector<6x512xf32>
    %14 = arith.select %10, %8, %13 : vector<6x512xi1>, vector<6x512xf32>
    %c0_10 = arith.constant 0 : index
    %c0_11 = arith.constant 0 : index
    %15 = vector.load %arg5[%c0_10, %c0_11] : memref<512x256xf32, #tpu.memory_space<vmem>>, vector<512x256xf32>
    %cst_12 = arith.constant dense<0.000000e+00> : vector<6x256xf32>
    %16 = tpu.matmul %14, %15, %cst_12 {dimension_numbers = #tpu.dot_dimension_numbers<[1], [0], [0], [1], [0, 0, 1, 1], [], []>} : vector<6x512xf32>, vector<512x256xf32>, vector<6x256xf32> -> vector<6x256xf32>
    %c0_13 = arith.constant 0 : index
    %c0_14 = arith.constant 0 : index
    %17 = vector.load %arg6[%c0_13, %c0_14] : memref<1x256xf32, #tpu.memory_space<vmem>>, vector<1x256xf32>
    %18 = vector.broadcast %17 : vector<1x256xf32> to vector<6x256xf32>
    %19 = arith.addf %16, %18 : vector<6x256xf32>
    %cst_15 = arith.constant 0.000000e+00 : f32
    %20 = vector.broadcast %cst_15 : f32 to vector<6x256xf32>
    %21 = arith.cmpf oge, %19, %20 : vector<6x256xf32>
    %c1 = arith.constant 1 : index
    %22 = memref.load %arg0[%c1] : memref<2xf32, #tpu.memory_space<smem>>
    %23 = vector.broadcast %22 : f32 to vector<6x256xf32>
    %24 = arith.mulf %23, %19 : vector<6x256xf32>
    %25 = arith.select %21, %19, %24 : vector<6x256xi1>, vector<6x256xf32>
    %c0_16 = arith.constant 0 : index
    %c0_17 = arith.constant 0 : index
    %26 = vector.load %arg7[%c0_16, %c0_17] : memref<256x256xf32, #tpu.memory_space<vmem>>, vector<256x256xf32>
    %cst_18 = arith.constant dense<0.000000e+00> : vector<6x256xf32>
    %27 = tpu.matmul %25, %26, %cst_18 {dimension_numbers = #tpu.dot_dimension_numbers<[1], [0], [0], [1], [0, 0, 1, 1], [], []>} : vector<6x256xf32>, vector<256x256xf32>, vector<6x256xf32> -> vector<6x256xf32>
    %c0_19 = arith.constant 0 : index
    %c0_20 = arith.constant 0 : index
    %28 = vector.load %arg8[%c0_19, %c0_20] : memref<1x256xf32, #tpu.memory_space<vmem>>, vector<1x256xf32>
    %29 = vector.broadcast %28 : vector<1x256xf32> to vector<6x256xf32>
    %30 = arith.addf %27, %29 : vector<6x256xf32>
    %c0_21 = arith.constant 0 : index
    %c0_22 = arith.constant 0 : index
    %31 = vector.load %arg9[%c0_21, %c0_22] : memref<6x256xf32, #tpu.memory_space<vmem>>, vector<6x256xf32>
    tpu.vector_store %arg9[%c0_21, %c0_22], %30 {strides = array<i32>} : memref<6x256xf32, #tpu.memory_space<vmem>>, vector<6x256xf32>,
    return
  }
}

</mosaic_0001>

<bundles_post_ra>
// kernel: _lambda_.3
= control target key start
LH: loop header
LB: loop body
LE: loop exit
PB: predicated region body
PF: predicated region fallthrough
CT: control target
= control target key end

     0   :  { %9 = vsyncpa [#allocation3], 0  ;;  %s628_s0 = inlined_call_operand.vmem [shape: f32[5,384], index: 0, kind: input, shape index: {}]   ;;  %s629_s1 = inlined_call_operand.vmem [shape: f32[11,5], index: 1, kind: input, shape index: {}]   ;;  %s630_s2 = inlined_call_operand.vmem [shape: f32[21,11], index: 2, kind: input, shape index: {}]   ;;  %s631_s3 = inlined_call_operand.vmem [shape: f32[2], index: 3, kind: input, shape index: {}]   ;;  %s632_s4 = inlined_call_operand.vmem [shape: f32[21,384], index: 4, kind: output, shape index: {}]  }
   0x1   :  { %s22_s17 = sshll.u32 %s631_s3, 4  ;;  %s23_s17 = int_to_ptr.vmem [resolvable:$true] %s22_s17 }
   0x2   :  { %s511_s18 = scalar_lea.vmem %s23_s17, 16  ;;  %p516_p1 = scmp.lt.s32.totalorder %s23_s17, %s23_s17 }
   0x3   :  { %p512_p0 = scmp.ne.s32.totalorder %s23_s17, %s511_s18  ;;  %p517_p2 = scmp.lt.s32.totalorder %s511_s18, %s511_s18 }
   0x5   :  { %p518_p3 = por %p517_p2, %p516_p1 }
   0x7   :  { %p519_p4 = pnand %p518_p3, %p512_p0 }
   0x9   :  { %522 = shalt.err (!%p519_p4)
}
   0xa   :  { %s525_s19 = smov [#allocation2]  }
   0xb   :  { %25 = dma.vmem_to_smem %s23_s17, 16, %s525_s19, [#allocation3]  }
   0xc   :  { %523 = dma.done.wait [#allocation3], 16  }
   0xd   :  { %524 = vsyncadd [#allocation3], 4294967280 }
   0xe   :  { %29 = sfence }
   0xf   :  { %v33_v0 = vld [vmem:[%s628_s0 + $0x8] sm:$0x1f]  ;;  %vm42_vm0 = vcmask 1044480   ;;  %v34_v1 = vld [vmem:[%s628_s0 + $0x10] sm:$0x1f]  ;;  %v30_v3 = vld [vmem:[%s629_s1] sm:$0xff] }
  0x10   :  { %453 = vmatprep.subr.msk.mxu0 %vm42_vm0, %v33_v0  ;;  %478 = vmatprep.subr.msk.mxu1 %vm42_vm0, %v34_v1  ;;  %v32_v2 = vld [vmem:[%s628_s0] sm:$0x1f]  ;;  %vm35_vm1 = vcmask 39936   ;;  %v31_v4 = vld [vmem:[%s629_s1 + $0x8] sm:$0x7]  ;;  %v526_v5 = vmov 0.0  }
  0x11   :  { %454 = vmatpush1.msk.msra.mxu0 %vm42_vm0, %v32_v2  ;;  %116 = vmatprep.mubr.f32.mxu0 %v526_v5  ;;  %v527_v6 = vmov 0.0|0.0   ;;  %vm528_vm2 = vmmov 0   ;;  %s210_s0 = sld [smem:[#allocation2]]  ;;  %vm237_vm4 = vcmask 1042432   ;;  %vm529_vm7 = vmmov 1   ;;  %v224_v26 = vld [vmem:[%s630_s2] sm:$0xff] }
  0x12   :  { %479 = vmatpush3.msk.msra.mxu1 %vm42_vm0, %v34_v1  ;;  %480 = vmatprep.mubr.msk.f32.mxu1 %vm35_vm1, %v30_v3  ;;  %vm574_vm8 = vmpackc.low %vm237_vm4, %vm529_vm7  ;;  %vm227_vm12 = vcmask 89088   ;;  %v225_v31 = vld [vmem:[%s630_s2 + $0x8] sm:$0xff]  ;;  %v226_v32 = vld [vmem:[%s630_s2 + $0x10] sm:$0x1f]  ;;  %s469_s8 = sld [smem:[#allocation2 + $0x1]] }
  0x13   :  { %455 = vmatmul.mubr.msk.f32.vlgmr.msra.gmra.mrb[0].mxu0 %vm35_vm1, %v30_v3  ;;  %481 = vmatmul.mubr.msk.f32.vlgmr.msra.gmra.mrb[0].mxu1 %vm35_vm1, %v31_v4 }
  0x14   :  { %122 = vmatprep.mubr.f32.mxu0 %v526_v5  ;;  %311 = vmatprep.mubr.f32.mxu1 %v526_v5 }
  0x15   :  { %502 = vmatprep.subr.bf16.mxu0 %v527_v6 }
  0x17   :  { %456 = vmatmul.mubr.msk.f32.gmra.mrb[2].mxu0 %vm35_vm1, %v31_v4  ;;  %v211_v8 = vstv %s210_s0 }
  0x18   :  { %487 = vmatprep.mubr.msk.f32.mxu0 %vm528_vm2, %v526_v5  ;;  %v420_v33 = vstv %s469_s8 }
  0xe6   :  { %v118_v7 = vpop.f32.mrb[0].mxu0  ;;  %v482_v9 = vpop.f32.mrb[0].mxu1 }
  0xe7   :  { %vm209_vm3 = vcmp.ge.f32.partialorder %v482_v9, 0.0  ;;  %v217_v10 = vmul.f32 %v482_v9, %v211_v8  ;;  %v120_v11 = vpop.f32.mrb[1].mxu0  ;;  %v195_v12 = vpop.f32.mrb[1].mxu1  ;;  %v212_v14 = vmul.f32 %v211_v8, %v118_v7  ;;  %vm204_vm6 = vcmp.ge.f32.partialorder %v118_v7, 0.0 }
  0xe8   :  { %vm206_vm5 = vcmp.ge.f32.partialorder %v195_v12, 0.0  ;;  %v214_v13 = vmul.f32 %v211_v8, %v195_v12  ;;  %v213_v16 = vmul.f32 %v211_v8, %v120_v11  ;;  %vm205_vm9 = vcmp.ge.f32.partialorder %v120_v11, 0.0 }
  0xe9   :  { %v223_v15 = vsel %vm209_vm3, %v482_v9, %v217_v10  ;;  %v218_v24 = vsel %vm204_vm6, %v118_v7, %v212_v14 }
  0xea   :  { %v220_v17 = vsel %vm206_vm5, %v195_v12, %v214_v13  ;;  %v124_v18 = vpop.f32.mrb[2].mxu0  ;;  %v219_v27 = vsel %vm205_vm9, %v120_v11, %v213_v16 }
  0xeb   :  { %v503_v20 = vpack.c.bf16 %v223_v15, %v220_v17  ;;  %vm207_vm10 = vcmp.ge.f32.partialorder %v124_v18, 0.0  ;;  %v215_v21 = vmul.f32 %v211_v8, %v124_v18  ;;  %v126_v22 = vpop.f32.mrb[3].mxu0 }
  0xec   :  { %vm208_vm11 = vcmp.ge.f32.partialorder %v126_v22, 0.0  ;;  %v216_v23 = vmul.f32 %v211_v8, %v126_v22 }
  0xed   :  { %v221_v25 = vsel %vm207_vm10, %v124_v18, %v215_v21  ;;  %505 = vmatpush3.bf16.msk.msra.mxu0 %vm574_vm8, %v503_v20 }
  0xee   :  { %v499_v28 = vpack.c.bf16 %v221_v25, %v218_v24  ;;  %v222_v29 = vsel %vm208_vm11, %v126_v22, %v216_v23 }
  0xef   :  { %v496_v30 = vpack.c.bf16 %v222_v29, %v219_v27 }
  0xf0   :  { %488 = vmatmul.mubr.msk.f32.vlgmr.msra.gmra.mrb[4].mxu0 %vm227_vm12, %v224_v26 }
  0xf1   :  { %498 = vmatprep.subr.msk.bf16.mxu1 %vm574_vm8, %v496_v30  ;;  %490 = vmatprep.mubr.msk.f32.mxu0 %vm528_vm2, %v526_v5 }
  0xf2   :  { %501 = vmatpush1.bf16.msk.msra.mxu1 %vm574_vm8, %v499_v28 }
  0xf4   :  { %491 = vmatmul.mubr.msk.f32.gmra.mrb[6].mxu0 %vm227_vm12, %v225_v31 }
  0xf5   :  { %462 = vmatmul.mubr.msk.f32.vlgmr.msra.gmra.mrb[2].mxu1 %vm227_vm12, %v224_v26  ;;  %493 = vmatprep.mubr.msk.f32.mxu0 %vm528_vm2, %v526_v5 }
  0xf6   :  { %317 = vmatprep.mubr.f32.mxu1 %v526_v5 }
  0xf8   :  { %494 = vmatmul.mubr.msk.f32.gmra.mrb[8].mxu0 %vm227_vm12, %v226_v32 }
  0xf9   :  { %463 = vmatmul.mubr.msk.f32.gmra.mrb[4].mxu1 %vm227_vm12, %v225_v31 }
  0xfa   :  { %323 = vmatprep.mubr.f32.mxu1 %v526_v5 }
  0xfd   :  { %464 = vmatmul.mubr.msk.f32.gmra.mrb[6].mxu1 %vm227_vm12, %v226_v32 }
 0x1c3   :  { %v396_v34 = vpop.f32.mrb[4].mxu0 }
 0x1c4   :  { %vm412_vm13 = vcmp.ge.f32.partialorder %v396_v34, 0.0  ;;  %v423_v35 = vmul.f32 %v420_v33, %v396_v34  ;;  %v489_v36 = vpop.f32.mrb[5].mxu0 }
 0x1c6   :  { %v432_v37 = vsel %vm412_vm13, %v396_v34, %v423_v35 }
 0x1c7   :  { %441 = vst [vmem:[%s632_s4 + $0x10] sm:$0xff] %v432_v37  ;;  %v401_v38 = vpop.f32.mrb[6].mxu0 }
 0x1c8   :  { %v313_v39 = vpop.f32.mrb[2].mxu1  ;;  %vm415_vm14 = vcmp.ge.f32.partialorder %v401_v38, 0.0  ;;  %v426_v40 = vmul.f32 %v420_v33, %v401_v38  ;;  %v492_v41 = vpop.f32.mrb[7].mxu0 }
 0x1c9   :  { %vm410_vm15 = vcmp.ge.f32.partialorder %v313_v39, 0.0  ;;  %v421_v42 = vmul.f32 %v420_v33, %v313_v39  ;;  %v315_v43 = vpop.f32.mrb[3].mxu1 }
 0x1ca   :  { %vm411_vm0 = vcmp.ge.f32.partialorder %v315_v43, 0.0  ;;  %v422_v44 = vmul.f32 %v420_v33, %v315_v43  ;;  %v435_v45 = vsel %vm415_vm14, %v401_v38, %v426_v40 }
 0x1cb   :  { %v430_v46 = vsel %vm410_vm15, %v313_v39, %v421_v42  ;;  %444 = vst [vmem:[%s632_s4 + $0x28] sm:$0xff] %v435_v45  ;;  %v406_v47 = vpop.f32.mrb[8].mxu0 }
 0x1cc   :  { %439 = vst [vmem:[%s632_s4] sm:$0xff] %v430_v46  ;;  %v431_v48 = vsel %vm411_vm0, %v315_v43, %v422_v44  ;;  %v319_v49 = vpop.f32.mrb[4].mxu1  ;;  %vm418_vm1 = vcmp.ge.f32.partialorder %v406_v47, 0.0  ;;  %v429_v50 = vmul.f32 %v420_v33, %v406_v47  ;;  %v495_v51 = vpop.f32.mrb[9].mxu0 }
 0x1cd   :  { %440 = vst [vmem:[%s632_s4 + $0x8] sm:$0xff] %v431_v48  ;;  %vm413_vm2 = vcmp.ge.f32.partialorder %v319_v49, 0.0  ;;  %v424_v52 = vmul.f32 %v420_v33, %v319_v49  ;;  %v321_v53 = vpop.f32.mrb[5].mxu1 }
 0x1ce   :  { %vm414_vm3 = vcmp.ge.f32.partialorder %v321_v53, 0.0  ;;  %v425_v54 = vmul.f32 %v420_v33, %v321_v53  ;;  %v438_v55 = vsel %vm418_vm1, %v406_v47, %v429_v50 }
 0x1cf   :  { %v433_v56 = vsel %vm413_vm2, %v319_v49, %v424_v52  ;;  %447 = vst [vmem:[%s632_s4 + $0x40] sm:$0x1f] %v438_v55 }
 0x1d0   :  { %442 = vst [vmem:[%s632_s4 + $0x18] sm:$0xff] %v433_v56  ;;  %v434_v57 = vsel %vm414_vm3, %v321_v53, %v425_v54  ;;  %v325_v58 = vpop.f32.mrb[6].mxu1 }
 0x1d1   :  { %443 = vst [vmem:[%s632_s4 + $0x20] sm:$0xff] %v434_v57  ;;  %vm416_vm4 = vcmp.ge.f32.partialorder %v325_v58, 0.0  ;;  %v427_v59 = vmul.f32 %v420_v33, %v325_v58  ;;  %v327_v60 = vpop.f32.mrb[7].mxu1 }
 0x1d2   :  { %vm417_vm5 = vcmp.ge.f32.partialorder %v327_v60, 0.0  ;;  %v428_v61 = vmul.f32 %v420_v33, %v327_v60 }
 0x1d3   :  { %v436_v62 = vsel %vm416_vm4, %v325_v58, %v427_v59 }
 0x1d4   :  { %445 = vst [vmem:[%s632_s4 + $0x30] sm:$0x1f] %v436_v62  ;;  %v437_v63 = vsel %vm417_vm5, %v327_v60, %v428_v61 }
 0x1d5   :  { %446 = vst [vmem:[%s632_s4 + $0x38] sm:$0x1f] %v437_v63 }
 0x1d6   :  { %452 = vsyncpa [#allocation3], 1 }

// kernel: _lambda_.4
= control target key start
LH: loop header
LB: loop body
LE: loop exit
PB: predicated region body
PF: predicated region fallthrough
CT: control target
= control target key end

     0   :  { %10 = vsyncpa [#allocation3], 0  ;;  %s2940_s0 = inlined_call_operand.vmem [shape: f32[21,384], index: 0, kind: input, shape index: {}]   ;;  %s2941_s1 = inlined_call_operand.vmem [shape: f32[61,21], index: 1, kind: input, shape index: {}]   ;;  %s2942_s2 = inlined_call_operand.vmem [shape: f32[101,61], index: 2, kind: input, shape index: {}]   ;;  %s2943_s3 = inlined_call_operand.vmem [shape: f32[200,101], index: 3, kind: input, shape index: {}]   ;;  %s2944_s4 = inlined_call_operand.vmem [shape: f32[3], index: 4, kind: input, shape index: {}]   ;;  %s2945_s5 = inlined_call_operand.vmem [shape: f32[200,384], index: 5, kind: output, shape index: {}]  }
   0x1   :  { %s25_s20 = sshll.u32 %s2944_s4, 4  ;;  %s26_s20 = int_to_ptr.vmem [resolvable:$true] %s25_s20 }
   0x2   :  { %s2090_s21 = scalar_lea.vmem %s26_s20, 16  ;;  %p2095_p1 = scmp.lt.s32.totalorder %s26_s20, %s26_s20 }
   0x3   :  { %p2091_p0 = scmp.ne.s32.totalorder %s26_s20, %s2090_s21  ;;  %p2096_p2 = scmp.lt.s32.totalorder %s2090_s21, %s2090_s21 }
   0x5   :  { %p2097_p3 = por %p2096_p2, %p2095_p1 }
   0x7   :  { %p2098_p4 = pnand %p2097_p3, %p2091_p0 }
   0x9   :  { %2101 = shalt.err (!%p2098_p4)
}
   0xa   :  { %s2104_s22 = smov [#allocation2]  }
   0xb   :  { %28 = dma.vmem_to_smem %s26_s20, 16, %s2104_s22, [#allocation3]  }
   0xc   :  { %2102 = dma.done.wait [#allocation3], 16  }
   0xd   :  { %2103 = vsyncadd [#allocation3], 4294967280 }
   0xe   :  { %32 = sfence }
   0xf   :  { %v42_v0 = vld [vmem:[%s2940_s0 + $0x8] sm:$0xff]  ;;  %v45_v1 = vld [vmem:[%s2940_s0 + $0x20] sm:$0xff]  ;;  %v44_v4 = vld [vmem:[%s2940_s0 + $0x18] sm:$0xff]  ;;  %v2105_v5 = vmov 0.0   ;;  %vm75_vm0 = vcmask 1044480   ;;  %vm50_vm1 = vcmask 171008  }
  0x10   :  { %v41_v2 = vld [vmem:[%s2940_s0] sm:$0xff]  ;;  %v2000_v3 = vpack.c.bf16 %v45_v1, %v42_v0  ;;  %149 = vmatprep.mubr.f32.mxu0 %v2105_v5  ;;  %185 = vmatprep.mubr.f32.mxu1 %v2105_v5  ;;  %v48_v7 = vld [vmem:[%s2940_s0 + $0x38] sm:$0x1f]  ;;  %v43_v8 = vld [vmem:[%s2940_s0 + $0x10] sm:$0xff]  ;;  %v2106_v21 = vmov 0.0|0.0   ;;  %vm2107_vm2 = vmmov 0  }
  0x11   :  { %v2002_v6 = vpack.c.bf16 %v44_v4, %v41_v2  ;;  %v46_v9 = vld [vmem:[%s2940_s0 + $0x28] sm:$0xff]  ;;  %v47_v10 = vld [vmem:[%s2940_s0 + $0x30] sm:$0x1f]  ;;  %v33_v11 = vld [vmem:[%s2941_s1] sm:$0xff]  ;;  %s1701_s28 = sld [smem:[#allocation2 + $0x1]]  ;;  %s1755_s23 = sld [smem:[#allocation2 + $0x2]] }
  0x12   :  { %2001 = vmatprep.subr.bf16.mxu0 %v2000_v3  ;;  %2081 = vmatprep.subr.bf16.mxu1 %v2000_v3  ;;  %v39_v12 = vld [vmem:[%s2941_s1 + $0x30] sm:$0xff]  ;;  %v2004_v13 = vpack.c.bf16 %v46_v9, %v43_v8  ;;  %v34_v14 = vld [vmem:[%s2941_s1 + $0x8] sm:$0xff]  ;;  %v40_v15 = vld [vmem:[%s2941_s1 + $0x38] sm:$0x1f] }
  0x13   :  { %2003 = vmatpush1.bf16.msra.mxu0 %v2002_v6  ;;  %2083 = vmatpush1.bf16.msra.mxu1 %v2002_v6  ;;  %v49_v16 = vld [vmem:[%s2940_s0 + $0x40] sm:$0x1f]  ;;  %v35_v17 = vld [vmem:[%s2941_s1 + $0x10] sm:$0xff]  ;;  %v36_v18 = vld [vmem:[%s2941_s1 + $0x18] sm:$0xff] }
  0x14   :  { %1653 = vmatprep.subr.msk.mxu0 %vm75_vm0, %v48_v7  ;;  %2082 = vmatprep.subr.msk.mxu1 %vm75_vm0, %v48_v7  ;;  %v37_v19 = vld [vmem:[%s2941_s1 + $0x20] sm:$0xff]  ;;  %v38_v20 = vld [vmem:[%s2941_s1 + $0x28] sm:$0xff]  ;;  %s327_s1 = sld [smem:[#allocation2]] }
  0x17   :  { %1654 = vmatpush1.msk.msra.mxu0 %vm75_vm0, %v47_v10  ;;  %2084 = vmatpush1.msk.msra.mxu1 %vm75_vm0, %v47_v10 }
  0x18   :  { %1655 = vmatmul.mubr.msk.f32.vlgmr.msra.gmra.mrb[0].mxu0 %vm50_vm1, %v33_v11  ;;  %1661 = vmatmul.mubr.msk.f32.vlgmr.msra.gmra.mrb[0].mxu1 %vm50_vm1, %v39_v12 }
  0x19   :  { %155 = vmatprep.mubr.f32.mxu0 %v2105_v5  ;;  %191 = vmatprep.mubr.f32.mxu1 %v2105_v5 }
  0x1a   :  { %2005 = vmatprep.subr.bf16.mxu1 %v2004_v13  ;;  %2026 = vmatprep.subr.bf16.mxu0 %v2106_v21  ;;  %v2227_v23 = vstv %s327_s1 }
  0x1b   :  { %2007 = vmatpush3.bf16.msra.mxu1 %v2004_v13 }
  0x1c   :  { %1656 = vmatmul.mubr.msk.f32.gmra.mrb[2].mxu0 %vm50_vm1, %v34_v14  ;;  %1662 = vmatmul.mubr.msk.f32.gmra.mrb[2].mxu1 %vm50_vm1, %v40_v15 }
  0x1d   :  { %161 = vmatprep.mubr.f32.mxu0 %v2105_v5  ;;  %1830 = vmatprep.subr.msk.mxu1 %vm75_vm0, %v49_v16 }
  0x1e   :  { %1832 = vmatprep.mubr.msk.f32.mxu1 %vm50_vm1, %v33_v11 }
  0x1f   :  { %1831 = vmatpush3.msk.msra.mxu1 %vm75_vm0, %v49_v16 }
  0x20   :  { %1657 = vmatmul.mubr.msk.f32.gmra.mrb[4].mxu0 %vm50_vm1, %v35_v17  ;;  %1833 = vmatmul.mubr.msk.f32.vlgmr.msra.gmra.mrb[4].mxu1 %vm50_vm1, %v34_v14 }
  0x21   :  { %167 = vmatprep.mubr.f32.mxu0 %v2105_v5  ;;  %1835 = vmatprep.mubr.msk.f32.mxu1 %vm50_vm1, %v35_v17 }
  0x24   :  { %1658 = vmatmul.mubr.msk.f32.gmra.mrb[6].mxu0 %vm50_vm1, %v36_v18  ;;  %1836 = vmatmul.mubr.msk.f32.gmra.mrb[6].mxu1 %vm50_vm1, %v36_v18 }
  0x25   :  { %173 = vmatprep.mubr.f32.mxu0 %v2105_v5  ;;  %1838 = vmatprep.mubr.msk.f32.mxu1 %vm50_vm1, %v37_v19 }
  0x28   :  { %1659 = vmatmul.mubr.msk.f32.gmra.mrb[8].mxu0 %vm50_vm1, %v37_v19  ;;  %1839 = vmatmul.mubr.msk.f32.gmra.mrb[8].mxu1 %vm50_vm1, %v38_v20 }
  0x29   :  { %179 = vmatprep.mubr.f32.mxu0 %v2105_v5  ;;  %1841 = vmatprep.mubr.msk.f32.mxu1 %vm50_vm1, %v39_v12 }
  0x2c   :  { %1660 = vmatmul.mubr.msk.f32.gmra.mrb[10].mxu0 %vm50_vm1, %v38_v20  ;;  %1842 = vmatmul.mubr.msk.f32.gmra.mrb[10].mxu1 %vm50_vm1, %v40_v15 }
  0x2d   :  { %503 = vmatprep.mubr.f32.mxu1 %v2105_v5  ;;  %1860 = vmatprep.mubr.msk.f32.mxu0 %vm2107_vm2, %v2105_v5 }
  0xeb   :  { %v151_v22 = vpop.f32.mrb[0].mxu0  ;;  %v187_v24 = vpop.f32.mrb[0].mxu1 }
  0xec   :  { %v153_v25 = vpop.f32.mrb[1].mxu0  ;;  %vm321_vm3 = vcmp.ge.f32.partialorder %v187_v24, 0.0  ;;  %v347_v26 = vmul.f32 %v2227_v23, %v187_v24  ;;  %v189_v27 = vpop.f32.mrb[1].mxu1  ;;  %v329_v29 = vmul.f32 %v2227_v23, %v151_v22  ;;  %vm303_vm5 = vcmp.ge.f32.partialorder %v151_v22, 0.0 }
  0xed   :  { %vm322_vm4 = vcmp.ge.f32.partialorder %v189_v27, 0.0  ;;  %v348_v28 = vmul.f32 %v2227_v23, %v189_v27  ;;  %v330_v30 = vmul.f32 %v2227_v23, %v153_v25  ;;  %vm304_vm10 = vcmp.ge.f32.partialorder %v153_v25, 0.0 }
  0xee   :  { %v2233_v31 = vsel %vm321_vm3, %v187_v24, %v347_v26  ;;  %v353_v41 = vsel %vm303_vm5, %v151_v22, %v329_v29 }
  0xef   :  { %v157_v32 = vpop.f32.mrb[2].mxu0  ;;  %v2235_v33 = vsel %vm322_vm4, %v189_v27, %v348_v28  ;;  %v193_v34 = vpop.f32.mrb[2].mxu1  ;;  %v354_v53 = vsel %vm304_vm10, %v153_v25, %v330_v30 }
  0xf0   :  { %vm306_vm6 = vcmp.ge.f32.partialorder %v157_v32, 0.0  ;;  %v332_v35 = vmul.f32 %v2227_v23, %v157_v32  ;;  %v159_v36 = vpop.f32.mrb[3].mxu0  ;;  %vm324_vm7 = vcmp.ge.f32.partialorder %v193_v34, 0.0  ;;  %v350_v37 = vmul.f32 %v2227_v23, %v193_v34  ;;  %v195_v38 = vpop.f32.mrb[3].mxu1 }
  0xf1   :  { %vm307_vm8 = vcmp.ge.f32.partialorder %v159_v36, 0.0  ;;  %v333_v39 = vmul.f32 %v2227_v23, %v159_v36  ;;  %vm325_vm9 = vcmp.ge.f32.partialorder %v195_v38, 0.0  ;;  %v351_v40 = vmul.f32 %v2227_v23, %v195_v38 }
  0xf2   :  { %v356_v42 = vsel %vm306_vm6, %v157_v32, %v332_v35  ;;  %v2242_v43 = vsel %vm324_vm7, %v193_v34, %v350_v37 }
  0xf3   :  { %v2010_v44 = vpack.c.bf16 %v356_v42, %v353_v41  ;;  %v357_v45 = vsel %vm307_vm8, %v159_v36, %v333_v39  ;;  %v2023_v46 = vpack.c.bf16 %v2242_v43, %v2233_v31  ;;  %v2246_v47 = vsel %vm325_vm9, %v195_v38, %v351_v40  ;;  %v163_v48 = vpop.f32.mrb[4].mxu0  ;;  %v1834_v49 = vpop.f32.mrb[4].mxu1  ;;  %v379_v31 = vld [vmem:[%s2942_s2 + $0x10] sm:$0xff]  ;;  %v381_v43 = vld [vmem:[%s2942_s2 + $0x20] sm:$0xff] }
  0xf4   :  { %v2020_v50 = vpack.c.bf16 %v2246_v47, %v2235_v33  ;;  %v165_v51 = vpop.f32.mrb[5].mxu0  ;;  %vm308_vm11 = vcmp.ge.f32.partialorder %v1834_v49, 0.0  ;;  %v264_v52 = vpop.f32.mrb[5].mxu1  ;;  %v334_v54 = vmul.f32 %v1834_v49, %v2227_v23  ;;  %v335_v55 = vmul.f32 %v2227_v23, %v163_v48  ;;  %v380_v33 = vld [vmem:[%s2942_s2 + $0x18] sm:$0xff]  ;;  %v383_v47 = vld [vmem:[%s2942_s2 + $0x30] sm:$0xff] }
  0xf5   :  { %vm305_vm12 = vcmp.ge.f32.partialorder %v264_v52, 0.0  ;;  %v331_v56 = vmul.f32 %v2227_v23, %v264_v52  ;;  %v2008_v57 = vpack.c.bf16 %v357_v45, %v354_v53  ;;  %vm309_vm13 = vcmp.ge.f32.partialorder %v163_v48, 0.0  ;;  %v385_v53 = vld [vmem:[%s2942_s2 + $0x40] sm:$0xff] }
  0xf6   :  { %vm310_vm14 = vcmp.ge.f32.partialorder %v165_v51, 0.0  ;;  %v336_v58 = vmul.f32 %v2227_v23, %v165_v51  ;;  %v358_v59 = vsel %vm308_vm11, %v1834_v49, %v334_v54  ;;  %v359_v6 = vsel %vm309_vm13, %v163_v48, %v335_v55  ;;  %v386_v54 = vld [vmem:[%s2942_s2 + $0x48] sm:$0xff]  ;;  %v387_v55 = vld [vmem:[%s2942_s2 + $0x50] sm:$0xff] }
  0xf7   :  { %v169_v60 = vpop.f32.mrb[6].mxu0  ;;  %v1837_v61 = vpop.f32.mrb[6].mxu1  ;;  %v355_v62 = vsel %vm305_vm12, %v264_v52, %v331_v56  ;;  %2009 = vmatprep.subr.bf16.mxu1 %v2008_v57  ;;  %vm2108_vm13 = vmmov 1   ;;  %v378_v52 = vld [vmem:[%s2942_s2 + $0x8] sm:$0xff]  ;;  %v388_v56 = vld [vmem:[%s2942_s2 + $0x58] sm:$0xff] }
  0xf8   :  { %vm312_vm15 = vcmp.ge.f32.partialorder %v169_v60, 0.0  ;;  %v338_v63 = vmul.f32 %v2227_v23, %v169_v60  ;;  %v171_v0 = vpop.f32.mrb[7].mxu0  ;;  %vm314_vm1 = vcmp.ge.f32.partialorder %v1837_v61, 0.0  ;;  %v274_v1 = vpop.f32.mrb[7].mxu1  ;;  %v2027_v2 = vpack.c.bf16 %v358_v59, %v355_v62  ;;  %2011 = vmatpush1.bf16.msra.mxu1 %v2010_v44  ;;  %v389_v57 = vld [vmem:[%s2942_s2 + $0x60] sm:$0x1f] }
  0xf9   :  { %vm313_vm3 = vcmp.ge.f32.partialorder %v171_v0, 0.0  ;;  %v339_v3 = vmul.f32 %v2227_v23, %v171_v0  ;;  %v340_v4 = vmul.f32 %v1837_v61, %v2227_v23  ;;  %vm311_vm4 = vcmp.ge.f32.partialorder %v274_v1, 0.0 }
  0xfa   :  { %v362_v7 = vsel %vm312_vm15, %v169_v60, %v338_v63  ;;  %v337_v8 = vmul.f32 %v2227_v23, %v274_v1  ;;  %2028 = vmatpush3.bf16.msra.mxu0 %v2027_v2  ;;  %v360_v17 = vsel %vm310_vm14, %v165_v51, %v336_v58  ;;  %vm2021_vm14 = vmpackc.low %vm75_vm0, %vm2108_vm13  ;;  %vm390_vm15 = vcmask 498688  }
  0xfb   :  { %v2014_v9 = vpack.c.bf16 %v362_v7, %v359_v6  ;;  %v363_v10 = vsel %vm313_vm3, %v171_v0, %v339_v3  ;;  %v364_v11 = vsel %vm314_vm1, %v1837_v61, %v340_v4  ;;  %v175_v12 = vpop.f32.mrb[8].mxu0  ;;  %v1840_v13 = vpop.f32.mrb[8].mxu1  ;;  %2029 = vmatprep.subr.bf16.mxu0 %v2106_v21  ;;  %v2385_v58 = vstv %s1701_s28 }
  0xfc   :  { %v361_v14 = vsel %vm311_vm4, %v274_v1, %v337_v8  ;;  %v177_v15 = vpop.f32.mrb[9].mxu0  ;;  %vm320_vm5 = vcmp.ge.f32.partialorder %v1840_v13, 0.0  ;;  %v284_v16 = vpop.f32.mrb[9].mxu1  ;;  %v346_v19 = vmul.f32 %v1840_v13, %v2227_v23  ;;  %v341_v20 = vmul.f32 %v2227_v23, %v175_v12 }
  0xfd   :  { %v2030_v18 = vpack.c.bf16 %v364_v11, %v361_v14  ;;  %vm317_vm6 = vcmp.ge.f32.partialorder %v284_v16, 0.0  ;;  %v343_v22 = vmul.f32 %v2227_v23, %v284_v16  ;;  %v2012_v24 = vpack.c.bf16 %v363_v10, %v360_v17 }
  0xfe   :  { %vm315_vm7 = vcmp.ge.f32.partialorder %v175_v12, 0.0  ;;  %vm316_vm8 = vcmp.ge.f32.partialorder %v177_v15, 0.0  ;;  %v342_v25 = vmul.f32 %v2227_v23, %v177_v15  ;;  %v370_v26 = vsel %vm320_vm5, %v1840_v13, %v346_v19 }
  0xff   :  { %v181_v27 = vpop.f32.mrb[10].mxu0  ;;  %2031 = vmatpush3.bf16.msra.mxu0 %v2030_v18  ;;  %v1843_v28 = vpop.f32.mrb[10].mxu1  ;;  %v367_v29 = vsel %vm317_vm6, %v284_v16, %v343_v22  ;;  %2013 = vmatprep.subr.bf16.mxu1 %v2012_v24  ;;  %v365_v38 = vsel %vm315_vm7, %v175_v12, %v341_v20 }
 0x100   :  { %vm318_vm9 = vcmp.ge.f32.partialorder %v181_v27, 0.0  ;;  %v344_v30 = vmul.f32 %v2227_v23, %v181_v27  ;;  %v183_v32 = vpop.f32.mrb[11].mxu0  ;;  %vm326_vm10 = vcmp.ge.f32.partialorder %v1843_v28, 0.0  ;;  %v294_v34 = vpop.f32.mrb[11].mxu1  ;;  %2032 = vmatprep.subr.bf16.mxu0 %v2106_v21  ;;  %v2033_v35 = vpack.c.bf16 %v370_v26, %v367_v29  ;;  %2015 = vmatpush1.bf16.msra.mxu1 %v2014_v9 }
 0x101   :  { %vm319_vm11 = vcmp.ge.f32.partialorder %v183_v32, 0.0  ;;  %v345_v36 = vmul.f32 %v2227_v23, %v183_v32  ;;  %v352_v37 = vmul.f32 %v1843_v28, %v2227_v23  ;;  %vm323_vm12 = vcmp.ge.f32.partialorder %v294_v34, 0.0 }
 0x102   :  { %v368_v39 = vsel %vm318_vm9, %v181_v27, %v344_v30  ;;  %v349_v40 = vmul.f32 %v2227_v23, %v294_v34  ;;  %v366_v41 = vsel %vm316_vm8, %v177_v15, %v342_v25  ;;  %v377_v23 = vld [vmem:[%s2942_s2] sm:$0xff] }
 0x103   :  { %v2018_v42 = vpack.c.bf16 %v368_v39, %v365_v38  ;;  %v369_v44 = vsel %vm319_vm11, %v183_v32, %v345_v36  ;;  %v376_v45 = vsel %vm326_vm10, %v1843_v28, %v352_v37  ;;  %2034 = vmatpush3.bf16.msra.mxu0 %v2033_v35 }
 0x104   :  { %v373_v48 = vsel %vm323_vm12, %v294_v34, %v349_v40  ;;  %v2016_v49 = vpack.c.bf16 %v369_v44, %v366_v41  ;;  %2035 = vmatprep.subr.bf16.mxu0 %v2106_v21 }
 0x105   :  { %v2036_v51 = vpack.c.bf16 %v376_v45, %v373_v48 }
 0x106   :  { %2017 = vmatprep.subr.bf16.mxu1 %v2016_v49 }
 0x107   :  { %2019 = vmatpush1.bf16.msra.mxu1 %v2018_v42  ;;  %2038 = vmatpush3.bf16.msk.msra.mxu0 %vm2021_vm14, %v2036_v51 }
 0x108   :  { %2022 = vmatprep.subr.msk.bf16.mxu1 %vm2021_vm14, %v2020_v50  ;;  %2063 = vmatprep.subr.bf16.mxu0 %v2106_v21  ;;  %v384_v50 = vld [vmem:[%s2942_s2 + $0x38] sm:$0xff] }
 0x10a   :  { %1861 = vmatmul.mubr.msk.f32.vlgmr.msra.gmra.mrb[12].mxu0 %vm390_vm15, %v377_v23 }
 0x10b   :  { %2025 = vmatpush1.bf16.msk.msra.mxu1 %vm2021_vm14, %v2023_v46  ;;  %1863 = vmatprep.mubr.msk.f32.mxu0 %vm2107_vm2, %v2105_v5  ;;  %v382_v46 = vld [vmem:[%s2942_s2 + $0x28] sm:$0xff] }
 0x10e   :  { %1674 = vmatmul.mubr.msk.f32.vlgmr.msra.gmra.mrb[12].mxu1 %vm390_vm15, %v377_v23  ;;  %1864 = vmatmul.mubr.msk.f32.gmra.mrb[14].mxu0 %vm390_vm15, %v378_v52 }
 0x10f   :  { %509 = vmatprep.mubr.f32.mxu1 %v2105_v5  ;;  %1866 = vmatprep.mubr.msk.f32.mxu0 %vm2107_vm2, %v2105_v5 }
 0x112   :  { %1675 = vmatmul.mubr.msk.f32.gmra.mrb[14].mxu1 %vm390_vm15, %v378_v52  ;;  %1867 = vmatmul.mubr.msk.f32.gmra.mrb[16].mxu0 %vm390_vm15, %v379_v31 }
 0x113   :  { %515 = vmatprep.mubr.f32.mxu1 %v2105_v5  ;;  %1869 = vmatprep.mubr.msk.f32.mxu0 %vm2107_vm2, %v2105_v5 }
 0x116   :  { %1676 = vmatmul.mubr.msk.f32.gmra.mrb[16].mxu1 %vm390_vm15, %v379_v31  ;;  %1870 = vmatmul.mubr.msk.f32.gmra.mrb[18].mxu0 %vm390_vm15, %v380_v33 }
 0x117   :  { %521 = vmatprep.mubr.f32.mxu1 %v2105_v5  ;;  %1872 = vmatprep.mubr.msk.f32.mxu0 %vm2107_vm2, %v2105_v5 }
 0x11a   :  { %1677 = vmatmul.mubr.msk.f32.gmra.mrb[18].mxu1 %vm390_vm15, %v380_v33  ;;  %1873 = vmatmul.mubr.msk.f32.gmra.mrb[20].mxu0 %vm390_vm15, %v381_v43 }
 0x11b   :  { %527 = vmatprep.mubr.f32.mxu1 %v2105_v5  ;;  %1875 = vmatprep.mubr.msk.f32.mxu0 %vm2107_vm2, %v2105_v5 }
 0x11e   :  { %1678 = vmatmul.mubr.msk.f32.gmra.mrb[20].mxu1 %vm390_vm15, %v381_v43  ;;  %1876 = vmatmul.mubr.msk.f32.gmra.mrb[22].mxu0 %vm390_vm15, %v382_v46 }
 0x11f   :  { %533 = vmatprep.mubr.f32.mxu1 %v2105_v5  ;;  %1878 = vmatprep.mubr.msk.f32.mxu0 %vm2107_vm2, %v2105_v5 }
 0x122   :  { %1679 = vmatmul.mubr.msk.f32.gmra.mrb[22].mxu1 %vm390_vm15, %v382_v46  ;;  %1879 = vmatmul.mubr.msk.f32.gmra.mrb[24].mxu0 %vm390_vm15, %v383_v47 }
 0x123   :  { %539 = vmatprep.mubr.f32.mxu1 %v2105_v5  ;;  %1881 = vmatprep.mubr.msk.f32.mxu0 %vm2107_vm2, %v2105_v5 }
 0x126   :  { %1680 = vmatmul.mubr.msk.f32.gmra.mrb[24].mxu1 %vm390_vm15, %v383_v47  ;;  %1882 = vmatmul.mubr.msk.f32.gmra.mrb[26].mxu0 %vm390_vm15, %v384_v50 }
 0x127   :  { %545 = vmatprep.mubr.f32.mxu1 %v2105_v5  ;;  %1884 = vmatprep.mubr.msk.f32.mxu0 %vm2107_vm2, %v2105_v5 }
 0x12a   :  { %1681 = vmatmul.mubr.msk.f32.gmra.mrb[26].mxu1 %vm390_vm15, %v384_v50  ;;  %1885 = vmatmul.mubr.msk.f32.gmra.mrb[28].mxu0 %vm390_vm15, %v385_v53 }
 0x12b   :  { %551 = vmatprep.mubr.f32.mxu1 %v2105_v5  ;;  %1887 = vmatprep.mubr.msk.f32.mxu0 %vm2107_vm2, %v2105_v5 }
 0x12e   :  { %1682 = vmatmul.mubr.msk.f32.gmra.mrb[28].mxu1 %vm390_vm15, %v385_v53  ;;  %1888 = vmatmul.mubr.msk.f32.gmra.mrb[30].mxu0 %vm390_vm15, %v386_v54 }
 0x12f   :  { %557 = vmatprep.mubr.f32.mxu1 %v2105_v5  ;;  %1890 = vmatprep.mubr.msk.f32.mxu0 %vm2107_vm2, %v2105_v5 }
 0x132   :  { %1683 = vmatmul.mubr.msk.f32.gmra.mrb[30].mxu1 %vm390_vm15, %v386_v54  ;;  %1891 = vmatmul.mubr.msk.f32.gmra.mrb[32].mxu0 %vm390_vm15, %v387_v55 }
 0x133   :  { %563 = vmatprep.mubr.f32.mxu1 %v2105_v5  ;;  %1893 = vmatprep.mubr.msk.f32.mxu0 %vm2107_vm2, %v2105_v5 }
 0x136   :  { %1684 = vmatmul.mubr.msk.f32.gmra.mrb[32].mxu1 %vm390_vm15, %v387_v55  ;;  %1894 = vmatmul.mubr.msk.f32.gmra.mrb[34].mxu0 %vm390_vm15, %v388_v56 }
 0x137   :  { %569 = vmatprep.mubr.f32.mxu1 %v2105_v5  ;;  %1896 = vmatprep.mubr.msk.f32.mxu0 %vm2107_vm2, %v2105_v5 }
 0x13a   :  { %1685 = vmatmul.mubr.msk.f32.gmra.mrb[34].mxu1 %vm390_vm15, %v388_v56  ;;  %1897 = vmatmul.mubr.msk.f32.gmra.mrb[36].mxu0 %vm390_vm15, %v389_v57 }
 0x13b   :  { %575 = vmatprep.mubr.f32.mxu1 %v2105_v5  ;;  %1925 = vmatprep.mubr.msk.f32.mxu0 %vm2107_vm2, %v2105_v5 }
 0x13e   :  { %1686 = vmatmul.mubr.msk.f32.gmra.mrb[36].mxu1 %vm390_vm15, %v389_v57 }
 0x13f   :  { %1005 = vmatprep.mubr.f32.mxu1 %v2105_v5 }
 0x1dd   :  { %v648_v59 = vpop.f32.mrb[12].mxu0 }
 0x1de   :  { %v755_v60 = vmul.f32 %v2385_v58, %v648_v59  ;;  %v1862_v61 = vpop.f32.mrb[13].mxu0  ;;  %vm714_vm1 = vcmp.ge.f32.partialorder %v648_v59, 0.0 }
 0x1e0   :  { %v794_v0 = vsel %vm714_vm1, %v648_v59, %v755_v60 }
 0x1e1   :  { %v505_v62 = vpop.f32.mrb[12].mxu1  ;;  %v653_v63 = vpop.f32.mrb[14].mxu0 }
 0x1e2   :  { %v507_v1 = vpop.f32.mrb[13].mxu1  ;;  %vm717_vm3 = vcmp.ge.f32.partialorder %v653_v63, 0.0  ;;  %v758_v2 = vmul.f32 %v2385_v58, %v653_v63  ;;  %v1865_v3 = vpop.f32.mrb[15].mxu0  ;;  %v753_v4 = vmul.f32 %v2385_v58, %v505_v62  ;;  %vm712_vm4 = vcmp.ge.f32.partialorder %v505_v62, 0.0 }
 0x1e3   :  { %v754_v10 = vmul.f32 %v2385_v58, %v507_v1  ;;  %vm713_vm6 = vcmp.ge.f32.partialorder %v507_v1, 0.0 }
 0x1e4   :  { %v797_v6 = vsel %vm717_vm3, %v653_v63, %v758_v2  ;;  %v792_v16 = vsel %vm712_vm4, %v505_v62, %v753_v4 }
 0x1e5   :  { %v2064_v7 = vpack.c.bf16 %v797_v6, %v794_v0  ;;  %v511_v8 = vpop.f32.mrb[14].mxu1  ;;  %v658_v9 = vpop.f32.mrb[16].mxu0  ;;  %v793_v24 = vsel %vm713_vm6, %v507_v1, %v754_v10 }
 0x1e6   :  { %vm715_vm5 = vcmp.ge.f32.partialorder %v511_v8, 0.0  ;;  %v756_v11 = vmul.f32 %v2385_v58, %v511_v8  ;;  %v513_v12 = vpop.f32.mrb[15].mxu1  ;;  %v761_v13 = vmul.f32 %v2385_v58, %v658_v9  ;;  %v1868_v14 = vpop.f32.mrb[17].mxu0  ;;  %vm720_vm8 = vcmp.ge.f32.partialorder %v658_v9, 0.0 }
 0x1e7   :  { %vm716_vm7 = vcmp.ge.f32.partialorder %v513_v12, 0.0  ;;  %v757_v15 = vmul.f32 %v2385_v58, %v513_v12  ;;  %2065 = vmatpush3.bf16.msra.mxu0 %v2064_v7 }
 0x1e8   :  { %v795_v17 = vsel %vm715_vm5, %v511_v8, %v756_v11  ;;  %2066 = vmatprep.subr.bf16.mxu0 %v2106_v21  ;;  %v800_v25 = vsel %vm720_vm8, %v658_v9, %v761_v13 }
 0x1e9   :  { %v2041_v18 = vpack.c.bf16 %v795_v17, %v792_v16  ;;  %v796_v19 = vsel %vm716_vm7, %v513_v12, %v757_v15  ;;  %v517_v20 = vpop.f32.mrb[16].mxu1  ;;  %v663_v22 = vpop.f32.mrb[18].mxu0 }
 0x1ea   :  { %v519_v26 = vpop.f32.mrb[17].mxu1  ;;  %vm723_vm9 = vcmp.ge.f32.partialorder %v663_v22, 0.0  ;;  %v764_v27 = vmul.f32 %v2385_v58, %v663_v22  ;;  %v1871_v28 = vpop.f32.mrb[19].mxu0  ;;  %v2039_v29 = vpack.c.bf16 %v796_v19, %v793_v24  ;;  %v759_v30 = vmul.f32 %v2385_v58, %v517_v20 }
 0x1eb   :  { %vm718_vm10 = vcmp.ge.f32.partialorder %v517_v20, 0.0  ;;  %v760_v37 = vmul.f32 %v2385_v58, %v519_v26  ;;  %vm719_vm12 = vcmp.ge.f32.partialorder %v519_v26, 0.0 }
 0x1ec   :  { %v803_v32 = vsel %vm723_vm9, %v663_v22, %v764_v27  ;;  %2040 = vmatprep.subr.bf16.mxu1 %v2039_v29  ;;  %v798_v44 = vsel %vm718_vm10, %v517_v20, %v759_v30 }
 0x1ed   :  { %v2067_v34 = vpack.c.bf16 %v803_v32, %v800_v25  ;;  %v523_v35 = vpop.f32.mrb[18].mxu1  ;;  %v668_v36 = vpop.f32.mrb[20].mxu0  ;;  %2042 = vmatpush1.bf16.msra.mxu1 %v2041_v18  ;;  %v799_v52 = vsel %vm719_vm12, %v519_v26, %v760_v37 }
 0x1ee   :  { %vm721_vm11 = vcmp.ge.f32.partialorder %v523_v35, 0.0  ;;  %v762_v38 = vmul.f32 %v2385_v58, %v523_v35  ;;  %v525_v39 = vpop.f32.mrb[19].mxu1  ;;  %v767_v40 = vmul.f32 %v2385_v58, %v668_v36  ;;  %v1874_v41 = vpop.f32.mrb[21].mxu0  ;;  %vm726_vm14 = vcmp.ge.f32.partialorder %v668_v36, 0.0 }
 0x1ef   :  { %vm722_vm13 = vcmp.ge.f32.partialorder %v525_v39, 0.0  ;;  %v763_v42 = vmul.f32 %v2385_v58, %v525_v39  ;;  %2068 = vmatpush3.bf16.msra.mxu0 %v2067_v34 }
 0x1f0   :  { %v801_v45 = vsel %vm721_vm11, %v523_v35, %v762_v38  ;;  %2069 = vmatprep.subr.bf16.mxu0 %v2106_v21  ;;  %v806_v31 = vsel %vm726_vm14, %v668_v36, %v767_v40 }
 0x1f1   :  { %v2045_v48 = vpack.c.bf16 %v801_v45, %v798_v44  ;;  %v802_v49 = vsel %vm722_vm13, %v525_v39, %v763_v42  ;;  %v529_v51 = vpop.f32.mrb[20].mxu1  ;;  %v673_v23 = vpop.f32.mrb[22].mxu0 }
 0x1f2   :  { %v531_v33 = vpop.f32.mrb[21].mxu1  ;;  %vm729_vm15 = vcmp.ge.f32.partialorder %v673_v23, 0.0  ;;  %v770_v43 = vmul.f32 %v2385_v58, %v673_v23  ;;  %v1877_v46 = vpop.f32.mrb[23].mxu0  ;;  %v2043_v47 = vpack.c.bf16 %v802_v49, %v799_v52  ;;  %v765_v50 = vmul.f32 %v2385_v58, %v529_v51 }
 0x1f3   :  { %vm724_vm1 = vcmp.ge.f32.partialorder %v529_v51, 0.0  ;;  %v766_v57 = vmul.f32 %v2385_v58, %v531_v33  ;;  %vm725_vm4 = vcmp.ge.f32.partialorder %v531_v33, 0.0 }
 0x1f4   :  { %v809_v53 = vsel %vm729_vm15, %v673_v23, %v770_v43  ;;  %2044 = vmatprep.subr.bf16.mxu1 %v2043_v47  ;;  %v804_v0 = vsel %vm724_vm1, %v529_v51, %v765_v50 }
 0x1f5   :  { %v2070_v54 = vpack.c.bf16 %v809_v53, %v806_v31  ;;  %v535_v55 = vpop.f32.mrb[22].mxu1  ;;  %v678_v56 = vpop.f32.mrb[24].mxu0  ;;  %2046 = vmatpush1.bf16.msra.mxu1 %v2045_v48  ;;  %v805_v7 = vsel %vm725_vm4, %v531_v33, %v766_v57 }
 0x1f6   :  { %vm727_vm3 = vcmp.ge.f32.partialorder %v535_v55, 0.0  ;;  %v768_v59 = vmul.f32 %v2385_v58, %v535_v55  ;;  %v537_v60 = vpop.f32.mrb[23].mxu1  ;;  %v773_v61 = vmul.f32 %v2385_v58, %v678_v56  ;;  %v1880_v62 = vpop.f32.mrb[25].mxu0  ;;  %vm732_vm6 = vcmp.ge.f32.partialorder %v678_v56, 0.0 }
 0x1f7   :  { %vm728_vm5 = vcmp.ge.f32.partialorder %v537_v60, 0.0  ;;  %v769_v63 = vmul.f32 %v2385_v58, %v537_v60  ;;  %2071 = vmatpush3.bf16.msra.mxu0 %v2070_v54 }
 0x1f8   :  { %v807_v1 = vsel %vm727_vm3, %v535_v55, %v768_v59  ;;  %2072 = vmatprep.subr.bf16.mxu0 %v2106_v21  ;;  %v812_v8 = vsel %vm732_vm6, %v678_v56, %v773_v61 }
 0x1f9   :  { %v2049_v2 = vpack.c.bf16 %v807_v1, %v804_v0  ;;  %v808_v3 = vsel %vm728_vm5, %v537_v60, %v769_v63  ;;  %v541_v4 = vpop.f32.mrb[24].mxu1  ;;  %v683_v6 = vpop.f32.mrb[26].mxu0 }
 0x1fa   :  { %v543_v9 = vpop.f32.mrb[25].mxu1  ;;  %vm735_vm7 = vcmp.ge.f32.partialorder %v683_v6, 0.0  ;;  %v776_v10 = vmul.f32 %v2385_v58, %v683_v6  ;;  %v1883_v11 = vpop.f32.mrb[27].mxu0  ;;  %v2047_v12 = vpack.c.bf16 %v808_v3, %v805_v7  ;;  %v771_v13 = vmul.f32 %v2385_v58, %v541_v4 }
 0x1fb   :  { %vm730_vm8 = vcmp.ge.f32.partialorder %v541_v4, 0.0  ;;  %v772_v18 = vmul.f32 %v2385_v58, %v543_v9  ;;  %vm731_vm10 = vcmp.ge.f32.partialorder %v543_v9, 0.0 }
 0x1fc   :  { %v815_v14 = vsel %vm735_vm7, %v683_v6, %v776_v10  ;;  %2048 = vmatprep.subr.bf16.mxu1 %v2047_v12  ;;  %v810_v26 = vsel %vm730_vm8, %v541_v4, %v771_v13 }
 0x1fd   :  { %v2073_v15 = vpack.c.bf16 %v815_v14, %v812_v8  ;;  %v547_v16 = vpop.f32.mrb[26].mxu1  ;;  %v688_v17 = vpop.f32.mrb[28].mxu0  ;;  %2050 = vmatpush1.bf16.msra.mxu1 %v2049_v2  ;;  %v811_v34 = vsel %vm731_vm10, %v543_v9, %v772_v18 }
 0x1fe   :  { %vm733_vm9 = vcmp.ge.f32.partialorder %v547_v16, 0.0  ;;  %v774_v19 = vmul.f32 %v2385_v58, %v547_v16  ;;  %v549_v20 = vpop.f32.mrb[27].mxu1  ;;  %v779_v22 = vmul.f32 %v2385_v58, %v688_v17  ;;  %v1886_v24 = vpop.f32.mrb[29].mxu0  ;;  %vm738_vm12 = vcmp.ge.f32.partialorder %v688_v17, 0.0 }
 0x1ff   :  { %vm734_vm11 = vcmp.ge.f32.partialorder %v549_v20, 0.0  ;;  %v775_v25 = vmul.f32 %v2385_v58, %v549_v20  ;;  %2074 = vmatpush3.bf16.msra.mxu0 %v2073_v15  ;;  %v831_v15 = vld [vmem:[%s2943_s3] sm:$0xff] }
 0x200   :  { %v813_v27 = vsel %vm733_vm9, %v547_v16, %v774_v19  ;;  %2075 = vmatprep.subr.bf16.mxu0 %v2106_v21  ;;  %v818_v35 = vsel %vm738_vm12, %v688_v17, %v779_v22  ;;  %v832_v22 = vld [vmem:[%s2943_s3 + $0x8] sm:$0xff] }
 0x201   :  { %v2053_v28 = vpack.c.bf16 %v813_v27, %v810_v26  ;;  %v814_v29 = vsel %vm734_vm11, %v549_v20, %v775_v25  ;;  %v553_v30 = vpop.f32.mrb[28].mxu1  ;;  %v693_v32 = vpop.f32.mrb[30].mxu0  ;;  %vm856_vm11 = vcmask 826368   ;;  %v834_v25 = vld [vmem:[%s2943_s3 + $0x18] sm:$0xff]  ;;  %v835_v26 = vld [vmem:[%s2943_s3 + $0x20] sm:$0xff]  ;;  %v836_v27 = vld [vmem:[%s2943_s3 + $0x28] sm:$0xff] }
 0x202   :  { %v555_v36 = vpop.f32.mrb[29].mxu1  ;;  %vm741_vm13 = vcmp.ge.f32.partialorder %v693_v32, 0.0  ;;  %v782_v37 = vmul.f32 %v2385_v58, %v693_v32  ;;  %v1889_v38 = vpop.f32.mrb[31].mxu0  ;;  %v2051_v39 = vpack.c.bf16 %v814_v29, %v811_v34  ;;  %v777_v40 = vmul.f32 %v2385_v58, %v553_v30  ;;  %v838_v29 = vld [vmem:[%s2943_s3 + $0x38] sm:$0xff]  ;;  %v841_v34 = vld [vmem:[%s2943_s3 + $0x50] sm:$0xff] }
 0x203   :  { %vm736_vm14 = vcmp.ge.f32.partialorder %v553_v30, 0.0  ;;  %v778_v48 = vmul.f32 %v2385_v58, %v555_v36  ;;  %vm737_vm1 = vcmp.ge.f32.partialorder %v555_v36, 0.0  ;;  %v845_v38 = vld [vmem:[%s2943_s3 + $0x70] sm:$0xff] }
 0x204   :  { %v821_v41 = vsel %vm741_vm13, %v693_v32, %v782_v37  ;;  %2052 = vmatprep.subr.bf16.mxu1 %v2051_v39  ;;  %v816_v33 = vsel %vm736_vm14, %v553_v30, %v777_v40  ;;  %v839_v30 = vld [vmem:[%s2943_s3 + $0x40] sm:$0xff]  ;;  %v840_v32 = vld [vmem:[%s2943_s3 + $0x48] sm:$0xff]  ;;  %v846_v39 = vld [vmem:[%s2943_s3 + $0x78] sm:$0xff] }
 0x205   :  { %v2076_v42 = vpack.c.bf16 %v821_v41, %v818_v35  ;;  %v559_v44 = vpop.f32.mrb[30].mxu1  ;;  %v698_v45 = vpop.f32.mrb[32].mxu0  ;;  %2054 = vmatpush1.bf16.msra.mxu1 %v2053_v28  ;;  %v817_v54 = vsel %vm737_vm1, %v555_v36, %v778_v48  ;;  %v837_v28 = vld [vmem:[%s2943_s3 + $0x30] sm:$0xff]  ;;  %v842_v35 = vld [vmem:[%s2943_s3 + $0x58] sm:$0xff]  ;;  %v843_v36 = vld [vmem:[%s2943_s3 + $0x60] sm:$0xff] }
 0x206   :  { %vm739_vm15 = vcmp.ge.f32.partialorder %v559_v44, 0.0  ;;  %v780_v49 = vmul.f32 %v2385_v58, %v559_v44  ;;  %v561_v51 = vpop.f32.mrb[31].mxu1  ;;  %v785_v23 = vmul.f32 %v2385_v58, %v698_v45  ;;  %v1892_v52 = vpop.f32.mrb[33].mxu0  ;;  %vm744_vm4 = vcmp.ge.f32.partialorder %v698_v45, 0.0  ;;  %v844_v37 = vld [vmem:[%s2943_s3 + $0x68] sm:$0xff]  ;;  %v847_v40 = vld [vmem:[%s2943_s3 + $0x80] sm:$0xff] }
 0x207   :  { %vm740_vm3 = vcmp.ge.f32.partialorder %v561_v51, 0.0  ;;  %v781_v31 = vmul.f32 %v2385_v58, %v561_v51  ;;  %2077 = vmatpush3.bf16.msra.mxu0 %v2076_v42  ;;  %v848_v41 = vld [vmem:[%s2943_s3 + $0x88] sm:$0xff]  ;;  %v849_v42 = vld [vmem:[%s2943_s3 + $0x90] sm:$0xff]  ;;  %v2638_v52 = vstv %s1755_s23 }
 0x208   :  { %v819_v43 = vsel %vm739_vm15, %v559_v44, %v780_v49  ;;  %2078 = vmatprep.subr.bf16.mxu0 %v2106_v21  ;;  %v824_v55 = vsel %vm744_vm4, %v698_v45, %v785_v23  ;;  %v850_v44 = vld [vmem:[%s2943_s3 + $0x98] sm:$0xff]  ;;  %v851_v45 = vld [vmem:[%s2943_s3 + $0xa0] sm:$0xff]  ;;  %v852_v48 = vld [vmem:[%s2943_s3 + $0xa8] sm:$0xff] }
 0x209   :  { %v2057_v46 = vpack.c.bf16 %v819_v43, %v816_v33  ;;  %v820_v47 = vsel %vm740_vm3, %v561_v51, %v781_v31  ;;  %v565_v50 = vpop.f32.mrb[32].mxu1  ;;  %v703_v53 = vpop.f32.mrb[34].mxu0  ;;  %v853_v49 = vld [vmem:[%s2943_s3 + $0xb0] sm:$0xff]  ;;  %v854_v51 = vld [vmem:[%s2943_s3 + $0xb8] sm:$0xff]  ;;  %v855_v23 = vld [vmem:[%s2943_s3 + $0xc0] sm:$0xff] }
 0x20a   :  { %v567_v56 = vpop.f32.mrb[33].mxu1  ;;  %vm747_vm5 = vcmp.ge.f32.partialorder %v703_v53, 0.0  ;;  %v788_v57 = vmul.f32 %v2385_v58, %v703_v53  ;;  %v1895_v59 = vpop.f32.mrb[35].mxu0  ;;  %v2055_v60 = vpack.c.bf16 %v820_v47, %v817_v54  ;;  %v783_v61 = vmul.f32 %v2385_v58, %v565_v50 }
 0x20b   :  { %vm742_vm6 = vcmp.ge.f32.partialorder %v565_v50, 0.0  ;;  %vm743_vm7 = vcmp.ge.f32.partialorder %v567_v56, 0.0  ;;  %v784_v63 = vmul.f32 %v2385_v58, %v567_v56 }
 0x20c   :  { %v827_v62 = vsel %vm747_vm5, %v703_v53, %v788_v57  ;;  %2056 = vmatprep.subr.bf16.mxu1 %v2055_v60  ;;  %v822_v8 = vsel %vm742_vm6, %v565_v50, %v783_v61 }
 0x20d   :  { %v2079_v21 = vpack.c.bf16 %v827_v62, %v824_v55  ;;  %v571_v0 = vpop.f32.mrb[34].mxu1  ;;  %v708_v1 = vpop.f32.mrb[36].mxu0  ;;  %2058 = vmatpush1.bf16.msra.mxu1 %v2057_v46  ;;  %v823_v11 = vsel %vm743_vm7, %v567_v56, %v784_v63 }
 0x20e   :  { %vm745_vm8 = vcmp.ge.f32.partialorder %v571_v0, 0.0  ;;  %v786_v2 = vmul.f32 %v2385_v58, %v571_v0  ;;  %v573_v3 = vpop.f32.mrb[35].mxu1  ;;  %vm750_vm9 = vcmp.ge.f32.partialorder %v708_v1, 0.0  ;;  %v791_v4 = vmul.f32 %v2385_v58, %v708_v1  ;;  %v1898_v6 = vpop.f32.mrb[37].mxu0 }
 0x20f   :  { %vm746_vm10 = vcmp.ge.f32.partialorder %v573_v3, 0.0  ;;  %v787_v7 = vmul.f32 %v2385_v58, %v573_v3  ;;  %2080 = vmatpush3.bf16.msra.mxu0 %v2079_v21 }
 0x210   :  { %v825_v9 = vsel %vm745_vm8, %v571_v0, %v786_v2  ;;  %v830_v10 = vsel %vm750_vm9, %v708_v1, %v791_v4  ;;  %1923 = vmatprep.subr.mxu0 %v2105_v5 }
 0x211   :  { %v2061_v12 = vpack.c.bf16 %v825_v9, %v822_v8  ;;  %v826_v13 = vsel %vm746_vm10, %v573_v3, %v787_v7  ;;  %v577_v14 = vpop.f32.mrb[36].mxu1 }
 0x212   :  { %v579_v16 = vpop.f32.mrb[37].mxu1  ;;  %v2059_v17 = vpack.c.bf16 %v826_v13, %v823_v11  ;;  %v789_v19 = vmul.f32 %v2385_v58, %v577_v14  ;;  %vm748_vm13 = vcmp.ge.f32.partialorder %v577_v14, 0.0 }
 0x213   :  { %vm749_vm12 = vcmp.ge.f32.partialorder %v579_v16, 0.0  ;;  %v790_v18 = vmul.f32 %v2385_v58, %v579_v16  ;;  %1924 = vmatpush3.msk.msra.mxu0 %vm75_vm0, %v830_v10  ;;  %v833_v58 = vld [vmem:[%s2943_s3 + $0x10] sm:$0xff] }
 0x214   :  { %2060 = vmatprep.subr.bf16.mxu1 %v2059_v17  ;;  %1926 = vmatmul.mubr.msk.f32.vlgmr.msra.gmra.mrb[38].mxu0 %vm856_vm11, %v831_v15  ;;  %v828_v24 = vsel %vm748_vm13, %v577_v14, %v789_v19 }
 0x215   :  { %2062 = vmatpush1.bf16.msra.mxu1 %v2061_v12  ;;  %v829_v20 = vsel %vm749_vm12, %v579_v16, %v790_v18  ;;  %1928 = vmatprep.mubr.msk.f32.mxu0 %vm2107_vm2, %v2105_v5 }
 0x216   :  { %1702 = vmatprep.subr.msk.mxu1 %vm75_vm0, %v829_v20 }
 0x218   :  { %1929 = vmatmul.mubr.msk.f32.gmra.mrb[40].mxu0 %vm856_vm11, %v832_v22 }
 0x219   :  { %1703 = vmatpush1.msk.msra.mxu1 %vm75_vm0, %v828_v24  ;;  %1931 = vmatprep.mubr.msk.f32.mxu0 %vm2107_vm2, %v2105_v5 }
 0x21a   :  { %1704 = vmatmul.mubr.msk.f32.vlgmr.msra.gmra.mrb[38].mxu1 %vm856_vm11, %v831_v15 }
 0x21b   :  { %1011 = vmatprep.mubr.f32.mxu1 %v2105_v5 }
 0x21c   :  { %1932 = vmatmul.mubr.msk.f32.gmra.mrb[42].mxu0 %vm856_vm11, %v833_v58 }
 0x21d   :  { %1934 = vmatprep.mubr.msk.f32.mxu0 %vm2107_vm2, %v2105_v5 }
 0x21e   :  { %1705 = vmatmul.mubr.msk.f32.gmra.mrb[40].mxu1 %vm856_vm11, %v832_v22 }
 0x21f   :  { %1017 = vmatprep.mubr.f32.mxu1 %v2105_v5 }
 0x220   :  { %1935 = vmatmul.mubr.msk.f32.gmra.mrb[44].mxu0 %vm856_vm11, %v834_v25 }
 0x221   :  { %1937 = vmatprep.mubr.msk.f32.mxu0 %vm2107_vm2, %v2105_v5 }
 0x222   :  { %1706 = vmatmul.mubr.msk.f32.gmra.mrb[42].mxu1 %vm856_vm11, %v833_v58 }
 0x223   :  { %1023 = vmatprep.mubr.f32.mxu1 %v2105_v5 }
 0x224   :  { %1938 = vmatmul.mubr.msk.f32.gmra.mrb[46].mxu0 %vm856_vm11, %v835_v26 }
 0x225   :  { %1940 = vmatprep.mubr.msk.f32.mxu0 %vm2107_vm2, %v2105_v5 }
 0x226   :  { %1707 = vmatmul.mubr.msk.f32.gmra.mrb[44].mxu1 %vm856_vm11, %v834_v25 }
 0x227   :  { %1029 = vmatprep.mubr.f32.mxu1 %v2105_v5 }
 0x228   :  { %1941 = vmatmul.mubr.msk.f32.gmra.mrb[48].mxu0 %vm856_vm11, %v836_v27 }
 0x229   :  { %1943 = vmatprep.mubr.msk.f32.mxu0 %vm2107_vm2, %v2105_v5 }
 0x22a   :  { %1708 = vmatmul.mubr.msk.f32.gmra.mrb[46].mxu1 %vm856_vm11, %v835_v26 }
 0x22b   :  { %1035 = vmatprep.mubr.f32.mxu1 %v2105_v5 }
 0x22c   :  { %1944 = vmatmul.mubr.msk.f32.gmra.mrb[50].mxu0 %vm856_vm11, %v837_v28 }
 0x22d   :  { %1946 = vmatprep.mubr.msk.f32.mxu0 %vm2107_vm2, %v2105_v5 }
 0x22e   :  { %1709 = vmatmul.mubr.msk.f32.gmra.mrb[48].mxu1 %vm856_vm11, %v836_v27 }
 0x22f   :  { %1041 = vmatprep.mubr.f32.mxu1 %v2105_v5 }
 0x230   :  { %1947 = vmatmul.mubr.msk.f32.gmra.mrb[52].mxu0 %vm856_vm11, %v838_v29 }
 0x231   :  { %1949 = vmatprep.mubr.msk.f32.mxu0 %vm2107_vm2, %v2105_v5 }
 0x232   :  { %1710 = vmatmul.mubr.msk.f32.gmra.mrb[50].mxu1 %vm856_vm11, %v837_v28 }
 0x233   :  { %1047 = vmatprep.mubr.f32.mxu1 %v2105_v5 }
 0x234   :  { %1950 = vmatmul.mubr.msk.f32.gmra.mrb[54].mxu0 %vm856_vm11, %v839_v30 }
 0x235   :  { %1952 = vmatprep.mubr.msk.f32.mxu0 %vm2107_vm2, %v2105_v5 }
 0x236   :  { %1711 = vmatmul.mubr.msk.f32.gmra.mrb[52].mxu1 %vm856_vm11, %v838_v29 }
 0x237   :  { %1053 = vmatprep.mubr.f32.mxu1 %v2105_v5 }
 0x238   :  { %1953 = vmatmul.mubr.msk.f32.gmra.mrb[56].mxu0 %vm856_vm11, %v840_v32 }
 0x239   :  { %1955 = vmatprep.mubr.msk.f32.mxu0 %vm2107_vm2, %v2105_v5 }
 0x23a   :  { %1712 = vmatmul.mubr.msk.f32.gmra.mrb[54].mxu1 %vm856_vm11, %v839_v30 }
 0x23b   :  { %1059 = vmatprep.mubr.f32.mxu1 %v2105_v5 }
 0x23c   :  { %1956 = vmatmul.mubr.msk.f32.gmra.mrb[58].mxu0 %vm856_vm11, %v841_v34 }
 0x23d   :  { %1958 = vmatprep.mubr.msk.f32.mxu0 %vm2107_vm2, %v2105_v5 }
 0x23e   :  { %1713 = vmatmul.mubr.msk.f32.gmra.mrb[56].mxu1 %vm856_vm11, %v840_v32 }
 0x23f   :  { %1065 = vmatprep.mubr.f32.mxu1 %v2105_v5 }
 0x240   :  { %1959 = vmatmul.mubr.msk.f32.gmra.mrb[60].mxu0 %vm856_vm11, %v842_v35 }
 0x241   :  { %1961 = vmatprep.mubr.msk.f32.mxu0 %vm2107_vm2, %v2105_v5 }
 0x242   :  { %1714 = vmatmul.mubr.msk.f32.gmra.mrb[58].mxu1 %vm856_vm11, %v841_v34 }
 0x243   :  { %1071 = vmatprep.mubr.f32.mxu1 %v2105_v5 }
 0x244   :  { %1962 = vmatmul.mubr.msk.f32.gmra.mrb[62].mxu0 %vm856_vm11, %v843_v36 }
 0x245   :  { %1964 = vmatprep.mubr.msk.f32.mxu0 %vm2107_vm2, %v2105_v5 }
 0x246   :  { %1715 = vmatmul.mubr.msk.f32.gmra.mrb[60].mxu1 %vm856_vm11, %v842_v35 }
 0x247   :  { %1077 = vmatprep.mubr.f32.mxu1 %v2105_v5 }
 0x248   :  { %1965 = vmatmul.mubr.msk.f32.gmra.mrb[64].mxu0 %vm856_vm11, %v844_v37 }
 0x249   :  { %1967 = vmatprep.mubr.msk.f32.mxu0 %vm2107_vm2, %v2105_v5 }
 0x24a   :  { %1716 = vmatmul.mubr.msk.f32.gmra.mrb[62].mxu1 %vm856_vm11, %v843_v36 }
 0x24b   :  { %1083 = vmatprep.mubr.f32.mxu1 %v2105_v5 }
 0x24c   :  { %1968 = vmatmul.mubr.msk.f32.gmra.mrb[66].mxu0 %vm856_vm11, %v845_v38 }
 0x24d   :  { %1970 = vmatprep.mubr.msk.f32.mxu0 %vm2107_vm2, %v2105_v5 }
 0x24e   :  { %1717 = vmatmul.mubr.msk.f32.gmra.mrb[64].mxu1 %vm856_vm11, %v844_v37 }
 0x24f   :  { %1089 = vmatprep.mubr.f32.mxu1 %v2105_v5 }
 0x250   :  { %1971 = vmatmul.mubr.msk.f32.gmra.mrb[68].mxu0 %vm856_vm11, %v846_v39 }
 0x251   :  { %1973 = vmatprep.mubr.msk.f32.mxu0 %vm2107_vm2, %v2105_v5 }
 0x252   :  { %1718 = vmatmul.mubr.msk.f32.gmra.mrb[66].mxu1 %vm856_vm11, %v845_v38 }
 0x253   :  { %1095 = vmatprep.mubr.f32.mxu1 %v2105_v5 }
 0x254   :  { %1974 = vmatmul.mubr.msk.f32.gmra.mrb[70].mxu0 %vm856_vm11, %v847_v40 }
 0x255   :  { %1976 = vmatprep.mubr.msk.f32.mxu0 %vm2107_vm2, %v2105_v5 }
 0x256   :  { %1719 = vmatmul.mubr.msk.f32.gmra.mrb[68].mxu1 %vm856_vm11, %v846_v39 }
 0x257   :  { %1101 = vmatprep.mubr.f32.mxu1 %v2105_v5 }
 0x258   :  { %1977 = vmatmul.mubr.msk.f32.gmra.mrb[72].mxu0 %vm856_vm11, %v848_v41 }
 0x259   :  { %1979 = vmatprep.mubr.msk.f32.mxu0 %vm2107_vm2, %v2105_v5 }
 0x25a   :  { %1720 = vmatmul.mubr.msk.f32.gmra.mrb[70].mxu1 %vm856_vm11, %v847_v40 }
 0x25b   :  { %1107 = vmatprep.mubr.f32.mxu1 %v2105_v5 }
 0x25c   :  { %1980 = vmatmul.mubr.msk.f32.gmra.mrb[74].mxu0 %vm856_vm11, %v849_v42 }
 0x25d   :  { %1982 = vmatprep.mubr.msk.f32.mxu0 %vm2107_vm2, %v2105_v5 }
 0x25e   :  { %1721 = vmatmul.mubr.msk.f32.gmra.mrb[72].mxu1 %vm856_vm11, %v848_v41 }
 0x25f   :  { %1113 = vmatprep.mubr.f32.mxu1 %v2105_v5 }
 0x260   :  { %1983 = vmatmul.mubr.msk.f32.gmra.mrb[76].mxu0 %vm856_vm11, %v850_v44 }
 0x261   :  { %1985 = vmatprep.mubr.msk.f32.mxu0 %vm2107_vm2, %v2105_v5 }
 0x262   :  { %1722 = vmatmul.mubr.msk.f32.gmra.mrb[74].mxu1 %vm856_vm11, %v849_v42 }
 0x263   :  { %1119 = vmatprep.mubr.f32.mxu1 %v2105_v5 }
 0x264   :  { %1986 = vmatmul.mubr.msk.f32.gmra.mrb[78].mxu0 %vm856_vm11, %v851_v45 }
 0x265   :  { %1988 = vmatprep.mubr.msk.f32.mxu0 %vm2107_vm2, %v2105_v5 }
 0x266   :  { %1723 = vmatmul.mubr.msk.f32.gmra.mrb[76].mxu1 %vm856_vm11, %v850_v44 }
 0x267   :  { %1125 = vmatprep.mubr.f32.mxu1 %v2105_v5 }
 0x268   :  { %1989 = vmatmul.mubr.msk.f32.gmra.mrb[80].mxu0 %vm856_vm11, %v852_v48 }
 0x269   :  { %1991 = vmatprep.mubr.msk.f32.mxu0 %vm2107_vm2, %v2105_v5 }
 0x26a   :  { %1724 = vmatmul.mubr.msk.f32.gmra.mrb[78].mxu1 %vm856_vm11, %v851_v45 }
 0x26b   :  { %1131 = vmatprep.mubr.f32.mxu1 %v2105_v5 }
 0x26c   :  { %1992 = vmatmul.mubr.msk.f32.gmra.mrb[82].mxu0 %vm856_vm11, %v853_v49 }
 0x26d   :  { %1994 = vmatprep.mubr.msk.f32.mxu0 %vm2107_vm2, %v2105_v5 }
 0x26e   :  { %1725 = vmatmul.mubr.msk.f32.gmra.mrb[80].mxu1 %vm856_vm11, %v852_v48 }
 0x26f   :  { %1137 = vmatprep.mubr.f32.mxu1 %v2105_v5 }
 0x270   :  { %1995 = vmatmul.mubr.msk.f32.gmra.mrb[84].mxu0 %vm856_vm11, %v854_v51 }
 0x271   :  { %1997 = vmatprep.mubr.msk.f32.mxu0 %vm2107_vm2, %v2105_v5 }
 0x272   :  { %1726 = vmatmul.mubr.msk.f32.gmra.mrb[82].mxu1 %vm856_vm11, %v853_v49 }
 0x273   :  { %1143 = vmatprep.mubr.f32.mxu1 %v2105_v5 }
 0x274   :  { %1998 = vmatmul.mubr.msk.f32.gmra.mrb[86].mxu0 %vm856_vm11, %v855_v23 }
 0x276   :  { %1727 = vmatmul.mubr.msk.f32.gmra.mrb[84].mxu1 %vm856_vm11, %v854_v51 }
 0x277   :  { %1149 = vmatprep.mubr.f32.mxu1 %v2105_v5 }
 0x27a   :  { %1728 = vmatmul.mubr.msk.f32.gmra.mrb[86].mxu1 %vm856_vm11, %v855_v23 }
 0x2e7   :  { %v1222_v31 = vpop.f32.mrb[38].mxu0 }
 0x2e8   :  { %vm1348_vm0 = vcmp.ge.f32.partialorder %v1222_v31, 0.0  ;;  %v1425_v33 = vmul.f32 %v2638_v52, %v1222_v31  ;;  %v1927_v43 = vpop.f32.mrb[39].mxu0 }
 0x2ea   :  { %v1500_v46 = vsel %vm1348_vm0, %v1222_v31, %v1425_v33 }
 0x2eb   :  { %1575 = vst [vmem:[%s2945_s5 + $0x10] sm:$0xff] %v1500_v46  ;;  %v1227_v47 = vpop.f32.mrb[40].mxu0 }
 0x2ec   :  { %vm1351_vm2 = vcmp.ge.f32.partialorder %v1227_v47, 0.0  ;;  %v1428_v50 = vmul.f32 %v2638_v52, %v1227_v47  ;;  %v1930_v5 = vpop.f32.mrb[41].mxu0 }
 0x2ed   :  { %v1007_v53 = vpop.f32.mrb[38].mxu1 }
 0x2ee   :  { %vm1346_vm14 = vcmp.ge.f32.partialorder %v1007_v53, 0.0  ;;  %v1423_v54 = vmul.f32 %v2638_v52, %v1007_v53  ;;  %v1009_v55 = vpop.f32.mrb[39].mxu1  ;;  %v1503_v56 = vsel %vm1351_vm2, %v1227_v47, %v1428_v50 }
 0x2ef   :  { %vm1347_vm15 = vcmp.ge.f32.partialorder %v1009_v55, 0.0  ;;  %v1424_v57 = vmul.f32 %v2638_v52, %v1009_v55  ;;  %1578 = vst [vmem:[%s2945_s5 + $0x28] sm:$0xff] %v1503_v56  ;;  %v1232_v59 = vpop.f32.mrb[42].mxu0 }
 0x2f0   :  { %v1498_v60 = vsel %vm1346_vm14, %v1007_v53, %v1423_v54  ;;  %vm1354_vm1 = vcmp.ge.f32.partialorder %v1232_v59, 0.0  ;;  %v1431_v61 = vmul.f32 %v2638_v52, %v1232_v59  ;;  %v1933_v62 = vpop.f32.mrb[43].mxu0 }
 0x2f1   :  { %1573 = vst [vmem:[%s2945_s5] sm:$0xff] %v1498_v60  ;;  %v1499_v63 = vsel %vm1347_vm15, %v1009_v55, %v1424_v57  ;;  %v1013_v21 = vpop.f32.mrb[40].mxu1 }
 0x2f2   :  { %1574 = vst [vmem:[%s2945_s5 + $0x8] sm:$0xff] %v1499_v63  ;;  %vm1349_vm3 = vcmp.ge.f32.partialorder %v1013_v21, 0.0  ;;  %v1426_v0 = vmul.f32 %v2638_v52, %v1013_v21  ;;  %v1015_v1 = vpop.f32.mrb[41].mxu1  ;;  %v1506_v2 = vsel %vm1354_vm1, %v1232_v59, %v1431_v61 }
 0x2f3   :  { %vm1350_vm4 = vcmp.ge.f32.partialorder %v1015_v1, 0.0  ;;  %v1427_v3 = vmul.f32 %v2638_v52, %v1015_v1  ;;  %1581 = vst [vmem:[%s2945_s5 + $0x40] sm:$0xff] %v1506_v2  ;;  %v1237_v4 = vpop.f32.mrb[44].mxu0 }
 0x2f4   :  { %v1501_v6 = vsel %vm1349_vm3, %v1013_v21, %v1426_v0  ;;  %vm1357_vm5 = vcmp.ge.f32.partialorder %v1237_v4, 0.0  ;;  %v1434_v7 = vmul.f32 %v2638_v52, %v1237_v4  ;;  %v1936_v8 = vpop.f32.mrb[45].mxu0 }
 0x2f5   :  { %1576 = vst [vmem:[%s2945_s5 + $0x18] sm:$0xff] %v1501_v6  ;;  %v1502_v9 = vsel %vm1350_vm4, %v1015_v1, %v1427_v3  ;;  %v1019_v10 = vpop.f32.mrb[42].mxu1 }
 0x2f6   :  { %1577 = vst [vmem:[%s2945_s5 + $0x20] sm:$0xff] %v1502_v9  ;;  %vm1352_vm6 = vcmp.ge.f32.partialorder %v1019_v10, 0.0  ;;  %v1429_v11 = vmul.f32 %v2638_v52, %v1019_v10  ;;  %v1021_v12 = vpop.f32.mrb[43].mxu1  ;;  %v1509_v13 = vsel %vm1357_vm5, %v1237_v4, %v1434_v7 }
 0x2f7   :  { %vm1353_vm7 = vcmp.ge.f32.partialorder %v1021_v12, 0.0  ;;  %v1430_v14 = vmul.f32 %v2638_v52, %v1021_v12  ;;  %1584 = vst [vmem:[%s2945_s5 + $0x58] sm:$0xff] %v1509_v13  ;;  %v1242_v15 = vpop.f32.mrb[46].mxu0 }
 0x2f8   :  { %v1504_v16 = vsel %vm1352_vm6, %v1019_v10, %v1429_v11  ;;  %vm1360_vm8 = vcmp.ge.f32.partialorder %v1242_v15, 0.0  ;;  %v1437_v17 = vmul.f32 %v2638_v52, %v1242_v15  ;;  %v1939_v18 = vpop.f32.mrb[47].mxu0 }
 0x2f9   :  { %1579 = vst [vmem:[%s2945_s5 + $0x30] sm:$0xff] %v1504_v16  ;;  %v1505_v19 = vsel %vm1353_vm7, %v1021_v12, %v1430_v14  ;;  %v1025_v20 = vpop.f32.mrb[44].mxu1 }
 0x2fa   :  { %1580 = vst [vmem:[%s2945_s5 + $0x38] sm:$0xff] %v1505_v19  ;;  %vm1355_vm9 = vcmp.ge.f32.partialorder %v1025_v20, 0.0  ;;  %v1432_v22 = vmul.f32 %v2638_v52, %v1025_v20  ;;  %v1027_v24 = vpop.f32.mrb[45].mxu1  ;;  %v1512_v58 = vsel %vm1360_vm8, %v1242_v15, %v1437_v17 }
 0x2fb   :  { %vm1356_vm10 = vcmp.ge.f32.partialorder %v1027_v24, 0.0  ;;  %v1433_v25 = vmul.f32 %v2638_v52, %v1027_v24  ;;  %1587 = vst [vmem:[%s2945_s5 + $0x70] sm:$0xff] %v1512_v58  ;;  %v1247_v26 = vpop.f32.mrb[48].mxu0 }
 0x2fc   :  { %v1507_v27 = vsel %vm1355_vm9, %v1025_v20, %v1432_v22  ;;  %vm1363_vm11 = vcmp.ge.f32.partialorder %v1247_v26, 0.0  ;;  %v1440_v28 = vmul.f32 %v2638_v52, %v1247_v26  ;;  %v1942_v29 = vpop.f32.mrb[49].mxu0 }
 0x2fd   :  { %1582 = vst [vmem:[%s2945_s5 + $0x48] sm:$0xff] %v1507_v27  ;;  %v1508_v30 = vsel %vm1356_vm10, %v1027_v24, %v1433_v25  ;;  %v1031_v32 = vpop.f32.mrb[46].mxu1 }
 0x2fe   :  { %1583 = vst [vmem:[%s2945_s5 + $0x50] sm:$0xff] %v1508_v30  ;;  %vm1358_vm12 = vcmp.ge.f32.partialorder %v1031_v32, 0.0  ;;  %v1435_v34 = vmul.f32 %v2638_v52, %v1031_v32  ;;  %v1033_v35 = vpop.f32.mrb[47].mxu1  ;;  %v1515_v36 = vsel %vm1363_vm11, %v1247_v26, %v1440_v28 }
 0x2ff   :  { %vm1359_vm13 = vcmp.ge.f32.partialorder %v1033_v35, 0.0  ;;  %v1436_v37 = vmul.f32 %v2638_v52, %v1033_v35  ;;  %1590 = vst [vmem:[%s2945_s5 + $0x88] sm:$0xff] %v1515_v36  ;;  %v1252_v38 = vpop.f32.mrb[50].mxu0 }
 0x300   :  { %v1510_v39 = vsel %vm1358_vm12, %v1031_v32, %v1435_v34  ;;  %vm1366_vm0 = vcmp.ge.f32.partialorder %v1252_v38, 0.0  ;;  %v1443_v40 = vmul.f32 %v2638_v52, %v1252_v38  ;;  %v1945_v41 = vpop.f32.mrb[51].mxu0 }
 0x301   :  { %1585 = vst [vmem:[%s2945_s5 + $0x60] sm:$0xff] %v1510_v39  ;;  %v1511_v42 = vsel %vm1359_vm13, %v1033_v35, %v1436_v37  ;;  %v1037_v44 = vpop.f32.mrb[48].mxu1 }
 0x302   :  { %1586 = vst [vmem:[%s2945_s5 + $0x68] sm:$0xff] %v1511_v42  ;;  %vm1361_vm2 = vcmp.ge.f32.partialorder %v1037_v44, 0.0  ;;  %v1438_v45 = vmul.f32 %v2638_v52, %v1037_v44  ;;  %v1039_v48 = vpop.f32.mrb[49].mxu1  ;;  %v1518_v49 = vsel %vm1366_vm0, %v1252_v38, %v1443_v40 }
 0x303   :  { %vm1362_vm14 = vcmp.ge.f32.partialorder %v1039_v48, 0.0  ;;  %v1439_v51 = vmul.f32 %v2638_v52, %v1039_v48  ;;  %1593 = vst [vmem:[%s2945_s5 + $0xa0] sm:$0xff] %v1518_v49  ;;  %v1257_v23 = vpop.f32.mrb[52].mxu0 }
 0x304   :  { %v1513_v31 = vsel %vm1361_vm2, %v1037_v44, %v1438_v45  ;;  %vm1369_vm15 = vcmp.ge.f32.partialorder %v1257_v23, 0.0  ;;  %v1446_v33 = vmul.f32 %v2638_v52, %v1257_v23  ;;  %v1948_v43 = vpop.f32.mrb[53].mxu0 }
 0x305   :  { %1588 = vst [vmem:[%s2945_s5 + $0x78] sm:$0xff] %v1513_v31  ;;  %v1514_v46 = vsel %vm1362_vm14, %v1039_v48, %v1439_v51  ;;  %v1043_v47 = vpop.f32.mrb[50].mxu1 }
 0x306   :  { %1589 = vst [vmem:[%s2945_s5 + $0x80] sm:$0xff] %v1514_v46  ;;  %vm1364_vm1 = vcmp.ge.f32.partialorder %v1043_v47, 0.0  ;;  %v1441_v50 = vmul.f32 %v2638_v52, %v1043_v47  ;;  %v1045_v5 = vpop.f32.mrb[51].mxu1  ;;  %v1521_v53 = vsel %vm1369_vm15, %v1257_v23, %v1446_v33 }
 0x307   :  { %vm1365_vm3 = vcmp.ge.f32.partialorder %v1045_v5, 0.0  ;;  %v1442_v54 = vmul.f32 %v2638_v52, %v1045_v5  ;;  %1596 = vst [vmem:[%s2945_s5 + $0xb8] sm:$0xff] %v1521_v53  ;;  %v1262_v55 = vpop.f32.mrb[54].mxu0 }
 0x308   :  { %v1516_v56 = vsel %vm1364_vm1, %v1043_v47, %v1441_v50  ;;  %vm1372_vm4 = vcmp.ge.f32.partialorder %v1262_v55, 0.0  ;;  %v1449_v57 = vmul.f32 %v2638_v52, %v1262_v55  ;;  %v1951_v59 = vpop.f32.mrb[55].mxu0 }
 0x309   :  { %1591 = vst [vmem:[%s2945_s5 + $0x90] sm:$0xff] %v1516_v56  ;;  %v1517_v60 = vsel %vm1365_vm3, %v1045_v5, %v1442_v54  ;;  %v1049_v61 = vpop.f32.mrb[52].mxu1 }
 0x30a   :  { %1592 = vst [vmem:[%s2945_s5 + $0x98] sm:$0xff] %v1517_v60  ;;  %vm1367_vm5 = vcmp.ge.f32.partialorder %v1049_v61, 0.0  ;;  %v1444_v62 = vmul.f32 %v2638_v52, %v1049_v61  ;;  %v1051_v63 = vpop.f32.mrb[53].mxu1  ;;  %v1524_v21 = vsel %vm1372_vm4, %v1262_v55, %v1449_v57 }
 0x30b   :  { %vm1368_vm6 = vcmp.ge.f32.partialorder %v1051_v63, 0.0  ;;  %v1445_v0 = vmul.f32 %v2638_v52, %v1051_v63  ;;  %1599 = vst [vmem:[%s2945_s5 + $0xd0] sm:$0xff] %v1524_v21  ;;  %v1267_v1 = vpop.f32.mrb[56].mxu0 }
 0x30c   :  { %v1519_v2 = vsel %vm1367_vm5, %v1049_v61, %v1444_v62  ;;  %vm1375_vm7 = vcmp.ge.f32.partialorder %v1267_v1, 0.0  ;;  %v1452_v3 = vmul.f32 %v2638_v52, %v1267_v1  ;;  %v1954_v4 = vpop.f32.mrb[57].mxu0 }
 0x30d   :  { %1594 = vst [vmem:[%s2945_s5 + $0xa8] sm:$0xff] %v1519_v2  ;;  %v1520_v6 = vsel %vm1368_vm6, %v1051_v63, %v1445_v0  ;;  %v1055_v7 = vpop.f32.mrb[54].mxu1 }
 0x30e   :  { %1595 = vst [vmem:[%s2945_s5 + $0xb0] sm:$0xff] %v1520_v6  ;;  %vm1370_vm8 = vcmp.ge.f32.partialorder %v1055_v7, 0.0  ;;  %v1447_v8 = vmul.f32 %v2638_v52, %v1055_v7  ;;  %v1057_v9 = vpop.f32.mrb[55].mxu1  ;;  %v1527_v10 = vsel %vm1375_vm7, %v1267_v1, %v1452_v3 }
 0x30f   :  { %vm1371_vm9 = vcmp.ge.f32.partialorder %v1057_v9, 0.0  ;;  %v1448_v11 = vmul.f32 %v2638_v52, %v1057_v9  ;;  %1602 = vst [vmem:[%s2945_s5 + $0xe8] sm:$0xff] %v1527_v10  ;;  %v1272_v12 = vpop.f32.mrb[58].mxu0 }
 0x310   :  { %v1522_v13 = vsel %vm1370_vm8, %v1055_v7, %v1447_v8  ;;  %vm1378_vm10 = vcmp.ge.f32.partialorder %v1272_v12, 0.0  ;;  %v1455_v14 = vmul.f32 %v2638_v52, %v1272_v12  ;;  %v1957_v15 = vpop.f32.mrb[59].mxu0 }
 0x311   :  { %1597 = vst [vmem:[%s2945_s5 + $0xc0] sm:$0xff] %v1522_v13  ;;  %v1523_v16 = vsel %vm1371_vm9, %v1057_v9, %v1448_v11  ;;  %v1061_v17 = vpop.f32.mrb[56].mxu1 }
 0x312   :  { %1598 = vst [vmem:[%s2945_s5 + $0xc8] sm:$0xff] %v1523_v16  ;;  %vm1373_vm11 = vcmp.ge.f32.partialorder %v1061_v17, 0.0  ;;  %v1450_v18 = vmul.f32 %v2638_v52, %v1061_v17  ;;  %v1063_v19 = vpop.f32.mrb[57].mxu1  ;;  %v1530_v20 = vsel %vm1378_vm10, %v1272_v12, %v1455_v14 }
 0x313   :  { %vm1374_vm12 = vcmp.ge.f32.partialorder %v1063_v19, 0.0  ;;  %v1451_v22 = vmul.f32 %v2638_v52, %v1063_v19  ;;  %1605 = vst [vmem:[%s2945_s5 + $0x100] sm:$0xff] %v1530_v20  ;;  %v1277_v24 = vpop.f32.mrb[60].mxu0 }
 0x314   :  { %v1525_v58 = vsel %vm1373_vm11, %v1061_v17, %v1450_v18  ;;  %vm1381_vm13 = vcmp.ge.f32.partialorder %v1277_v24, 0.0  ;;  %v1458_v25 = vmul.f32 %v2638_v52, %v1277_v24  ;;  %v1960_v26 = vpop.f32.mrb[61].mxu0 }
 0x315   :  { %1600 = vst [vmem:[%s2945_s5 + $0xd8] sm:$0xff] %v1525_v58  ;;  %v1526_v27 = vsel %vm1374_vm12, %v1063_v19, %v1451_v22  ;;  %v1067_v28 = vpop.f32.mrb[58].mxu1 }
 0x316   :  { %1601 = vst [vmem:[%s2945_s5 + $0xe0] sm:$0xff] %v1526_v27  ;;  %vm1376_vm0 = vcmp.ge.f32.partialorder %v1067_v28, 0.0  ;;  %v1453_v29 = vmul.f32 %v2638_v52, %v1067_v28  ;;  %v1069_v30 = vpop.f32.mrb[59].mxu1  ;;  %v1533_v32 = vsel %vm1381_vm13, %v1277_v24, %v1458_v25 }
 0x317   :  { %vm1377_vm2 = vcmp.ge.f32.partialorder %v1069_v30, 0.0  ;;  %v1454_v34 = vmul.f32 %v2638_v52, %v1069_v30  ;;  %1608 = vst [vmem:[%s2945_s5 + $0x118] sm:$0xff] %v1533_v32  ;;  %v1282_v35 = vpop.f32.mrb[62].mxu0 }
 0x318   :  { %v1528_v36 = vsel %vm1376_vm0, %v1067_v28, %v1453_v29  ;;  %vm1384_vm14 = vcmp.ge.f32.partialorder %v1282_v35, 0.0  ;;  %v1461_v37 = vmul.f32 %v2638_v52, %v1282_v35  ;;  %v1963_v38 = vpop.f32.mrb[63].mxu0 }
 0x319   :  { %1603 = vst [vmem:[%s2945_s5 + $0xf0] sm:$0xff] %v1528_v36  ;;  %v1529_v39 = vsel %vm1377_vm2, %v1069_v30, %v1454_v34  ;;  %v1073_v40 = vpop.f32.mrb[60].mxu1 }
 0x31a   :  { %1604 = vst [vmem:[%s2945_s5 + $0xf8] sm:$0xff] %v1529_v39  ;;  %vm1379_vm15 = vcmp.ge.f32.partialorder %v1073_v40, 0.0  ;;  %v1456_v41 = vmul.f32 %v2638_v52, %v1073_v40  ;;  %v1075_v42 = vpop.f32.mrb[61].mxu1  ;;  %v1536_v44 = vsel %vm1384_vm14, %v1282_v35, %v1461_v37 }
 0x31b   :  { %vm1380_vm1 = vcmp.ge.f32.partialorder %v1075_v42, 0.0  ;;  %v1457_v45 = vmul.f32 %v2638_v52, %v1075_v42  ;;  %1611 = vst [vmem:[%s2945_s5 + $0x130] sm:$0xff] %v1536_v44  ;;  %v1287_v48 = vpop.f32.mrb[64].mxu0 }
 0x31c   :  { %v1531_v49 = vsel %vm1379_vm15, %v1073_v40, %v1456_v41  ;;  %vm1387_vm3 = vcmp.ge.f32.partialorder %v1287_v48, 0.0  ;;  %v1464_v51 = vmul.f32 %v2638_v52, %v1287_v48  ;;  %v1966_v23 = vpop.f32.mrb[65].mxu0 }
 0x31d   :  { %1606 = vst [vmem:[%s2945_s5 + $0x108] sm:$0xff] %v1531_v49  ;;  %v1532_v31 = vsel %vm1380_vm1, %v1075_v42, %v1457_v45  ;;  %v1079_v33 = vpop.f32.mrb[62].mxu1 }
 0x31e   :  { %1607 = vst [vmem:[%s2945_s5 + $0x110] sm:$0xff] %v1532_v31  ;;  %vm1382_vm4 = vcmp.ge.f32.partialorder %v1079_v33, 0.0  ;;  %v1459_v43 = vmul.f32 %v2638_v52, %v1079_v33  ;;  %v1081_v46 = vpop.f32.mrb[63].mxu1  ;;  %v1539_v47 = vsel %vm1387_vm3, %v1287_v48, %v1464_v51 }
 0x31f   :  { %vm1383_vm5 = vcmp.ge.f32.partialorder %v1081_v46, 0.0  ;;  %v1460_v50 = vmul.f32 %v2638_v52, %v1081_v46  ;;  %1614 = vst [vmem:[%s2945_s5 + $0x148] sm:$0xff] %v1539_v47  ;;  %v1292_v5 = vpop.f32.mrb[66].mxu0 }
 0x320   :  { %v1534_v53 = vsel %vm1382_vm4, %v1079_v33, %v1459_v43  ;;  %vm1390_vm6 = vcmp.ge.f32.partialorder %v1292_v5, 0.0  ;;  %v1467_v54 = vmul.f32 %v2638_v52, %v1292_v5  ;;  %v1969_v55 = vpop.f32.mrb[67].mxu0 }
 0x321   :  { %1609 = vst [vmem:[%s2945_s5 + $0x120] sm:$0xff] %v1534_v53  ;;  %v1535_v56 = vsel %vm1383_vm5, %v1081_v46, %v1460_v50  ;;  %v1085_v57 = vpop.f32.mrb[64].mxu1 }
 0x322   :  { %1610 = vst [vmem:[%s2945_s5 + $0x128] sm:$0xff] %v1535_v56  ;;  %vm1385_vm7 = vcmp.ge.f32.partialorder %v1085_v57, 0.0  ;;  %v1462_v59 = vmul.f32 %v2638_v52, %v1085_v57  ;;  %v1087_v60 = vpop.f32.mrb[65].mxu1  ;;  %v1542_v61 = vsel %vm1390_vm6, %v1292_v5, %v1467_v54 }
 0x323   :  { %vm1386_vm8 = vcmp.ge.f32.partialorder %v1087_v60, 0.0  ;;  %v1463_v62 = vmul.f32 %v2638_v52, %v1087_v60  ;;  %1617 = vst [vmem:[%s2945_s5 + $0x160] sm:$0xff] %v1542_v61  ;;  %v1297_v63 = vpop.f32.mrb[68].mxu0 }
 0x324   :  { %v1537_v21 = vsel %vm1385_vm7, %v1085_v57, %v1462_v59  ;;  %vm1393_vm9 = vcmp.ge.f32.partialorder %v1297_v63, 0.0  ;;  %v1470_v0 = vmul.f32 %v2638_v52, %v1297_v63  ;;  %v1972_v1 = vpop.f32.mrb[69].mxu0 }
 0x325   :  { %1612 = vst [vmem:[%s2945_s5 + $0x138] sm:$0xff] %v1537_v21  ;;  %v1538_v2 = vsel %vm1386_vm8, %v1087_v60, %v1463_v62  ;;  %v1091_v3 = vpop.f32.mrb[66].mxu1 }
 0x326   :  { %1613 = vst [vmem:[%s2945_s5 + $0x140] sm:$0xff] %v1538_v2  ;;  %vm1388_vm10 = vcmp.ge.f32.partialorder %v1091_v3, 0.0  ;;  %v1465_v4 = vmul.f32 %v2638_v52, %v1091_v3  ;;  %v1093_v6 = vpop.f32.mrb[67].mxu1  ;;  %v1545_v7 = vsel %vm1393_vm9, %v1297_v63, %v1470_v0 }
 0x327   :  { %vm1389_vm11 = vcmp.ge.f32.partialorder %v1093_v6, 0.0  ;;  %v1466_v8 = vmul.f32 %v2638_v52, %v1093_v6  ;;  %1620 = vst [vmem:[%s2945_s5 + $0x178] sm:$0xff] %v1545_v7  ;;  %v1302_v9 = vpop.f32.mrb[70].mxu0 }
 0x328   :  { %v1540_v10 = vsel %vm1388_vm10, %v1091_v3, %v1465_v4  ;;  %vm1396_vm12 = vcmp.ge.f32.partialorder %v1302_v9, 0.0  ;;  %v1473_v11 = vmul.f32 %v2638_v52, %v1302_v9  ;;  %v1975_v12 = vpop.f32.mrb[71].mxu0 }
 0x329   :  { %1615 = vst [vmem:[%s2945_s5 + $0x150] sm:$0xff] %v1540_v10  ;;  %v1541_v13 = vsel %vm1389_vm11, %v1093_v6, %v1466_v8  ;;  %v1097_v14 = vpop.f32.mrb[68].mxu1 }
 0x32a   :  { %1616 = vst [vmem:[%s2945_s5 + $0x158] sm:$0xff] %v1541_v13  ;;  %vm1391_vm13 = vcmp.ge.f32.partialorder %v1097_v14, 0.0  ;;  %v1468_v15 = vmul.f32 %v2638_v52, %v1097_v14  ;;  %v1099_v16 = vpop.f32.mrb[69].mxu1  ;;  %v1548_v17 = vsel %vm1396_vm12, %v1302_v9, %v1473_v11 }
 0x32b   :  { %vm1392_vm0 = vcmp.ge.f32.partialorder %v1099_v16, 0.0  ;;  %v1469_v18 = vmul.f32 %v2638_v52, %v1099_v16  ;;  %1623 = vst [vmem:[%s2945_s5 + $0x190] sm:$0xff] %v1548_v17  ;;  %v1307_v19 = vpop.f32.mrb[72].mxu0 }
 0x32c   :  { %v1543_v20 = vsel %vm1391_vm13, %v1097_v14, %v1468_v15  ;;  %vm1399_vm2 = vcmp.ge.f32.partialorder %v1307_v19, 0.0  ;;  %v1476_v22 = vmul.f32 %v2638_v52, %v1307_v19  ;;  %v1978_v24 = vpop.f32.mrb[73].mxu0 }
 0x32d   :  { %1618 = vst [vmem:[%s2945_s5 + $0x168] sm:$0xff] %v1543_v20  ;;  %v1544_v58 = vsel %vm1392_vm0, %v1099_v16, %v1469_v18  ;;  %v1103_v25 = vpop.f32.mrb[70].mxu1 }
 0x32e   :  { %1619 = vst [vmem:[%s2945_s5 + $0x170] sm:$0xff] %v1544_v58  ;;  %vm1394_vm14 = vcmp.ge.f32.partialorder %v1103_v25, 0.0  ;;  %v1471_v26 = vmul.f32 %v2638_v52, %v1103_v25  ;;  %v1105_v27 = vpop.f32.mrb[71].mxu1  ;;  %v1551_v28 = vsel %vm1399_vm2, %v1307_v19, %v1476_v22 }
 0x32f   :  { %vm1395_vm15 = vcmp.ge.f32.partialorder %v1105_v27, 0.0  ;;  %v1472_v29 = vmul.f32 %v2638_v52, %v1105_v27  ;;  %1626 = vst [vmem:[%s2945_s5 + $0x1a8] sm:$0xff] %v1551_v28  ;;  %v1312_v30 = vpop.f32.mrb[74].mxu0 }
 0x330   :  { %v1546_v32 = vsel %vm1394_vm14, %v1103_v25, %v1471_v26  ;;  %vm1402_vm1 = vcmp.ge.f32.partialorder %v1312_v30, 0.0  ;;  %v1479_v34 = vmul.f32 %v2638_v52, %v1312_v30  ;;  %v1981_v35 = vpop.f32.mrb[75].mxu0 }
 0x331   :  { %1621 = vst [vmem:[%s2945_s5 + $0x180] sm:$0xff] %v1546_v32  ;;  %v1547_v36 = vsel %vm1395_vm15, %v1105_v27, %v1472_v29  ;;  %v1109_v37 = vpop.f32.mrb[72].mxu1 }
 0x332   :  { %1622 = vst [vmem:[%s2945_s5 + $0x188] sm:$0xff] %v1547_v36  ;;  %vm1397_vm3 = vcmp.ge.f32.partialorder %v1109_v37, 0.0  ;;  %v1474_v38 = vmul.f32 %v2638_v52, %v1109_v37  ;;  %v1111_v39 = vpop.f32.mrb[73].mxu1  ;;  %v1554_v40 = vsel %vm1402_vm1, %v1312_v30, %v1479_v34 }
 0x333   :  { %vm1398_vm4 = vcmp.ge.f32.partialorder %v1111_v39, 0.0  ;;  %v1475_v41 = vmul.f32 %v2638_v52, %v1111_v39  ;;  %1629 = vst [vmem:[%s2945_s5 + $0x1c0] sm:$0xff] %v1554_v40  ;;  %v1317_v42 = vpop.f32.mrb[76].mxu0 }
 0x334   :  { %v1549_v44 = vsel %vm1397_vm3, %v1109_v37, %v1474_v38  ;;  %vm1405_vm5 = vcmp.ge.f32.partialorder %v1317_v42, 0.0  ;;  %v1482_v45 = vmul.f32 %v2638_v52, %v1317_v42  ;;  %v1984_v48 = vpop.f32.mrb[77].mxu0 }
 0x335   :  { %1624 = vst [vmem:[%s2945_s5 + $0x198] sm:$0xff] %v1549_v44  ;;  %v1550_v49 = vsel %vm1398_vm4, %v1111_v39, %v1475_v41  ;;  %v1115_v51 = vpop.f32.mrb[74].mxu1 }
 0x336   :  { %1625 = vst [vmem:[%s2945_s5 + $0x1a0] sm:$0xff] %v1550_v49  ;;  %vm1400_vm6 = vcmp.ge.f32.partialorder %v1115_v51, 0.0  ;;  %v1477_v23 = vmul.f32 %v2638_v52, %v1115_v51  ;;  %v1117_v31 = vpop.f32.mrb[75].mxu1  ;;  %v1557_v33 = vsel %vm1405_vm5, %v1317_v42, %v1482_v45 }
 0x337   :  { %vm1401_vm7 = vcmp.ge.f32.partialorder %v1117_v31, 0.0  ;;  %v1478_v43 = vmul.f32 %v2638_v52, %v1117_v31  ;;  %1632 = vst [vmem:[%s2945_s5 + $0x1d8] sm:$0xff] %v1557_v33  ;;  %v1322_v46 = vpop.f32.mrb[78].mxu0 }
 0x338   :  { %v1552_v47 = vsel %vm1400_vm6, %v1115_v51, %v1477_v23  ;;  %vm1408_vm8 = vcmp.ge.f32.partialorder %v1322_v46, 0.0  ;;  %v1485_v50 = vmul.f32 %v2638_v52, %v1322_v46  ;;  %v1987_v5 = vpop.f32.mrb[79].mxu0 }
 0x339   :  { %1627 = vst [vmem:[%s2945_s5 + $0x1b0] sm:$0xff] %v1552_v47  ;;  %v1553_v53 = vsel %vm1401_vm7, %v1117_v31, %v1478_v43  ;;  %v1121_v54 = vpop.f32.mrb[76].mxu1 }
 0x33a   :  { %1628 = vst [vmem:[%s2945_s5 + $0x1b8] sm:$0xff] %v1553_v53  ;;  %vm1403_vm9 = vcmp.ge.f32.partialorder %v1121_v54, 0.0  ;;  %v1480_v55 = vmul.f32 %v2638_v52, %v1121_v54  ;;  %v1123_v56 = vpop.f32.mrb[77].mxu1  ;;  %v1560_v57 = vsel %vm1408_vm8, %v1322_v46, %v1485_v50 }
 0x33b   :  { %vm1404_vm10 = vcmp.ge.f32.partialorder %v1123_v56, 0.0  ;;  %v1481_v59 = vmul.f32 %v2638_v52, %v1123_v56  ;;  %1635 = vst [vmem:[%s2945_s5 + $0x1f0] sm:$0xff] %v1560_v57  ;;  %v1327_v60 = vpop.f32.mrb[80].mxu0 }
 0x33c   :  { %v1555_v61 = vsel %vm1403_vm9, %v1121_v54, %v1480_v55  ;;  %vm1411_vm11 = vcmp.ge.f32.partialorder %v1327_v60, 0.0  ;;  %v1488_v62 = vmul.f32 %v2638_v52, %v1327_v60  ;;  %v1990_v63 = vpop.f32.mrb[81].mxu0 }
 0x33d   :  { %1630 = vst [vmem:[%s2945_s5 + $0x1c8] sm:$0xff] %v1555_v61  ;;  %v1556_v21 = vsel %vm1404_vm10, %v1123_v56, %v1481_v59  ;;  %v1127_v0 = vpop.f32.mrb[78].mxu1 }
 0x33e   :  { %1631 = vst [vmem:[%s2945_s5 + $0x1d0] sm:$0xff] %v1556_v21  ;;  %vm1406_vm12 = vcmp.ge.f32.partialorder %v1127_v0, 0.0  ;;  %v1483_v1 = vmul.f32 %v2638_v52, %v1127_v0  ;;  %v1129_v2 = vpop.f32.mrb[79].mxu1  ;;  %v1563_v3 = vsel %vm1411_vm11, %v1327_v60, %v1488_v62 }
 0x33f   :  { %vm1407_vm13 = vcmp.ge.f32.partialorder %v1129_v2, 0.0  ;;  %v1484_v4 = vmul.f32 %v2638_v52, %v1129_v2  ;;  %1638 = vst [vmem:[%s2945_s5 + $0x208] sm:$0xff] %v1563_v3  ;;  %v1332_v6 = vpop.f32.mrb[82].mxu0 }
 0x340   :  { %v1558_v7 = vsel %vm1406_vm12, %v1127_v0, %v1483_v1  ;;  %vm1414_vm0 = vcmp.ge.f32.partialorder %v1332_v6, 0.0  ;;  %v1491_v8 = vmul.f32 %v2638_v52, %v1332_v6  ;;  %v1993_v9 = vpop.f32.mrb[83].mxu0 }
 0x341   :  { %1633 = vst [vmem:[%s2945_s5 + $0x1e0] sm:$0xff] %v1558_v7  ;;  %v1559_v10 = vsel %vm1407_vm13, %v1129_v2, %v1484_v4  ;;  %v1133_v11 = vpop.f32.mrb[80].mxu1 }
 0x342   :  { %1634 = vst [vmem:[%s2945_s5 + $0x1e8] sm:$0xff] %v1559_v10  ;;  %vm1409_vm2 = vcmp.ge.f32.partialorder %v1133_v11, 0.0  ;;  %v1486_v12 = vmul.f32 %v2638_v52, %v1133_v11  ;;  %v1135_v13 = vpop.f32.mrb[81].mxu1  ;;  %v1566_v14 = vsel %vm1414_vm0, %v1332_v6, %v1491_v8 }
 0x343   :  { %vm1410_vm14 = vcmp.ge.f32.partialorder %v1135_v13, 0.0  ;;  %v1487_v15 = vmul.f32 %v2638_v52, %v1135_v13  ;;  %1641 = vst [vmem:[%s2945_s5 + $0x220] sm:$0xff] %v1566_v14  ;;  %v1337_v16 = vpop.f32.mrb[84].mxu0 }
 0x344   :  { %v1561_v17 = vsel %vm1409_vm2, %v1133_v11, %v1486_v12  ;;  %vm1417_vm15 = vcmp.ge.f32.partialorder %v1337_v16, 0.0  ;;  %v1494_v18 = vmul.f32 %v2638_v52, %v1337_v16  ;;  %v1996_v19 = vpop.f32.mrb[85].mxu0 }
 0x345   :  { %1636 = vst [vmem:[%s2945_s5 + $0x1f8] sm:$0xff] %v1561_v17  ;;  %v1562_v20 = vsel %vm1410_vm14, %v1135_v13, %v1487_v15  ;;  %v1139_v22 = vpop.f32.mrb[82].mxu1 }
 0x346   :  { %1637 = vst [vmem:[%s2945_s5 + $0x200] sm:$0xff] %v1562_v20  ;;  %vm1412_vm1 = vcmp.ge.f32.partialorder %v1139_v22, 0.0  ;;  %v1489_v24 = vmul.f32 %v2638_v52, %v1139_v22  ;;  %v1141_v58 = vpop.f32.mrb[83].mxu1  ;;  %v1569_v25 = vsel %vm1417_vm15, %v1337_v16, %v1494_v18 }
 0x347   :  { %vm1413_vm3 = vcmp.ge.f32.partialorder %v1141_v58, 0.0  ;;  %v1490_v26 = vmul.f32 %v2638_v52, %v1141_v58  ;;  %1644 = vst [vmem:[%s2945_s5 + $0x238] sm:$0xff] %v1569_v25  ;;  %v1342_v27 = vpop.f32.mrb[86].mxu0 }
 0x348   :  { %v1564_v28 = vsel %vm1412_vm1, %v1139_v22, %v1489_v24  ;;  %vm1420_vm4 = vcmp.ge.f32.partialorder %v1342_v27, 0.0  ;;  %v1497_v29 = vmul.f32 %v2638_v52, %v1342_v27  ;;  %v1999_v30 = vpop.f32.mrb[87].mxu0 }
 0x349   :  { %1639 = vst [vmem:[%s2945_s5 + $0x210] sm:$0xff] %v1564_v28  ;;  %v1565_v32 = vsel %vm1413_vm3, %v1141_v58, %v1490_v26  ;;  %v1145_v34 = vpop.f32.mrb[84].mxu1 }
 0x34a   :  { %1640 = vst [vmem:[%s2945_s5 + $0x218] sm:$0xff] %v1565_v32  ;;  %vm1415_vm5 = vcmp.ge.f32.partialorder %v1145_v34, 0.0  ;;  %v1492_v35 = vmul.f32 %v2638_v52, %v1145_v34  ;;  %v1147_v36 = vpop.f32.mrb[85].mxu1  ;;  %v1572_v37 = vsel %vm1420_vm4, %v1342_v27, %v1497_v29 }
 0x34b   :  { %vm1416_vm6 = vcmp.ge.f32.partialorder %v1147_v36, 0.0  ;;  %v1493_v38 = vmul.f32 %v2638_v52, %v1147_v36  ;;  %1647 = vst [vmem:[%s2945_s5 + $0x250] sm:$0xff] %v1572_v37 }
 0x34c   :  { %v1567_v39 = vsel %vm1415_vm5, %v1145_v34, %v1492_v35 }
 0x34d   :  { %1642 = vst [vmem:[%s2945_s5 + $0x228] sm:$0xff] %v1567_v39  ;;  %v1568_v40 = vsel %vm1416_vm6, %v1147_v36, %v1493_v38  ;;  %v1151_v41 = vpop.f32.mrb[86].mxu1 }
 0x34e   :  { %1643 = vst [vmem:[%s2945_s5 + $0x230] sm:$0xff] %v1568_v40  ;;  %vm1418_vm7 = vcmp.ge.f32.partialorder %v1151_v41, 0.0  ;;  %v1495_v42 = vmul.f32 %v2638_v52, %v1151_v41  ;;  %v1153_v44 = vpop.f32.mrb[87].mxu1 }
 0x34f   :  { %vm1419_vm8 = vcmp.ge.f32.partialorder %v1153_v44, 0.0  ;;  %v1496_v45 = vmul.f32 %v2638_v52, %v1153_v44 }
 0x350   :  { %v1570_v48 = vsel %vm1418_vm7, %v1151_v41, %v1495_v42 }
 0x351   :  { %1645 = vst [vmem:[%s2945_s5 + $0x240] sm:$0xff] %v1570_v48  ;;  %v1571_v49 = vsel %vm1419_vm8, %v1153_v44, %v1496_v45 }
 0x352   :  { %1646 = vst [vmem:[%s2945_s5 + $0x248] sm:$0xff] %v1571_v49 }
 0x353   :  { %1652 = vsyncpa [#allocation3], 1 }

// kernel: _lambda_.5
= control target key start
LH: loop header
LB: loop body
LE: loop exit
PB: predicated region body
PF: predicated region fallthrough
CT: control target
= control target key end

     0   :  { %14 = vsyncpa [#allocation3], 0  ;;  %s3420_s0 = inlined_call_operand.vmem [shape: f32[2], index: 0, kind: input, shape index: {}]   ;;  %s3421_s1 = inlined_call_operand.vmem [shape: f32[200,384], index: 1, kind: input, shape index: {}]   ;;  %s3422_s2 = inlined_call_operand.vmem [shape: f32[384,6], index: 2, kind: input, shape index: {}]   ;;  %s3423_s3 = inlined_call_operand.vmem [shape: f32[200,512], index: 3, kind: input, shape index: {}]   ;;  %s3424_s4 = inlined_call_operand.vmem [shape: f32[1,512], index: 4, kind: input, shape index: {}]   ;;  %s3425_s5 = inlined_call_operand.vmem [shape: f32[512,256], index: 5, kind: input, shape index: {}]   ;;  %s3426_s6 = inlined_call_operand.vmem [shape: f32[1,256], index: 6, kind: input, shape index: {}, may-alias: {6,8}]   ;;  %s3427_s7 = inlined_call_operand.vmem [shape: f32[256,256], index: 7, kind: input, shape index: {}]   ;;  %s3428_s8 = inlined_call_operand.vmem [shape: f32[1,256], index: 8, kind: input, shape index: {}, may-alias: {6,8}]   ;;  %s3429_s9 = inlined_call_operand.vmem [shape: f32[6,256], index: 9, kind: output, shape index: {}]  }
   0x1   :  { %s21_s11 = sshll.u32 %s3420_s0, 4  ;;  %s22_s11 = int_to_ptr.vmem [resolvable:$true] %s21_s11 }
   0x2   :  { %s1914_s12 = scalar_lea.vmem %s22_s11, 16  ;;  %p1919_p1 = scmp.lt.s32.totalorder %s22_s11, %s22_s11 }
   0x3   :  { %p1915_p0 = scmp.ne.s32.totalorder %s22_s11, %s1914_s12  ;;  %p1920_p2 = scmp.lt.s32.totalorder %s1914_s12, %s1914_s12 }
   0x5   :  { %p1921_p3 = por %p1920_p2, %p1919_p1 }
   0x7   :  { %p1922_p4 = pnand %p1921_p3, %p1915_p0 }
   0x9   :  { %1925 = shalt.err (!%p1922_p4)
}
   0xa   :  { %s1928_s13 = smov [#allocation2]  }
   0xb   :  { %24 = dma.vmem_to_smem %s22_s11, 16, %s1928_s13, [#allocation3]  }
   0xc   :  { %1926 = dma.done.wait [#allocation3], 16  }
   0xd   :  { %1927 = vsyncadd [#allocation3], 4294967280 }
   0xe   :  { %44 = sfence }
   0xf   :  { %v120_v0 = vld [vmem:[%s3422_s2] sm:$0xff]  ;;  %v121_v1 = vld [vmem:[%s3422_s2 + $0x8] sm:$0xff]  ;;  %v122_v2 = vld [vmem:[%s3422_s2 + $0x10] sm:$0xff]  ;;  %v1929_v3 = vmov 0.0|0.0   ;;  %vm1930_vm0 = vmmov 0   ;;  %v1931_v6 = vmov 0.0  }
  0x10   :  { %1489 = vmatprep.subr.bf16.mxu0 %v1929_v3  ;;  %v1490_v4 = vpack.c.bf16 %v121_v1, %v120_v0  ;;  %v123_v5 = vld [vmem:[%s3422_s2 + $0x18] sm:$0xff]  ;;  %1849 = vmatprep.subr.bf16.mxu1 %v1929_v3  ;;  %v124_v8 = vld [vmem:[%s3422_s2 + $0x20] sm:$0xff]  ;;  %v125_v9 = vld [vmem:[%s3422_s2 + $0x28] sm:$0xff]  ;;  %vm734_vm1 = vcmask 588800   ;;  %s884_s11 = sld [smem:[#allocation2]]  ;;  %s1340_s22 = sld [smem:[#allocation2 + $0x1]] }
  0x11   :  { %1462 = vmatprep.mubr.msk.f32.mxu1 %vm1930_vm0, %v1931_v6  ;;  %v1493_v7 = vpack.c.bf16 %v123_v5, %v122_v2  ;;  %v1496_v10 = vpack.c.bf16 %v125_v9, %v124_v8  ;;  %v126_v11 = vld [vmem:[%s3422_s2 + $0x30] sm:$0xff]  ;;  %v127_v12 = vld [vmem:[%s3422_s2 + $0x38] sm:$0xff]  ;;  %v46_v13 = vld [vmem:[%s3421_s1 + $0x8] sm:$0xff] }
  0x12   :  { %1491 = vmatpush1.bf16.msra.mxu0 %v1490_v4  ;;  %v1499_v14 = vpack.c.bf16 %v127_v12, %v126_v11  ;;  %232 = vmatprep.mubr.f32.mxu0 %v46_v13  ;;  %v152_v15 = vld [vmem:[%s3422_s2 + $0x100] sm:$0xff]  ;;  %v153_v16 = vld [vmem:[%s3422_s2 + $0x108] sm:$0xff]  ;;  %v154_v20 = vld [vmem:[%s3422_s2 + $0x110] sm:$0xff] }
  0x13   :  { %1492 = vmatprep.subr.bf16.mxu0 %v1929_v3  ;;  %v128_v17 = vld [vmem:[%s3422_s2 + $0x40] sm:$0xff]  ;;  %v129_v18 = vld [vmem:[%s3422_s2 + $0x48] sm:$0xff]  ;;  %v2031_v19 = vpack.c.bf16 %v153_v16, %v152_v15  ;;  %v155_v21 = vld [vmem:[%s3422_s2 + $0x118] sm:$0xff] }
  0x14   :  { %v1502_v22 = vpack.c.bf16 %v129_v18, %v128_v17  ;;  %v2040_v23 = vpack.c.bf16 %v155_v21, %v154_v20  ;;  %v130_v24 = vld [vmem:[%s3422_s2 + $0x50] sm:$0xff]  ;;  %v131_v25 = vld [vmem:[%s3422_s2 + $0x58] sm:$0xff]  ;;  %v156_v26 = vld [vmem:[%s3422_s2 + $0x120] sm:$0xff] }
  0x15   :  { %1857 = vmatpush3.bf16.msra.mxu1 %v2031_v19  ;;  %v157_v27 = vld [vmem:[%s3422_s2 + $0x128] sm:$0xff]  ;;  %v1505_v29 = vpack.c.bf16 %v131_v25, %v130_v24  ;;  %v158_v30 = vld [vmem:[%s3422_s2 + $0x130] sm:$0xff]  ;;  %v132_v31 = vld [vmem:[%s3422_s2 + $0x60] sm:$0xff] }
  0x16   :  { %1494 = vmatpush1.bf16.msra.mxu0 %v1493_v7  ;;  %1850 = vmatprep.subr.bf16.mxu1 %v1929_v3  ;;  %v2056_v28 = vpack.c.bf16 %v157_v27, %v156_v26  ;;  %v133_v32 = vld [vmem:[%s3422_s2 + $0x68] sm:$0xff]  ;;  %v159_v33 = vld [vmem:[%s3422_s2 + $0x138] sm:$0xff]  ;;  %v160_v36 = vld [vmem:[%s3422_s2 + $0x140] sm:$0xff] }
  0x17   :  { %1495 = vmatprep.subr.bf16.mxu0 %v1929_v3  ;;  %v2073_v34 = vpack.c.bf16 %v159_v33, %v158_v30  ;;  %v1508_v35 = vpack.c.bf16 %v133_v32, %v132_v31  ;;  %v161_v37 = vld [vmem:[%s3422_s2 + $0x148] sm:$0xff]  ;;  %v134_v38 = vld [vmem:[%s3422_s2 + $0x70] sm:$0xff]  ;;  %v135_v39 = vld [vmem:[%s3422_s2 + $0x78] sm:$0xff] }
  0x18   :  { %v2091_v40 = vpack.c.bf16 %v161_v37, %v160_v36  ;;  %v1511_v41 = vpack.c.bf16 %v135_v39, %v134_v38  ;;  %v162_v42 = vld [vmem:[%s3422_s2 + $0x150] sm:$0xff]  ;;  %v163_v43 = vld [vmem:[%s3422_s2 + $0x158] sm:$0xff]  ;;  %v136_v44 = vld [vmem:[%s3422_s2 + $0x80] sm:$0xff] }
  0x19   :  { %1858 = vmatpush3.bf16.msra.mxu1 %v2040_v23  ;;  %v137_v45 = vld [vmem:[%s3422_s2 + $0x88] sm:$0xff]  ;;  %v2108_v46 = vpack.c.bf16 %v163_v43, %v162_v42  ;;  %v164_v48 = vld [vmem:[%s3422_s2 + $0x160] sm:$0xff]  ;;  %v138_v50 = vld [vmem:[%s3422_s2 + $0x90] sm:$0xff] }
  0x1a   :  { %1497 = vmatpush1.bf16.msra.mxu0 %v1496_v10  ;;  %1851 = vmatprep.subr.bf16.mxu1 %v1929_v3  ;;  %v1514_v47 = vpack.c.bf16 %v137_v45, %v136_v44  ;;  %v165_v49 = vld [vmem:[%s3422_s2 + $0x168] sm:$0xff]  ;;  %v139_v51 = vld [vmem:[%s3422_s2 + $0x98] sm:$0xff]  ;;  %v166_v54 = vld [vmem:[%s3422_s2 + $0x170] sm:$0xff] }
  0x1b   :  { %1498 = vmatprep.subr.bf16.mxu0 %v1929_v3  ;;  %v2125_v52 = vpack.c.bf16 %v165_v49, %v164_v48  ;;  %v1517_v53 = vpack.c.bf16 %v139_v51, %v138_v50  ;;  %v167_v55 = vld [vmem:[%s3422_s2 + $0x178] sm:$0xff]  ;;  %v140_v56 = vld [vmem:[%s3422_s2 + $0xa0] sm:$0xff]  ;;  %v141_v57 = vld [vmem:[%s3422_s2 + $0xa8] sm:$0xff] }
  0x1c   :  { %v2142_v58 = vpack.c.bf16 %v167_v55, %v166_v54  ;;  %v1520_v59 = vpack.c.bf16 %v141_v57, %v140_v56  ;;  %v142_v60 = vld [vmem:[%s3422_s2 + $0xb0] sm:$0xff]  ;;  %v143_v61 = vld [vmem:[%s3422_s2 + $0xb8] sm:$0xff]  ;;  %v144_v0 = vld [vmem:[%s3422_s2 + $0xc0] sm:$0xff] }
  0x1d   :  { %1859 = vmatpush3.bf16.msra.mxu1 %v2056_v28  ;;  %v95_v62 = vld [vmem:[%s3421_s1 + $0x190] sm:$0xff]  ;;  %v1523_v63 = vpack.c.bf16 %v143_v61, %v142_v60  ;;  %v145_v1 = vld [vmem:[%s3422_s2 + $0xc8] sm:$0xff]  ;;  %v147_v7 = vld [vmem:[%s3422_s2 + $0xd8] sm:$0xff] }
  0x1e   :  { %1500 = vmatpush1.bf16.msra.mxu0 %v1499_v14  ;;  %1852 = vmatprep.subr.bf16.mxu1 %v1929_v3  ;;  %v98_v2 = vld [vmem:[%s3421_s1 + $0x1a8] sm:$0xff]  ;;  %v1526_v4 = vpack.c.bf16 %v145_v1, %v144_v0  ;;  %v146_v5 = vld [vmem:[%s3422_s2 + $0xd0] sm:$0xff]  ;;  %v101_v8 = vld [vmem:[%s3421_s1 + $0x1c0] sm:$0xff] }
  0x1f   :  { %1501 = vmatprep.subr.bf16.mxu0 %v1929_v3  ;;  %v1529_v9 = vpack.c.bf16 %v147_v7, %v146_v5  ;;  %v148_v10 = vld [vmem:[%s3422_s2 + $0xe0] sm:$0xff]  ;;  %v149_v11 = vld [vmem:[%s3422_s2 + $0xe8] sm:$0xff]  ;;  %v104_v12 = vld [vmem:[%s3421_s1 + $0x1d8] sm:$0xff] }
  0x20   :  { %v1532_v13 = vpack.c.bf16 %v149_v11, %v148_v10  ;;  %v150_v14 = vld [vmem:[%s3422_s2 + $0xf0] sm:$0xff]  ;;  %v151_v15 = vld [vmem:[%s3422_s2 + $0xf8] sm:$0xff]  ;;  %v110_v18 = vld [vmem:[%s3421_s1 + $0x208] sm:$0xff] }
  0x21   :  { %1860 = vmatpush3.bf16.msra.mxu1 %v2073_v34  ;;  %v107_v16 = vld [vmem:[%s3421_s1 + $0x1f0] sm:$0xff]  ;;  %v1535_v17 = vpack.c.bf16 %v151_v15, %v150_v14  ;;  %v45_v20 = vld [vmem:[%s3421_s1] sm:$0xff]  ;;  %v48_v24 = vld [vmem:[%s3421_s1 + $0x18] sm:$0xff] }
  0x22   :  { %1503 = vmatpush1.bf16.msra.mxu0 %v1502_v22  ;;  %1853 = vmatprep.subr.bf16.mxu1 %v1929_v3  ;;  %v49_v21 = vld [vmem:[%s3421_s1 + $0x20] sm:$0xff]  ;;  %v52_v25 = vld [vmem:[%s3421_s1 + $0x38] sm:$0xff]  ;;  %v51_v26 = vld [vmem:[%s3421_s1 + $0x30] sm:$0xff] }
  0x23   :  { %1504 = vmatprep.subr.bf16.mxu0 %v1929_v3  ;;  %v113_v22 = vld [vmem:[%s3421_s1 + $0x220] sm:$0xff]  ;;  %v55_v27 = vld [vmem:[%s3421_s1 + $0x50] sm:$0xff]  ;;  %v58_v30 = vld [vmem:[%s3421_s1 + $0x68] sm:$0xff] }
  0x24   :  { %v57_v31 = vld [vmem:[%s3421_s1 + $0x60] sm:$0xff]  ;;  %v64_v33 = vld [vmem:[%s3421_s1 + $0x98] sm:$0xff]  ;;  %v66_v36 = vld [vmem:[%s3421_s1 + $0xa8] sm:$0xff] }
  0x25   :  { %1861 = vmatpush3.bf16.msra.mxu1 %v2091_v40  ;;  %v61_v32 = vld [vmem:[%s3421_s1 + $0x80] sm:$0xff]  ;;  %v70_v37 = vld [vmem:[%s3421_s1 + $0xc8] sm:$0xff]  ;;  %v79_v42 = vld [vmem:[%s3421_s1 + $0x110] sm:$0xff] }
  0x26   :  { %1506 = vmatpush1.bf16.msra.mxu0 %v1505_v29  ;;  %1854 = vmatprep.subr.bf16.mxu1 %v1929_v3  ;;  %v119_v29 = vld [vmem:[%s3421_s1 + $0x250] sm:$0xff]  ;;  %v69_v38 = vld [vmem:[%s3421_s1 + $0xc0] sm:$0xff]  ;;  %v78_v43 = vld [vmem:[%s3421_s1 + $0x108] sm:$0xff] }
  0x27   :  { %1507 = vmatprep.subr.bf16.mxu0 %v1929_v3  ;;  %v73_v39 = vld [vmem:[%s3421_s1 + $0xe0] sm:$0xff]  ;;  %v82_v44 = vld [vmem:[%s3421_s1 + $0x128] sm:$0xff]  ;;  %v88_v48 = vld [vmem:[%s3421_s1 + $0x158] sm:$0xff] }
  0x28   :  { %v81_v45 = vld [vmem:[%s3421_s1 + $0x120] sm:$0xff]  ;;  %v87_v49 = vld [vmem:[%s3421_s1 + $0x150] sm:$0xff]  ;;  %v90_v51 = vld [vmem:[%s3421_s1 + $0x168] sm:$0xff] }
  0x29   :  { %1862 = vmatpush3.bf16.msra.mxu1 %v2108_v46  ;;  %v91_v50 = vld [vmem:[%s3421_s1 + $0x170] sm:$0xff]  ;;  %v97_v54 = vld [vmem:[%s3421_s1 + $0x1a0] sm:$0xff]  ;;  %v96_v55 = vld [vmem:[%s3421_s1 + $0x198] sm:$0xff] }
  0x2a   :  { %1509 = vmatpush1.bf16.msra.mxu0 %v1508_v35  ;;  %1855 = vmatprep.subr.bf16.mxu1 %v1929_v3  ;;  %v67_v35 = vld [vmem:[%s3421_s1 + $0xb0] sm:$0xff]  ;;  %v100_v56 = vld [vmem:[%s3421_s1 + $0x1b8] sm:$0xff]  ;;  %v106_v60 = vld [vmem:[%s3421_s1 + $0x1e8] sm:$0xff] }
  0x2b   :  { %1510 = vmatprep.subr.bf16.mxu0 %v1929_v3  ;;  %v99_v57 = vld [vmem:[%s3421_s1 + $0x1b0] sm:$0xff]  ;;  %v105_v61 = vld [vmem:[%s3421_s1 + $0x1e0] sm:$0xff]  ;;  %v112_v0 = vld [vmem:[%s3421_s1 + $0x218] sm:$0xff] }
  0x2c   :  { %v111_v1 = vld [vmem:[%s3421_s1 + $0x210] sm:$0xff]  ;;  %v118_v5 = vld [vmem:[%s3421_s1 + $0x248] sm:$0xff]  ;;  %v117_v7 = vld [vmem:[%s3421_s1 + $0x240] sm:$0xff] }
  0x2d   :  { %1863 = vmatpush3.bf16.msra.mxu1 %v2125_v52  ;;  %v53_v10 = vld [vmem:[%s3421_s1 + $0x40] sm:$0xff]  ;;  %v56_v11 = vld [vmem:[%s3421_s1 + $0x58] sm:$0xff] }
  0x2e   :  { %1512 = vmatpush1.bf16.msra.mxu0 %v1511_v41  ;;  %1856 = vmatprep.subr.bf16.mxu1 %v1929_v3  ;;  %v75_v41 = vld [vmem:[%s3421_s1 + $0xf0] sm:$0xff]  ;;  %v65_v14 = vld [vmem:[%s3421_s1 + $0xa0] sm:$0xff]  ;;  %v68_v15 = vld [vmem:[%s3421_s1 + $0xb8] sm:$0xff] }
  0x2f   :  { %1513 = vmatprep.subr.bf16.mxu0 %v1929_v3 }
  0x31   :  { %1864 = vmatpush3.bf16.msra.mxu1 %v2142_v58 }
  0x32   :  { %1515 = vmatpush1.bf16.msra.mxu0 %v1514_v47  ;;  %v84_v47 = vld [vmem:[%s3421_s1 + $0x138] sm:$0xff] }
  0x33   :  { %1516 = vmatprep.subr.bf16.mxu0 %v1929_v3 }
  0x34   :  { %1463 = vmatmul.mubr.f32.vlgmr.msra.gmra.mrb[0].mxu1 %v95_v62  ;;  %v109_v62 = vld [vmem:[%s3421_s1 + $0x200] sm:$0xff] }
  0x35   :  { %1465 = vmatprep.mubr.msk.f32.mxu1 %vm1930_vm0, %v1931_v6 }
  0x36   :  { %1518 = vmatpush1.bf16.msra.mxu0 %v1517_v53  ;;  %v93_v53 = vld [vmem:[%s3421_s1 + $0x180] sm:$0xff] }
  0x37   :  { %1519 = vmatprep.subr.bf16.mxu0 %v1929_v3 }
  0x38   :  { %1466 = vmatmul.mubr.f32.gmra.mrb[2].mxu1 %v98_v2  ;;  %v115_v2 = vld [vmem:[%s3421_s1 + $0x230] sm:$0xff] }
  0x39   :  { %1468 = vmatprep.mubr.msk.f32.mxu1 %vm1930_vm0, %v1931_v6 }
  0x3a   :  { %1521 = vmatpush1.bf16.msra.mxu0 %v1520_v59  ;;  %v102_v59 = vld [vmem:[%s3421_s1 + $0x1c8] sm:$0xff] }
  0x3b   :  { %1522 = vmatprep.subr.bf16.mxu0 %v1929_v3 }
  0x3c   :  { %1469 = vmatmul.mubr.f32.gmra.mrb[4].mxu1 %v101_v8  ;;  %v47_v8 = vld [vmem:[%s3421_s1 + $0x10] sm:$0xff] }
  0x3d   :  { %1471 = vmatprep.mubr.msk.f32.mxu1 %vm1930_vm0, %v1931_v6 }
  0x3e   :  { %1524 = vmatpush1.bf16.msra.mxu0 %v1523_v63  ;;  %v108_v63 = vld [vmem:[%s3421_s1 + $0x1f8] sm:$0xff] }
  0x3f   :  { %1525 = vmatprep.subr.bf16.mxu0 %v1929_v3 }
  0x40   :  { %1472 = vmatmul.mubr.f32.gmra.mrb[6].mxu1 %v104_v12  ;;  %v59_v12 = vld [vmem:[%s3421_s1 + $0x70] sm:$0xff] }
  0x41   :  { %1474 = vmatprep.mubr.msk.f32.mxu1 %vm1930_vm0, %v1931_v6 }
  0x42   :  { %1527 = vmatpush1.bf16.msra.mxu0 %v1526_v4  ;;  %v114_v4 = vld [vmem:[%s3421_s1 + $0x228] sm:$0xff] }
  0x43   :  { %1528 = vmatprep.subr.bf16.mxu0 %v1929_v3 }
  0x44   :  { %1475 = vmatmul.mubr.f32.gmra.mrb[8].mxu1 %v107_v16  ;;  %v71_v16 = vld [vmem:[%s3421_s1 + $0xd0] sm:$0xff] }
  0x45   :  { %1477 = vmatprep.mubr.msk.f32.mxu1 %vm1930_vm0, %v1931_v6 }
  0x46   :  { %1530 = vmatpush1.bf16.msra.mxu0 %v1529_v9  ;;  %v50_v9 = vld [vmem:[%s3421_s1 + $0x28] sm:$0xff] }
  0x47   :  { %1531 = vmatprep.subr.bf16.mxu0 %v1929_v3 }
  0x48   :  { %1478 = vmatmul.mubr.f32.gmra.mrb[10].mxu1 %v110_v18  ;;  %v77_v18 = vld [vmem:[%s3421_s1 + $0x100] sm:$0xff] }
  0x49   :  { %1480 = vmatprep.mubr.msk.f32.mxu1 %vm1930_vm0, %v1931_v6 }
  0x4a   :  { %1533 = vmatpush1.bf16.msra.mxu0 %v1532_v13  ;;  %v62_v13 = vld [vmem:[%s3421_s1 + $0x88] sm:$0xff] }
  0x4b   :  { %1534 = vmatprep.subr.bf16.mxu0 %v1929_v3 }
  0x4c   :  { %1481 = vmatmul.mubr.f32.gmra.mrb[12].mxu1 %v113_v22  ;;  %v86_v22 = vld [vmem:[%s3421_s1 + $0x148] sm:$0xff] }
  0x4d   :  { %1483 = vmatprep.mubr.msk.f32.mxu1 %vm1930_vm0, %v1931_v6 }
  0x4e   :  { %1536 = vmatpush1.bf16.msra.mxu0 %v1535_v17  ;;  %v74_v17 = vld [vmem:[%s3421_s1 + $0xe8] sm:$0xff] }
  0x4f   :  { %1537 = vmatprep.subr.bf16.mxu0 %v1929_v3 }
  0x51   :  { %233 = vmatmul.mubr.f32.vlgmr.msra.gmra.mrb[0].mxu0 %v45_v20  ;;  %v80_v20 = vld [vmem:[%s3421_s1 + $0x118] sm:$0xff] }
  0x52   :  { %1539 = vmatpush3.bf16.msra.mxu0 %v2031_v19  ;;  %237 = vmatprep.mubr.f32.mxu0 %v49_v21  ;;  %v116_v19 = vld [vmem:[%s3421_s1 + $0x238] sm:$0xff]  ;;  %v83_v21 = vld [vmem:[%s3421_s1 + $0x130] sm:$0xff] }
  0x53   :  { %1540 = vmatprep.subr.bf16.mxu0 %v1929_v3  ;;  %1484 = vmatmul.mubr.f32.gmra.mrb[14].mxu1 %v116_v19 }
  0x54   :  { %1486 = vmatprep.mubr.msk.f32.mxu1 %vm1930_vm0, %v1931_v6 }
  0x55   :  { %238 = vmatmul.mubr.f32.gmra.mrb[2].mxu0 %v48_v24  ;;  %v89_v24 = vld [vmem:[%s3421_s1 + $0x160] sm:$0xff] }
  0x56   :  { %242 = vmatprep.mubr.f32.mxu0 %v52_v25  ;;  %1542 = vmatpush3.bf16.msra.mxu0 %v2040_v23  ;;  %v54_v23 = vld [vmem:[%s3421_s1 + $0x48] sm:$0xff]  ;;  %v92_v25 = vld [vmem:[%s3421_s1 + $0x178] sm:$0xff] }
  0x57   :  { %1543 = vmatprep.subr.bf16.mxu0 %v1929_v3  ;;  %1487 = vmatmul.mubr.f32.gmra.mrb[16].mxu1 %v119_v29 }
  0x59   :  { %243 = vmatmul.mubr.f32.gmra.mrb[4].mxu0 %v51_v26 }
  0x5a   :  { %247 = vmatprep.mubr.f32.mxu0 %v55_v27  ;;  %1545 = vmatpush3.bf16.msra.mxu0 %v2056_v28  ;;  %v60_v28 = vld [vmem:[%s3421_s1 + $0x78] sm:$0xff] }
  0x5b   :  { %1546 = vmatprep.subr.bf16.mxu0 %v1929_v3 }
  0x5d   :  { %248 = vmatmul.mubr.f32.gmra.mrb[6].mxu0 %v54_v23 }
  0x5e   :  { %252 = vmatprep.mubr.f32.mxu0 %v58_v30  ;;  %1548 = vmatpush3.bf16.msra.mxu0 %v2073_v34  ;;  %v63_v34 = vld [vmem:[%s3421_s1 + $0x90] sm:$0xff] }
  0x5f   :  { %1549 = vmatprep.subr.bf16.mxu0 %v1929_v3 }
  0x61   :  { %253 = vmatmul.mubr.f32.gmra.mrb[8].mxu0 %v57_v31 }
  0x62   :  { %257 = vmatprep.mubr.f32.mxu0 %v61_v32  ;;  %1551 = vmatpush3.bf16.msra.mxu0 %v2091_v40  ;;  %v72_v40 = vld [vmem:[%s3421_s1 + $0xd8] sm:$0xff] }
  0x63   :  { %1552 = vmatprep.subr.bf16.mxu0 %v1929_v3 }
  0x65   :  { %258 = vmatmul.mubr.f32.gmra.mrb[10].mxu0 %v60_v28 }
  0x66   :  { %262 = vmatprep.mubr.f32.mxu0 %v64_v33  ;;  %1554 = vmatpush3.bf16.msra.mxu0 %v2108_v46  ;;  %v85_v46 = vld [vmem:[%s3421_s1 + $0x140] sm:$0xff] }
  0x67   :  { %1555 = vmatprep.subr.bf16.mxu0 %v1929_v3 }
  0x69   :  { %263 = vmatmul.mubr.f32.gmra.mrb[12].mxu0 %v63_v34 }
  0x6a   :  { %267 = vmatprep.mubr.f32.mxu0 %v67_v35  ;;  %1557 = vmatpush3.bf16.msra.mxu0 %v2125_v52  ;;  %v94_v52 = vld [vmem:[%s3421_s1 + $0x188] sm:$0xff] }
  0x6b   :  { %1558 = vmatprep.subr.bf16.mxu0 %v1929_v3  ;;  %v76_v3 = vld [vmem:[%s3421_s1 + $0xf8] sm:$0xff] }
  0x6d   :  { %268 = vmatmul.mubr.f32.gmra.mrb[14].mxu0 %v66_v36 }
  0x6e   :  { %272 = vmatprep.mubr.f32.mxu0 %v70_v37  ;;  %1560 = vmatpush3.bf16.msra.mxu0 %v2142_v58  ;;  %v103_v58 = vld [vmem:[%s3421_s1 + $0x1d0] sm:$0xff] }
  0x71   :  { %273 = vmatmul.mubr.f32.gmra.mrb[16].mxu0 %v69_v38 }
  0x72   :  { %277 = vmatprep.mubr.f32.mxu0 %v73_v39 }
  0x75   :  { %278 = vmatmul.mubr.f32.gmra.mrb[18].mxu0 %v72_v40 }
  0x76   :  { %282 = vmatprep.mubr.f32.mxu0 %v76_v3  ;;  %v613_v3 = vld [vmem:[%s3423_s3 + $0x8] sm:$0xff] }
  0x79   :  { %283 = vmatmul.mubr.f32.gmra.mrb[20].mxu0 %v75_v41  ;;  %v617_v41 = vld [vmem:[%s3423_s3 + $0x28] sm:$0xff] }
  0x7a   :  { %287 = vmatprep.mubr.f32.mxu0 %v79_v42  ;;  %v612_v42 = vld [vmem:[%s3423_s3] sm:$0xff] }
  0x7d   :  { %288 = vmatmul.mubr.f32.gmra.mrb[22].mxu0 %v78_v43  ;;  %v1561_v43 = vpack.c.bf16 %v617_v41, %v613_v3 }
  0x7e   :  { %292 = vmatprep.mubr.f32.mxu0 %v82_v44  ;;  %v616_v44 = vld [vmem:[%s3423_s3 + $0x20] sm:$0xff] }
  0x7f   :  { %1562 = vmatprep.subr.bf16.mxu1 %v1561_v43 }
  0x81   :  { %293 = vmatmul.mubr.f32.gmra.mrb[24].mxu0 %v81_v45  ;;  %v621_v45 = vld [vmem:[%s3423_s3 + $0x48] sm:$0xff] }
  0x82   :  { %297 = vmatprep.mubr.f32.mxu0 %v85_v46  ;;  %v625_v46 = vld [vmem:[%s3423_s3 + $0x68] sm:$0xff] }
  0x85   :  { %298 = vmatmul.mubr.f32.gmra.mrb[26].mxu0 %v84_v47  ;;  %v1563_v47 = vpack.c.bf16 %v616_v44, %v612_v42 }
  0x86   :  { %302 = vmatprep.mubr.f32.mxu0 %v88_v48  ;;  %v1565_v48 = vpack.c.bf16 %v625_v46, %v621_v45  ;;  %v684_v45 = vld [vmem:[%s3423_s3 + $0x240] sm:$0xff] }
  0x87   :  { %1564 = vmatpush1.bf16.msra.mxu1 %v1563_v47  ;;  %v688_v46 = vld [vmem:[%s3423_s3 + $0x260] sm:$0xff]  ;;  %v693_v47 = vld [vmem:[%s3423_s3 + $0x288] sm:$0xff] }
  0x88   :  { %1566 = vmatprep.subr.bf16.mxu1 %v1565_v48 }
  0x89   :  { %303 = vmatmul.mubr.f32.gmra.mrb[28].mxu0 %v87_v49  ;;  %v620_v49 = vld [vmem:[%s3423_s3 + $0x40] sm:$0xff] }
  0x8a   :  { %307 = vmatprep.mubr.f32.mxu0 %v91_v50  ;;  %v624_v50 = vld [vmem:[%s3423_s3 + $0x60] sm:$0xff] }
  0x8d   :  { %308 = vmatmul.mubr.f32.gmra.mrb[30].mxu0 %v90_v51  ;;  %v629_v51 = vld [vmem:[%s3423_s3 + $0x88] sm:$0xff] }
  0x8e   :  { %312 = vmatprep.mubr.f32.mxu0 %v94_v52  ;;  %v633_v52 = vld [vmem:[%s3423_s3 + $0xa8] sm:$0xff] }
  0x91   :  { %313 = vmatmul.mubr.f32.gmra.mrb[32].mxu0 %v93_v53  ;;  %v1567_v53 = vpack.c.bf16 %v624_v50, %v620_v49 }
  0x92   :  { %317 = vmatprep.mubr.f32.mxu0 %v97_v54  ;;  %v1569_v54 = vpack.c.bf16 %v633_v52, %v629_v51  ;;  %v1599_v51 = vpack.c.bf16 %v688_v46, %v684_v45 }
  0x93   :  { %1568 = vmatpush1.bf16.msra.mxu1 %v1567_v53  ;;  %v692_v53 = vld [vmem:[%s3423_s3 + $0x280] sm:$0xff] }
  0x94   :  { %1570 = vmatprep.subr.bf16.mxu1 %v1569_v54  ;;  %v696_v54 = vld [vmem:[%s3423_s3 + $0x2a0] sm:$0xff] }
  0x95   :  { %318 = vmatmul.mubr.f32.gmra.mrb[34].mxu0 %v96_v55  ;;  %v628_v55 = vld [vmem:[%s3423_s3 + $0x80] sm:$0xff] }
  0x96   :  { %322 = vmatprep.mubr.f32.mxu0 %v100_v56  ;;  %v632_v56 = vld [vmem:[%s3423_s3 + $0xa0] sm:$0xff] }
  0x99   :  { %323 = vmatmul.mubr.f32.gmra.mrb[36].mxu0 %v99_v57  ;;  %v637_v57 = vld [vmem:[%s3423_s3 + $0xc8] sm:$0xff] }
  0x9a   :  { %327 = vmatprep.mubr.f32.mxu0 %v103_v58  ;;  %v641_v58 = vld [vmem:[%s3423_s3 + $0xe8] sm:$0xff] }
  0x9d   :  { %328 = vmatmul.mubr.f32.gmra.mrb[38].mxu0 %v102_v59  ;;  %v1571_v59 = vpack.c.bf16 %v632_v56, %v628_v55  ;;  %v701_v55 = vld [vmem:[%s3423_s3 + $0x2c8] sm:$0xff] }
  0x9e   :  { %332 = vmatprep.mubr.f32.mxu0 %v106_v60  ;;  %v1573_v60 = vpack.c.bf16 %v641_v58, %v637_v57 }
  0x9f   :  { %1572 = vmatpush1.bf16.msra.mxu1 %v1571_v59  ;;  %v1603_v59 = vpack.c.bf16 %v696_v54, %v692_v53 }
  0xa0   :  { %1574 = vmatprep.subr.bf16.mxu1 %v1573_v60 }
  0xa1   :  { %333 = vmatmul.mubr.f32.gmra.mrb[40].mxu0 %v105_v61  ;;  %v636_v61 = vld [vmem:[%s3423_s3 + $0xc0] sm:$0xff] }
  0xa2   :  { %337 = vmatprep.mubr.f32.mxu0 %v109_v62  ;;  %v640_v62 = vld [vmem:[%s3423_s3 + $0xe0] sm:$0xff] }
  0xa5   :  { %338 = vmatmul.mubr.f32.gmra.mrb[42].mxu0 %v108_v63  ;;  %v645_v63 = vld [vmem:[%s3423_s3 + $0x108] sm:$0xff] }
  0xa6   :  { %342 = vmatprep.mubr.f32.mxu0 %v112_v0  ;;  %v649_v0 = vld [vmem:[%s3423_s3 + $0x128] sm:$0xff] }
  0xa9   :  { %343 = vmatmul.mubr.f32.gmra.mrb[44].mxu0 %v111_v1  ;;  %v1575_v1 = vpack.c.bf16 %v640_v62, %v636_v61  ;;  %v700_v61 = vld [vmem:[%s3423_s3 + $0x2c0] sm:$0xff] }
  0xaa   :  { %347 = vmatprep.mubr.f32.mxu0 %v115_v2  ;;  %v1577_v2 = vpack.c.bf16 %v649_v0, %v645_v63  ;;  %v704_v62 = vld [vmem:[%s3423_s3 + $0x2e0] sm:$0xff] }
  0xab   :  { %1576 = vmatpush1.bf16.msra.mxu1 %v1575_v1 }
  0xac   :  { %1578 = vmatprep.subr.bf16.mxu1 %v1577_v2  ;;  %v1607_v2 = vpack.c.bf16 %v704_v62, %v700_v61  ;;  %v622_v62 = vld [vmem:[%s3423_s3 + $0x50] sm:$0xff] }
  0xad   :  { %348 = vmatmul.mubr.f32.gmra.mrb[46].mxu0 %v114_v4  ;;  %v644_v4 = vld [vmem:[%s3423_s3 + $0x100] sm:$0xff] }
  0xae   :  { %352 = vmatprep.mubr.f32.mxu0 %v118_v5  ;;  %v648_v5 = vld [vmem:[%s3423_s3 + $0x120] sm:$0xff] }
  0xb1   :  { %353 = vmatmul.mubr.f32.gmra.mrb[48].mxu0 %v117_v7  ;;  %v653_v7 = vld [vmem:[%s3423_s3 + $0x148] sm:$0xff] }
  0xb2   :  { %1414 = vmatprep.mubr.msk.f32.mxu0 %vm1930_vm0, %v1931_v6 }
  0xb5   :  { %1415 = vmatmul.mubr.f32.vlgmr.msra.gmra.mrb[0].mxu0 %v47_v8  ;;  %v657_v8 = vld [vmem:[%s3423_s3 + $0x168] sm:$0xff] }
  0xb6   :  { %1417 = vmatprep.mubr.msk.f32.mxu0 %vm1930_vm0, %v1931_v6 }
  0xb9   :  { %1418 = vmatmul.mubr.f32.gmra.mrb[2].mxu0 %v50_v9  ;;  %v1579_v9 = vpack.c.bf16 %v648_v5, %v644_v4  ;;  %v615_v4 = vld [vmem:[%s3423_s3 + $0x18] sm:$0xff] }
  0xba   :  { %1420 = vmatprep.mubr.msk.f32.mxu0 %vm1930_vm0, %v1931_v6  ;;  %v619_v5 = vld [vmem:[%s3423_s3 + $0x38] sm:$0xff] }
  0xbb   :  { %1580 = vmatpush1.bf16.msra.mxu1 %v1579_v9  ;;  %v708_v9 = vld [vmem:[%s3423_s3 + $0x300] sm:$0xff] }
  0xbd   :  { %1421 = vmatmul.mubr.f32.gmra.mrb[4].mxu0 %v53_v10  ;;  %v1581_v10 = vpack.c.bf16 %v657_v8, %v653_v7 }
  0xbe   :  { %1423 = vmatprep.mubr.msk.f32.mxu0 %vm1930_vm0, %v1931_v6 }
  0xbf   :  { %1582 = vmatprep.subr.bf16.mxu1 %v1581_v10  ;;  %v1609_v10 = vpack.c.bf16 %v619_v5, %v615_v4  ;;  %v630_v5 = vld [vmem:[%s3423_s3 + $0x90] sm:$0xff] }
  0xc1   :  { %1424 = vmatmul.mubr.f32.gmra.mrb[6].mxu0 %v56_v11  ;;  %v652_v11 = vld [vmem:[%s3423_s3 + $0x140] sm:$0xff] }
  0xc2   :  { %1426 = vmatprep.mubr.msk.f32.mxu0 %vm1930_vm0, %v1931_v6 }
  0xc5   :  { %1427 = vmatmul.mubr.f32.gmra.mrb[8].mxu0 %v59_v12  ;;  %v656_v12 = vld [vmem:[%s3423_s3 + $0x160] sm:$0xff] }
  0xc6   :  { %1429 = vmatprep.mubr.msk.f32.mxu0 %vm1930_vm0, %v1931_v6 }
  0xc9   :  { %1430 = vmatmul.mubr.f32.gmra.mrb[10].mxu0 %v62_v13  ;;  %v661_v13 = vld [vmem:[%s3423_s3 + $0x188] sm:$0xff] }
  0xca   :  { %1432 = vmatprep.mubr.msk.f32.mxu0 %vm1930_vm0, %v1931_v6 }
  0xcd   :  { %1433 = vmatmul.mubr.f32.gmra.mrb[12].mxu0 %v65_v14  ;;  %v665_v14 = vld [vmem:[%s3423_s3 + $0x1a8] sm:$0xff] }
  0xce   :  { %1435 = vmatprep.mubr.msk.f32.mxu0 %vm1930_vm0, %v1931_v6 }
  0xd1   :  { %1436 = vmatmul.mubr.f32.gmra.mrb[14].mxu0 %v68_v15  ;;  %v1583_v15 = vpack.c.bf16 %v656_v12, %v652_v11 }
  0xd2   :  { %1438 = vmatprep.mubr.msk.f32.mxu0 %vm1930_vm0, %v1931_v6 }
  0xd3   :  { %1584 = vmatpush1.bf16.msra.mxu1 %v1583_v15 }
  0xd5   :  { %1439 = vmatmul.mubr.f32.gmra.mrb[16].mxu0 %v71_v16  ;;  %v1585_v16 = vpack.c.bf16 %v665_v14, %v661_v13 }
  0xd6   :  { %1441 = vmatprep.mubr.msk.f32.mxu0 %vm1930_vm0, %v1931_v6 }
  0xd7   :  { %1586 = vmatprep.subr.bf16.mxu1 %v1585_v16 }
  0xd9   :  { %1442 = vmatmul.mubr.f32.gmra.mrb[18].mxu0 %v74_v17  ;;  %v660_v17 = vld [vmem:[%s3423_s3 + $0x180] sm:$0xff] }
  0xda   :  { %1444 = vmatprep.mubr.msk.f32.mxu0 %vm1930_vm0, %v1931_v6 }
  0xdd   :  { %1445 = vmatmul.mubr.f32.gmra.mrb[20].mxu0 %v77_v18  ;;  %v664_v18 = vld [vmem:[%s3423_s3 + $0x1a0] sm:$0xff] }
  0xde   :  { %1447 = vmatprep.mubr.msk.f32.mxu0 %vm1930_vm0, %v1931_v6 }
  0xe1   :  { %1448 = vmatmul.mubr.f32.gmra.mrb[22].mxu0 %v80_v20  ;;  %v669_v20 = vld [vmem:[%s3423_s3 + $0x1c8] sm:$0xff] }
  0xe2   :  { %1450 = vmatprep.mubr.msk.f32.mxu0 %vm1930_vm0, %v1931_v6 }
  0xe5   :  { %1451 = vmatmul.mubr.f32.gmra.mrb[24].mxu0 %v83_v21  ;;  %v673_v21 = vld [vmem:[%s3423_s3 + $0x1e8] sm:$0xff] }
  0xe6   :  { %1453 = vmatprep.mubr.msk.f32.mxu0 %vm1930_vm0, %v1931_v6 }
  0xe9   :  { %1454 = vmatmul.mubr.f32.gmra.mrb[26].mxu0 %v86_v22  ;;  %v1587_v22 = vpack.c.bf16 %v664_v18, %v660_v17 }
  0xea   :  { %1456 = vmatprep.mubr.msk.f32.mxu0 %vm1930_vm0, %v1931_v6 }
  0xeb   :  { %1588 = vmatpush1.bf16.msra.mxu1 %v1587_v22 }
  0xed   :  { %1457 = vmatmul.mubr.f32.gmra.mrb[28].mxu0 %v89_v24  ;;  %v1589_v24 = vpack.c.bf16 %v673_v21, %v669_v20 }
  0xee   :  { %1459 = vmatprep.mubr.msk.f32.mxu0 %vm1930_vm0, %v1931_v6 }
  0xef   :  { %1590 = vmatprep.subr.bf16.mxu1 %v1589_v24 }
  0xf1   :  { %1460 = vmatmul.mubr.f32.gmra.mrb[30].mxu0 %v92_v25  ;;  %v668_v25 = vld [vmem:[%s3423_s3 + $0x1c0] sm:$0xff] }
 0x107   :  { %v2468_v19 = vpop.f32.mrb[0].mxu1 }
 0x108   :  { %v1464_v26 = vpop.f32.mrb[1].mxu1 }
 0x109   :  { %v672_v26 = vld [vmem:[%s3423_s3 + $0x1e0] sm:$0xff] }
 0x10b   :  { %v2470_v27 = vpop.f32.mrb[2].mxu1 }
 0x10c   :  { %v1467_v29 = vpop.f32.mrb[3].mxu1 }
 0x10d   :  { %v677_v29 = vld [vmem:[%s3423_s3 + $0x208] sm:$0xff] }
 0x10f   :  { %v2472_v23 = vpop.f32.mrb[4].mxu1 }
 0x110   :  { %v1470_v30 = vpop.f32.mrb[5].mxu1 }
 0x111   :  { %v681_v30 = vld [vmem:[%s3423_s3 + $0x228] sm:$0xff] }
 0x113   :  { %v2474_v31 = vpop.f32.mrb[6].mxu1 }
 0x114   :  { %v1473_v32 = vpop.f32.mrb[7].mxu1 }
 0x115   :  { %v1591_v32 = vpack.c.bf16 %v672_v26, %v668_v25 }
 0x117   :  { %v2476_v28 = vpop.f32.mrb[8].mxu1  ;;  %1592 = vmatpush1.bf16.msra.mxu1 %v1591_v32 }
 0x118   :  { %v1476_v6 = vpop.f32.mrb[9].mxu1 }
 0x119   :  { %v1593_v6 = vpack.c.bf16 %v681_v30, %v677_v29 }
 0x11b   :  { %v2478_v33 = vpop.f32.mrb[10].mxu1  ;;  %1594 = vmatprep.subr.bf16.mxu1 %v1593_v6 }
 0x11c   :  { %v1479_v34 = vpop.f32.mrb[11].mxu1 }
 0x11d   :  { %v676_v34 = vld [vmem:[%s3423_s3 + $0x200] sm:$0xff] }
 0x11f   :  { %v2480_v35 = vpop.f32.mrb[12].mxu1 }
 0x120   :  { %v1482_v36 = vpop.f32.mrb[13].mxu1 }
 0x121   :  { %v680_v36 = vld [vmem:[%s3423_s3 + $0x220] sm:$0xff] }
 0x122   :  { %v1595_v43 = vpack.c.bf16 %v680_v36, %v676_v34 }
 0x124   :  { %1596 = vmatpush1.bf16.msra.mxu1 %v1595_v43 }
 0x126   :  { %v2482_v37 = vpop.f32.mrb[14].mxu1 }
 0x127   :  { %v1485_v38 = vpop.f32.mrb[15].mxu1 }
 0x128   :  { %v685_v38 = vld [vmem:[%s3423_s3 + $0x248] sm:$0xff] }
 0x12a   :  { %v2484_v39 = vpop.f32.mrb[16].mxu1 }
 0x12b   :  { %v1488_v40 = vpop.f32.mrb[17].mxu1 }
 0x12c   :  { %v689_v40 = vld [vmem:[%s3423_s3 + $0x268] sm:$0xff] }
 0x12d   :  { %v1597_v44 = vpack.c.bf16 %v689_v40, %v685_v38 }
 0x12f   :  { %1598 = vmatprep.subr.bf16.mxu1 %v1597_v44 }
 0x130   :  { %1600 = vmatpush1.bf16.msra.mxu1 %v1599_v51 }
 0x164   :  { %v314_v3 = vpop.f32.mrb[32].mxu0 }
 0x165   :  { %v316_v41 = vpop.f32.mrb[33].mxu0  ;;  %v505_v42 = vadd.f32 %v2468_v19, %v314_v3  ;;  %v697_v19 = vld [vmem:[%s3423_s3 + $0x2a8] sm:$0xff] }
 0x166   :  { %v1601_v52 = vpack.c.bf16 %v697_v19, %v693_v47 }
 0x167   :  { %580 = vxpose.xlu0.b32.start [1/9] (short) (narrow) %v505_v42, 8 }
 0x168   :  { %v319_v48 = vpop.f32.mrb[34].mxu0  ;;  %1602 = vmatprep.subr.bf16.mxu1 %v1601_v52 }
 0x169   :  { %v321_v49 = vpop.f32.mrb[35].mxu0  ;;  %v510_v50 = vadd.f32 %v2470_v27, %v319_v48  ;;  %v705_v27 = vld [vmem:[%s3423_s3 + $0x2e8] sm:$0xff]  ;;  %1604 = vmatpush1.bf16.msra.mxu1 %v1603_v59  ;;  %v627_v59 = vld [vmem:[%s3423_s3 + $0x78] sm:$0xff] }
 0x16a   :  { %v1605_v60 = vpack.c.bf16 %v705_v27, %v701_v55 }
 0x16b   :  { %581 = vxpose.xlu0.b32.cont [2/9] (short) (narrow) %v510_v50, 8 }
 0x16c   :  { %v324_v56 = vpop.f32.mrb[36].mxu0  ;;  %1606 = vmatprep.subr.bf16.mxu1 %v1605_v60 }
 0x16d   :  { %v326_v57 = vpop.f32.mrb[37].mxu0  ;;  %v515_v58 = vadd.f32 %v2472_v23, %v324_v56  ;;  %v709_v23 = vld [vmem:[%s3423_s3 + $0x308] sm:$0xff]  ;;  %1608 = vmatpush1.bf16.msra.mxu1 %v1607_v2  ;;  %v614_v56 = vld [vmem:[%s3423_s3 + $0x10] sm:$0xff]  ;;  %v635_v2 = vld [vmem:[%s3423_s3 + $0xb8] sm:$0xff] }
 0x16e   :  { %786 = vmatprep.subr.mxu1 %v709_v23  ;;  %v618_v57 = vld [vmem:[%s3423_s3 + $0x30] sm:$0xff] }
 0x16f   :  { %582 = vxpose.xlu0.b32.cont [3/9] (short) (narrow) %v515_v58, 8  ;;  %v623_v58 = vld [vmem:[%s3423_s3 + $0x58] sm:$0xff]  ;;  %v1611_v60 = vpack.c.bf16 %v618_v57, %v614_v56 }
 0x170   :  { %v329_v63 = vpop.f32.mrb[38].mxu0  ;;  %v1613_v61 = vpack.c.bf16 %v627_v59, %v623_v58  ;;  %v707_v56 = vld [vmem:[%s3423_s3 + $0x2f8] sm:$0xff]  ;;  %v702_v59 = vld [vmem:[%s3423_s3 + $0x2d0] sm:$0xff] }
 0x171   :  { %v331_v0 = vpop.f32.mrb[39].mxu0  ;;  %v520_v1 = vadd.f32 %v2474_v31, %v329_v63  ;;  %787 = vmatpush1.msra.mxu1 %v708_v9  ;;  %v626_v63 = vld [vmem:[%s3423_s3 + $0x70] sm:$0xff] }
 0x172   :  { %1610 = vmatprep.subr.bf16.mxu1 %v1609_v10  ;;  %v1615_v23 = vpack.c.bf16 %v626_v63, %v622_v62  ;;  %v711_v62 = vld [vmem:[%s3423_s3 + $0x318] sm:$0xff]  ;;  %v895_v63 = vld [vmem:[%s3425_s5 + $0x8] sm:$0xff] }
 0x173   :  { %583 = vxpose.xlu0.b32.cont [4/9] (short) (narrow) %v520_v1, 8  ;;  %v631_v1 = vld [vmem:[%s3423_s3 + $0x98] sm:$0xff] }
 0x174   :  { %v334_v7 = vpop.f32.mrb[40].mxu0  ;;  %v1617_v4 = vpack.c.bf16 %v635_v2, %v631_v1  ;;  %v897_v1 = vld [vmem:[%s3425_s5 + $0x18] sm:$0xff]  ;;  %v894_v2 = vld [vmem:[%s3425_s5] sm:$0xff] }
 0x175   :  { %v336_v8 = vpop.f32.mrb[41].mxu0  ;;  %v525_v31 = vadd.f32 %v2476_v28, %v334_v7  ;;  %v634_v7 = vld [vmem:[%s3423_s3 + $0xb0] sm:$0xff] }
 0x176   :  { %v639_v8 = vld [vmem:[%s3423_s3 + $0xd8] sm:$0xff]  ;;  %v1619_v9 = vpack.c.bf16 %v634_v7, %v630_v5  ;;  %v710_v7 = vld [vmem:[%s3423_s3 + $0x310] sm:$0xff] }
 0x177   :  { %584 = vxpose.xlu0.b32.cont [5/9] (short) (narrow) %v525_v31, 8  ;;  %v643_v31 = vld [vmem:[%s3423_s3 + $0xf8] sm:$0xff] }
 0x178   :  { %v339_v11 = vpop.f32.mrb[42].mxu0  ;;  %v1621_v10 = vpack.c.bf16 %v643_v31, %v639_v8  ;;  %v901_v5 = vld [vmem:[%s3425_s5 + $0x38] sm:$0xff]  ;;  %v1657_v8 = vpack.c.bf16 %v897_v1, %v895_v63  ;;  %v934_v63 = vld [vmem:[%s3425_s5 + $0x140] sm:$0xff]  ;;  %v936_v1 = vld [vmem:[%s3425_s5 + $0x150] sm:$0xff] }
 0x179   :  { %v341_v12 = vpop.f32.mrb[43].mxu0  ;;  %v530_v13 = vadd.f32 %v2478_v33, %v339_v11  ;;  %v638_v11 = vld [vmem:[%s3423_s3 + $0xd0] sm:$0xff] }
 0x17a   :  { %v642_v12 = vld [vmem:[%s3423_s3 + $0xf0] sm:$0xff] }
 0x17b   :  { %585 = vxpose.xlu0.b32.cont [6/9] (short) (narrow) %v530_v13, 8  ;;  %v647_v13 = vld [vmem:[%s3423_s3 + $0x118] sm:$0xff] }
 0x17c   :  { %v344_v14 = vpop.f32.mrb[44].mxu0 }
 0x17d   :  { %v346_v15 = vpop.f32.mrb[45].mxu0  ;;  %v535_v16 = vadd.f32 %v2480_v35, %v344_v14  ;;  %v651_v14 = vld [vmem:[%s3423_s3 + $0x138] sm:$0xff] }
 0x17e   :  { %v1623_v15 = vpack.c.bf16 %v642_v12, %v638_v11  ;;  %v900_v11 = vld [vmem:[%s3425_s5 + $0x30] sm:$0xff]  ;;  %v903_v12 = vld [vmem:[%s3425_s5 + $0x48] sm:$0xff] }
 0x17f   :  { %586 = vxpose.xlu0.b32.cont [7/9] (short) (narrow) %v535_v16, 8  ;;  %v1625_v16 = vpack.c.bf16 %v651_v14, %v647_v13  ;;  %v905_v13 = vld [vmem:[%s3425_s5 + $0x58] sm:$0xff] }
 0x180   :  { %v349_v28 = vpop.f32.mrb[46].mxu0 }
 0x181   :  { %v351_v17 = vpop.f32.mrb[47].mxu0  ;;  %v540_v18 = vadd.f32 %v2482_v37, %v349_v28  ;;  %v646_v28 = vld [vmem:[%s3423_s3 + $0x110] sm:$0xff] }
 0x182   :  { %v650_v17 = vld [vmem:[%s3423_s3 + $0x130] sm:$0xff] }
 0x183   :  { %587 = vxpose.xlu0.b32.cont [8/9] (short) (narrow) %v540_v18, 8  ;;  %v655_v18 = vld [vmem:[%s3423_s3 + $0x158] sm:$0xff] }
 0x184   :  { %v354_v20 = vpop.f32.mrb[48].mxu0 }
 0x185   :  { %v356_v21 = vpop.f32.mrb[49].mxu0  ;;  %v545_v22 = vadd.f32 %v2484_v39, %v354_v20  ;;  %v659_v20 = vld [vmem:[%s3423_s3 + $0x178] sm:$0xff] }
 0x186   :  { %v1627_v21 = vpack.c.bf16 %v650_v17, %v646_v28  ;;  %v904_v28 = vld [vmem:[%s3425_s5 + $0x50] sm:$0xff]  ;;  %v907_v17 = vld [vmem:[%s3425_s5 + $0x68] sm:$0xff] }
 0x187   :  { %588 = vxpose.xlu0.b32.end [9/9] (short) (narrow) %v545_v22, 8  ;;  %v1629_v22 = vpack.c.bf16 %v659_v20, %v655_v18 }
 0x188   :  { %v424_v24 = vpop.f32.mrb[0].mxu0 }
 0x189   :  { %548 = vxpose.xlu1.b32.start [1/16] (narrow) %v424_v24, 8  ;;  %v1416_v33 = vpop.f32.mrb[1].mxu0  ;;  %v654_v24 = vld [vmem:[%s3423_s3 + $0x150] sm:$0xff] }
 0x18a   :  { %v658_v33 = vld [vmem:[%s3423_s3 + $0x170] sm:$0xff] }
 0x18c   :  { %v429_v25 = vpop.f32.mrb[2].mxu0 }
 0x18d   :  { %549 = vxpose.xlu1.b32.cont [2/16] (narrow) %v429_v25, 8  ;;  %v1419_v26 = vpop.f32.mrb[3].mxu0  ;;  %v663_v25 = vld [vmem:[%s3423_s3 + $0x198] sm:$0xff] }
 0x18e   :  { %v667_v26 = vld [vmem:[%s3423_s3 + $0x1b8] sm:$0xff] }
 0x190   :  { %v434_v29 = vpop.f32.mrb[4].mxu0 }
 0x191   :  { %550 = vxpose.xlu1.b32.cont [3/16] (narrow) %v434_v29, 8  ;;  %v1422_v35 = vpop.f32.mrb[5].mxu0  ;;  %v1631_v29 = vpack.c.bf16 %v658_v33, %v654_v24  ;;  %v911_v24 = vld [vmem:[%s3425_s5 + $0x88] sm:$0xff]  ;;  %v913_v33 = vld [vmem:[%s3425_s5 + $0x98] sm:$0xff] }
 0x192   :  { %v1633_v35 = vpack.c.bf16 %v667_v26, %v663_v25  ;;  %v1673_v26 = vpack.c.bf16 %v913_v33, %v911_v24  ;;  %v950_v24 = vld [vmem:[%s3425_s5 + $0x1c0] sm:$0xff]  ;;  %v952_v33 = vld [vmem:[%s3425_s5 + $0x1d0] sm:$0xff] }
 0x194   :  { %v439_v30 = vpop.f32.mrb[6].mxu0 }
 0x195   :  { %551 = vxpose.xlu1.b32.cont [4/16] (narrow) %v439_v30, 8  ;;  %v1425_v32 = vpop.f32.mrb[7].mxu0  ;;  %v662_v30 = vld [vmem:[%s3423_s3 + $0x190] sm:$0xff] }
 0x196   :  { %v666_v32 = vld [vmem:[%s3423_s3 + $0x1b0] sm:$0xff] }
 0x198   :  { %v444_v6 = vpop.f32.mrb[8].mxu0 }
 0x199   :  { %552 = vxpose.xlu1.b32.cont [5/16] (narrow) %v444_v6, 8  ;;  %v1428_v37 = vpop.f32.mrb[9].mxu0  ;;  %v671_v6 = vld [vmem:[%s3423_s3 + $0x1d8] sm:$0xff] }
 0x19a   :  { %v675_v37 = vld [vmem:[%s3423_s3 + $0x1f8] sm:$0xff] }
 0x19c   :  { %v449_v34 = vpop.f32.mrb[10].mxu0 }
 0x19d   :  { %553 = vxpose.xlu1.b32.cont [6/16] (narrow) %v449_v34, 8  ;;  %v1431_v36 = vpop.f32.mrb[11].mxu0  ;;  %v1635_v34 = vpack.c.bf16 %v666_v32, %v662_v30  ;;  %v915_v30 = vld [vmem:[%s3425_s5 + $0xa8] sm:$0xff]  ;;  %v917_v32 = vld [vmem:[%s3425_s5 + $0xb8] sm:$0xff] }
 0x19e   :  { %v1637_v36 = vpack.c.bf16 %v675_v37, %v671_v6  ;;  %v1677_v37 = vpack.c.bf16 %v917_v32, %v915_v30  ;;  %v954_v30 = vld [vmem:[%s3425_s5 + $0x1e0] sm:$0xff]  ;;  %v956_v32 = vld [vmem:[%s3425_s5 + $0x1f0] sm:$0xff] }
 0x1a0   :  { %v454_v39 = vpop.f32.mrb[12].mxu0 }
 0x1a1   :  { %554 = vxpose.xlu1.b32.cont [7/16] (narrow) %v454_v39, 8  ;;  %v1434_v38 = vpop.f32.mrb[13].mxu0  ;;  %v670_v39 = vld [vmem:[%s3423_s3 + $0x1d0] sm:$0xff] }
 0x1a2   :  { %v674_v38 = vld [vmem:[%s3423_s3 + $0x1f0] sm:$0xff] }
 0x1a4   :  { %v459_v40 = vpop.f32.mrb[14].mxu0 }
 0x1a5   :  { %555 = vxpose.xlu1.b32.cont [8/16] (narrow) %v459_v40, 8  ;;  %v1437_v3 = vpop.f32.mrb[15].mxu0  ;;  %v679_v40 = vld [vmem:[%s3423_s3 + $0x218] sm:$0xff] }
 0x1a6   :  { %v683_v3 = vld [vmem:[%s3423_s3 + $0x238] sm:$0xff] }
 0x1a8   :  { %v464_v41 = vpop.f32.mrb[16].mxu0 }
 0x1a9   :  { %556 = vxpose.xlu1.b32.cont [9/16] (narrow) %v464_v41, 8  ;;  %v1440_v42 = vpop.f32.mrb[17].mxu0  ;;  %v1639_v41 = vpack.c.bf16 %v674_v38, %v670_v39  ;;  %v919_v39 = vld [vmem:[%s3425_s5 + $0xc8] sm:$0xff]  ;;  %v921_v38 = vld [vmem:[%s3425_s5 + $0xd8] sm:$0xff] }
 0x1aa   :  { %v1641_v42 = vpack.c.bf16 %v683_v3, %v679_v40  ;;  %v1681_v3 = vpack.c.bf16 %v921_v38, %v919_v39  ;;  %v1185_v39 = vld [vmem:[%s3427_s7 + $0x8] sm:$0xff]  ;;  %v1187_v38 = vld [vmem:[%s3427_s7 + $0x18] sm:$0xff] }
 0x1ac   :  { %v469_v43 = vpop.f32.mrb[18].mxu0 }
 0x1ad   :  { %557 = vxpose.xlu1.b32.cont [10/16] (narrow) %v469_v43, 8  ;;  %v1443_v44 = vpop.f32.mrb[19].mxu0  ;;  %v678_v43 = vld [vmem:[%s3423_s3 + $0x210] sm:$0xff] }
 0x1ae   :  { %v682_v44 = vld [vmem:[%s3423_s3 + $0x230] sm:$0xff] }
 0x1b0   :  { %v474_v45 = vpop.f32.mrb[20].mxu0 }
 0x1b1   :  { %558 = vxpose.xlu1.b32.cont [11/16] (narrow) %v474_v45, 8  ;;  %v1446_v46 = vpop.f32.mrb[21].mxu0  ;;  %v687_v45 = vld [vmem:[%s3423_s3 + $0x258] sm:$0xff] }
 0x1b2   :  { %v691_v46 = vld [vmem:[%s3423_s3 + $0x278] sm:$0xff] }
 0x1b4   :  { %v479_v47 = vpop.f32.mrb[22].mxu0 }
 0x1b5   :  { %559 = vxpose.xlu1.b32.cont [12/16] (narrow) %v479_v47, 8  ;;  %v1449_v19 = vpop.f32.mrb[23].mxu0  ;;  %v1643_v47 = vpack.c.bf16 %v682_v44, %v678_v43  ;;  %v923_v43 = vld [vmem:[%s3425_s5 + $0xe8] sm:$0xff]  ;;  %v925_v44 = vld [vmem:[%s3425_s5 + $0xf8] sm:$0xff] }
 0x1b6   :  { %v1645_v19 = vpack.c.bf16 %v691_v46, %v687_v45  ;;  %v1685_v46 = vpack.c.bf16 %v925_v44, %v923_v43  ;;  %v1191_v43 = vld [vmem:[%s3427_s7 + $0x38] sm:$0xff] }
 0x1b8   :  { %v484_v48 = vpop.f32.mrb[24].mxu0 }
 0x1b9   :  { %560 = vxpose.xlu1.b32.cont [13/16] (narrow) %v484_v48, 8  ;;  %v1452_v49 = vpop.f32.mrb[25].mxu0  ;;  %v686_v48 = vld [vmem:[%s3423_s3 + $0x250] sm:$0xff] }
 0x1ba   :  { %v690_v49 = vld [vmem:[%s3423_s3 + $0x270] sm:$0xff] }
 0x1bc   :  { %v489_v50 = vpop.f32.mrb[26].mxu0 }
 0x1bd   :  { %561 = vxpose.xlu1.b32.cont [14/16] (narrow) %v489_v50, 8  ;;  %v1455_v51 = vpop.f32.mrb[27].mxu0  ;;  %v695_v50 = vld [vmem:[%s3423_s3 + $0x298] sm:$0xff] }
 0x1be   :  { %v699_v51 = vld [vmem:[%s3423_s3 + $0x2b8] sm:$0xff] }
 0x1c0   :  { %v494_v52 = vpop.f32.mrb[28].mxu0 }
 0x1c1   :  { %562 = vxpose.xlu1.b32.cont [15/16] (narrow) %v494_v52, 8  ;;  %v1458_v53 = vpop.f32.mrb[29].mxu0  ;;  %v1647_v52 = vpack.c.bf16 %v690_v49, %v686_v48  ;;  %v927_v48 = vld [vmem:[%s3425_s5 + $0x108] sm:$0xff]  ;;  %v929_v49 = vld [vmem:[%s3425_s5 + $0x118] sm:$0xff] }
 0x1c2   :  { %v1649_v53 = vpack.c.bf16 %v699_v51, %v695_v50  ;;  %v1689_v51 = vpack.c.bf16 %v929_v49, %v927_v48  ;;  %v1195_v48 = vld [vmem:[%s3427_s7 + $0x58] sm:$0xff] }
 0x1c4   :  { %v499_v54 = vpop.f32.mrb[30].mxu0 }
 0x1c5   :  { %563 = vxpose.xlu1.b32.end [16/16] (narrow) %v499_v54, 8  ;;  %v1461_v55 = vpop.f32.mrb[31].mxu0  ;;  %v694_v54 = vld [vmem:[%s3423_s3 + $0x290] sm:$0xff] }
 0x1c6   :  { %v698_v55 = vld [vmem:[%s3423_s3 + $0x2b0] sm:$0xff] }
 0x1c7   :  { %v1651_v57 = vpack.c.bf16 %v698_v55, %v694_v54  ;;  %v931_v54 = vld [vmem:[%s3425_s5 + $0x128] sm:$0xff]  ;;  %v933_v55 = vld [vmem:[%s3425_s5 + $0x138] sm:$0xff] }
 0x1e7   :  { %v596_v27 = vpop.trf.xlu0 }
 0x1e8   :  { %1338 = vmatprep.mubr.msk.f32.mxu1 %vm734_vm1, %v596_v27 }
 0x209   :  { %v2670_v0 = vpop.trf.xlu1 }
 0x20a   :  { %803 = vmatmul.mubr.f32.vlgmr.msra.gmra.mrb[18].mxu1 %v2670_v0 }
 0x20b   :  { %1612 = vmatpush1.bf16.msra.mxu1 %v1611_v60  ;;  %1339 = vmatprep.mubr.msk.f32.mxu1 %vm734_vm1, %v596_v27  ;;  %v703_v27 = vld [vmem:[%s3423_s3 + $0x2d8] sm:$0xff]  ;;  %v706_v60 = vld [vmem:[%s3423_s3 + $0x2f0] sm:$0xff] }
 0x20c   :  { %1614 = vmatprep.subr.bf16.mxu1 %v1613_v61  ;;  %v1653_v58 = vpack.c.bf16 %v707_v56, %v703_v27  ;;  %v1655_v61 = vpack.c.bf16 %v706_v60, %v702_v59  ;;  %v1693_v56 = vpack.c.bf16 %v933_v55, %v931_v54  ;;  %v935_v59 = vld [vmem:[%s3425_s5 + $0x148] sm:$0xff]  ;;  %v937_v60 = vld [vmem:[%s3425_s5 + $0x158] sm:$0xff] }
 0x20d   :  { %v1199_v54 = vld [vmem:[%s3427_s7 + $0x78] sm:$0xff] }
 0x20f   :  { %1616 = vmatpush1.bf16.msra.mxu1 %v1615_v23  ;;  %v896_v23 = vld [vmem:[%s3425_s5 + $0x10] sm:$0xff] }
 0x210   :  { %1618 = vmatprep.subr.bf16.mxu1 %v1617_v4  ;;  %v899_v4 = vld [vmem:[%s3425_s5 + $0x28] sm:$0xff]  ;;  %v1659_v31 = vpack.c.bf16 %v896_v23, %v894_v2  ;;  %v941_v23 = vld [vmem:[%s3425_s5 + $0x178] sm:$0xff] }
 0x211   :  { %v939_v2 = vld [vmem:[%s3425_s5 + $0x168] sm:$0xff] }
 0x213   :  { %1620 = vmatpush1.bf16.msra.mxu1 %v1619_v9  ;;  %v1661_v9 = vpack.c.bf16 %v901_v5, %v899_v4  ;;  %v1699_v4 = vpack.c.bf16 %v936_v1, %v934_v63  ;;  %v1701_v5 = vpack.c.bf16 %v941_v23, %v939_v2  ;;  %v1202_v63 = vld [vmem:[%s3427_s7 + $0x90] sm:$0xff]  ;;  %v1205_v1 = vld [vmem:[%s3427_s7 + $0xa8] sm:$0xff]  ;;  %v1207_v2 = vld [vmem:[%s3427_s7 + $0xb8] sm:$0xff] }
 0x214   :  { %1622 = vmatprep.subr.bf16.mxu1 %v1621_v10  ;;  %v898_v10 = vld [vmem:[%s3425_s5 + $0x20] sm:$0xff] }
 0x215   :  { %v1663_v14 = vpack.c.bf16 %v900_v11, %v898_v10 }
 0x217   :  { %1624 = vmatpush1.bf16.msra.mxu1 %v1623_v15  ;;  %v1665_v15 = vpack.c.bf16 %v905_v13, %v903_v12  ;;  %v942_v12 = vld [vmem:[%s3425_s5 + $0x180] sm:$0xff]  ;;  %v944_v13 = vld [vmem:[%s3425_s5 + $0x190] sm:$0xff] }
 0x218   :  { %1626 = vmatprep.subr.bf16.mxu1 %v1625_v16  ;;  %v902_v16 = vld [vmem:[%s3425_s5 + $0x40] sm:$0xff] }
 0x219   :  { %v1667_v18 = vpack.c.bf16 %v904_v28, %v902_v16  ;;  %v1707_v16 = vpack.c.bf16 %v944_v13, %v942_v12  ;;  %v1210_v12 = vld [vmem:[%s3427_s7 + $0xd0] sm:$0xff]  ;;  %v1213_v13 = vld [vmem:[%s3427_s7 + $0xe8] sm:$0xff] }
 0x21b   :  { %1628 = vmatpush1.bf16.msra.mxu1 %v1627_v21  ;;  %v906_v21 = vld [vmem:[%s3425_s5 + $0x60] sm:$0xff] }
 0x21c   :  { %1630 = vmatprep.subr.bf16.mxu1 %v1629_v22  ;;  %v908_v22 = vld [vmem:[%s3425_s5 + $0x70] sm:$0xff] }
 0x21d   :  { %v1671_v25 = vpack.c.bf16 %v908_v22, %v906_v21 }
 0x21f   :  { %1632 = vmatpush1.bf16.msra.mxu1 %v1631_v29  ;;  %v910_v29 = vld [vmem:[%s3425_s5 + $0x80] sm:$0xff] }
 0x220   :  { %1634 = vmatprep.subr.bf16.mxu1 %v1633_v35  ;;  %v912_v35 = vld [vmem:[%s3425_s5 + $0x90] sm:$0xff] }
 0x221   :  { %v1675_v6 = vpack.c.bf16 %v912_v35, %v910_v29  ;;  %v1715_v29 = vpack.c.bf16 %v952_v33, %v950_v24  ;;  %v1218_v24 = vld [vmem:[%s3427_s7 + $0x110] sm:$0xff]  ;;  %v1221_v33 = vld [vmem:[%s3427_s7 + $0x128] sm:$0xff] }
 0x223   :  { %1636 = vmatpush1.bf16.msra.mxu1 %v1635_v34  ;;  %v914_v34 = vld [vmem:[%s3425_s5 + $0xa0] sm:$0xff] }
 0x224   :  { %1638 = vmatprep.subr.bf16.mxu1 %v1637_v36  ;;  %v916_v36 = vld [vmem:[%s3425_s5 + $0xb0] sm:$0xff] }
 0x225   :  { %v1679_v40 = vpack.c.bf16 %v916_v36, %v914_v34  ;;  %v1719_v34 = vpack.c.bf16 %v956_v32, %v954_v30  ;;  %v1222_v30 = vld [vmem:[%s3427_s7 + $0x130] sm:$0xff]  ;;  %v1225_v32 = vld [vmem:[%s3427_s7 + $0x148] sm:$0xff] }
 0x227   :  { %1640 = vmatpush1.bf16.msra.mxu1 %v1639_v41  ;;  %v918_v41 = vld [vmem:[%s3425_s5 + $0xc0] sm:$0xff] }
 0x228   :  { %1642 = vmatprep.subr.bf16.mxu1 %v1641_v42  ;;  %v920_v42 = vld [vmem:[%s3425_s5 + $0xd0] sm:$0xff] }
 0x229   :  { %v1683_v45 = vpack.c.bf16 %v920_v42, %v918_v41  ;;  %v1186_v41 = vld [vmem:[%s3427_s7 + $0x10] sm:$0xff]  ;;  %v1189_v42 = vld [vmem:[%s3427_s7 + $0x28] sm:$0xff] }
 0x22b   :  { %1644 = vmatpush1.bf16.msra.mxu1 %v1643_v47  ;;  %v922_v47 = vld [vmem:[%s3425_s5 + $0xe0] sm:$0xff] }
 0x22c   :  { %1646 = vmatprep.subr.bf16.mxu1 %v1645_v19  ;;  %v924_v19 = vld [vmem:[%s3425_s5 + $0xf0] sm:$0xff] }
 0x22d   :  { %v1687_v50 = vpack.c.bf16 %v924_v19, %v922_v47  ;;  %v1190_v47 = vld [vmem:[%s3427_s7 + $0x30] sm:$0xff]  ;;  %v1193_v19 = vld [vmem:[%s3427_s7 + $0x48] sm:$0xff] }
 0x22f   :  { %1648 = vmatpush1.bf16.msra.mxu1 %v1647_v52  ;;  %v926_v52 = vld [vmem:[%s3425_s5 + $0x100] sm:$0xff] }
 0x230   :  { %1650 = vmatprep.subr.bf16.mxu1 %v1649_v53  ;;  %v928_v53 = vld [vmem:[%s3425_s5 + $0x110] sm:$0xff] }
 0x231   :  { %v1691_v27 = vpack.c.bf16 %v928_v53, %v926_v52  ;;  %v1194_v52 = vld [vmem:[%s3427_s7 + $0x50] sm:$0xff]  ;;  %v1197_v53 = vld [vmem:[%s3427_s7 + $0x68] sm:$0xff] }
 0x233   :  { %1652 = vmatpush1.bf16.msra.mxu1 %v1651_v57  ;;  %v930_v57 = vld [vmem:[%s3425_s5 + $0x120] sm:$0xff] }
 0x234   :  { %1654 = vmatprep.subr.bf16.mxu1 %v1653_v58  ;;  %v932_v58 = vld [vmem:[%s3425_s5 + $0x130] sm:$0xff] }
 0x237   :  { %1656 = vmatpush1.bf16.msra.mxu1 %v1655_v61  ;;  %v1695_v61 = vpack.c.bf16 %v932_v58, %v930_v57  ;;  %v1198_v57 = vld [vmem:[%s3427_s7 + $0x70] sm:$0xff]  ;;  %v1201_v58 = vld [vmem:[%s3427_s7 + $0x88] sm:$0xff] }
 0x238   :  { %857 = vmatprep.subr.mxu1 %v711_v62  ;;  %v1697_v62 = vpack.c.bf16 %v937_v60, %v935_v59  ;;  %v1203_v59 = vld [vmem:[%s3427_s7 + $0x98] sm:$0xff] }
 0x23b   :  { %858 = vmatpush1.msra.mxu1 %v710_v7  ;;  %v938_v7 = vld [vmem:[%s3425_s5 + $0x160] sm:$0xff] }
 0x23c   :  { %874 = vmatmul.mubr.f32.vlgmr.msra.gmra.mrb[20].mxu1 %v2670_v0  ;;  %1658 = vmatprep.subr.bf16.mxu1 %v1657_v8  ;;  %v909_v0 = vld [vmem:[%s3425_s5 + $0x78] sm:$0xff]  ;;  %v940_v8 = vld [vmem:[%s3425_s5 + $0x170] sm:$0xff] }
 0x23d   :  { %1660 = vmatpush1.bf16.msra.mxu1 %v1659_v31  ;;  %v1669_v20 = vpack.c.bf16 %v909_v0, %v907_v17  ;;  %v943_v31 = vld [vmem:[%s3425_s5 + $0x188] sm:$0xff]  ;;  %v1703_v10 = vpack.c.bf16 %v940_v8, %v938_v7  ;;  %v946_v17 = vld [vmem:[%s3425_s5 + $0x1a0] sm:$0xff]  ;;  %v948_v0 = vld [vmem:[%s3425_s5 + $0x1b0] sm:$0xff] }
 0x23e   :  { %1662 = vmatprep.subr.bf16.mxu1 %v1661_v9  ;;  %v945_v9 = vld [vmem:[%s3425_s5 + $0x198] sm:$0xff]  ;;  %v1711_v21 = vpack.c.bf16 %v948_v0, %v946_v17  ;;  %v1206_v7 = vld [vmem:[%s3427_s7 + $0xb0] sm:$0xff]  ;;  %v1209_v8 = vld [vmem:[%s3427_s7 + $0xc8] sm:$0xff] }
 0x23f   :  { %v1705_v11 = vpack.c.bf16 %v945_v9, %v943_v31  ;;  %v1211_v31 = vld [vmem:[%s3427_s7 + $0xd8] sm:$0xff]  ;;  %v1214_v17 = vld [vmem:[%s3427_s7 + $0xf0] sm:$0xff]  ;;  %v1217_v0 = vld [vmem:[%s3427_s7 + $0x108] sm:$0xff] }
 0x241   :  { %1664 = vmatpush1.bf16.msra.mxu1 %v1663_v14  ;;  %v947_v14 = vld [vmem:[%s3425_s5 + $0x1a8] sm:$0xff] }
 0x242   :  { %1666 = vmatprep.subr.bf16.mxu1 %v1665_v15  ;;  %v949_v15 = vld [vmem:[%s3425_s5 + $0x1b8] sm:$0xff] }
 0x243   :  { %v1709_v28 = vpack.c.bf16 %v949_v15, %v947_v14  ;;  %v1215_v14 = vld [vmem:[%s3427_s7 + $0xf8] sm:$0xff] }
 0x245   :  { %1668 = vmatpush1.bf16.msra.mxu1 %v1667_v18  ;;  %v951_v18 = vld [vmem:[%s3425_s5 + $0x1c8] sm:$0xff] }
 0x246   :  { %1670 = vmatprep.subr.bf16.mxu1 %v1669_v20  ;;  %v953_v20 = vld [vmem:[%s3425_s5 + $0x1d8] sm:$0xff] }
 0x247   :  { %v1713_v22 = vpack.c.bf16 %v953_v20, %v951_v18  ;;  %v1219_v18 = vld [vmem:[%s3427_s7 + $0x118] sm:$0xff] }
 0x249   :  { %1672 = vmatpush1.bf16.msra.mxu1 %v1671_v25  ;;  %v955_v25 = vld [vmem:[%s3425_s5 + $0x1e8] sm:$0xff] }
 0x24a   :  { %1674 = vmatprep.subr.bf16.mxu1 %v1673_v26  ;;  %v957_v26 = vld [vmem:[%s3425_s5 + $0x1f8] sm:$0xff] }
 0x24b   :  { %v1717_v35 = vpack.c.bf16 %v957_v26, %v955_v25  ;;  %v1223_v25 = vld [vmem:[%s3427_s7 + $0x138] sm:$0xff] }
 0x24d   :  { %1676 = vmatpush1.bf16.msra.mxu1 %v1675_v6  ;;  %v959_v6 = vld [vmem:[%s3425_s5 + $0x208] sm:$0xff] }
 0x24e   :  { %1678 = vmatprep.subr.bf16.mxu1 %v1677_v37  ;;  %v961_v37 = vld [vmem:[%s3425_s5 + $0x218] sm:$0xff] }
 0x24f   :  { %v1721_v36 = vpack.c.bf16 %v961_v37, %v959_v6  ;;  %v1227_v6 = vld [vmem:[%s3427_s7 + $0x158] sm:$0xff] }
 0x251   :  { %1680 = vmatpush1.bf16.msra.mxu1 %v1679_v40  ;;  %v1184_v40 = vld [vmem:[%s3427_s7] sm:$0xff] }
 0x252   :  { %1682 = vmatprep.subr.bf16.mxu1 %v1681_v3  ;;  %v1785_v3 = vpack.c.bf16 %v1187_v38, %v1185_v39  ;;  %v1787_v44 = vpack.c.bf16 %v1186_v41, %v1184_v40  ;;  %v1226_v39 = vld [vmem:[%s3427_s7 + $0x150] sm:$0xff]  ;;  %v1229_v38 = vld [vmem:[%s3427_s7 + $0x168] sm:$0xff]  ;;  %v1231_v40 = vld [vmem:[%s3427_s7 + $0x178] sm:$0xff]  ;;  %v714_v41 = vlaneseq }
 0x254   :  { %1786 = vmatprep.subr.bf16.mxu0 %v1785_v3 }
 0x255   :  { %1684 = vmatpush1.bf16.msra.mxu1 %v1683_v45  ;;  %v1789_v45 = vpack.c.bf16 %v1191_v43, %v1189_v42  ;;  %1788 = vmatpush1.bf16.msra.mxu0 %v1787_v44  ;;  %v1829_v42 = vpack.c.bf16 %v1231_v40, %v1229_v38  ;;  %v1228_v43 = vld [vmem:[%s3427_s7 + $0x160] sm:$0xff]  ;;  %v1230_v44 = vld [vmem:[%s3427_s7 + $0x170] sm:$0xff] }
 0x256   :  { %1686 = vmatprep.subr.bf16.mxu1 %v1685_v46  ;;  %v1188_v46 = vld [vmem:[%s3427_s7 + $0x20] sm:$0xff] }
 0x257   :  { %v1791_v49 = vpack.c.bf16 %v1190_v47, %v1188_v46  ;;  %1790 = vmatprep.subr.bf16.mxu0 %v1789_v45  ;;  %v1233_v45 = vld [vmem:[%s3427_s7 + $0x188] sm:$0xff]  ;;  %v1235_v46 = vld [vmem:[%s3427_s7 + $0x198] sm:$0xff]  ;;  %v1831_v47 = vpack.c.bf16 %v1230_v44, %v1228_v43  ;;  %v978_v40 = vld [vmem:[%s3425_s5 + $0x2a0] sm:$0xff] }
 0x259   :  { %1688 = vmatpush1.bf16.msra.mxu1 %v1687_v50  ;;  %v1793_v50 = vpack.c.bf16 %v1195_v48, %v1193_v19  ;;  %1792 = vmatpush1.bf16.msra.mxu0 %v1791_v49  ;;  %v3149_v19 = vshrl.u32 %v714_v41, 7  ;;  %v1833_v48 = vpack.c.bf16 %v1235_v46, %v1233_v45  ;;  %v1232_v49 = vld [vmem:[%s3427_s7 + $0x180] sm:$0xff]  ;;  %v983_v41 = vld [vmem:[%s3425_s5 + $0x2c8] sm:$0xff]  ;;  %v984_v46 = vld [vmem:[%s3425_s5 + $0x2d0] sm:$0xff] }
 0x25a   :  { %1690 = vmatprep.subr.bf16.mxu1 %v1689_v51  ;;  %v1192_v51 = vld [vmem:[%s3427_s7 + $0x40] sm:$0xff] }
 0x25b   :  { %v1795_v55 = vpack.c.bf16 %v1194_v52, %v1192_v51  ;;  %1794 = vmatprep.subr.bf16.mxu0 %v1793_v50  ;;  %v1234_v50 = vld [vmem:[%s3427_s7 + $0x190] sm:$0xff]  ;;  %v1237_v51 = vld [vmem:[%s3427_s7 + $0x1a8] sm:$0xff]  ;;  %v1239_v52 = vld [vmem:[%s3427_s7 + $0x1b8] sm:$0xff] }
 0x25c   :  { %v982_v45 = vld [vmem:[%s3425_s5 + $0x2c0] sm:$0xff] }
 0x25d   :  { %1692 = vmatpush1.bf16.msra.mxu1 %v1691_v27  ;;  %v1797_v27 = vpack.c.bf16 %v1199_v54, %v1197_v53  ;;  %1796 = vmatpush1.bf16.msra.mxu0 %v1795_v55  ;;  %v1835_v53 = vpack.c.bf16 %v1234_v50, %v1232_v49  ;;  %v3164_v54 = vsub.s32 0, %v3149_v19  ;;  %v1837_v55 = vpack.c.bf16 %v1239_v52, %v1237_v51  ;;  %v986_v51 = vld [vmem:[%s3425_s5 + $0x2e0] sm:$0xff]  ;;  %v988_v52 = vld [vmem:[%s3425_s5 + $0x2f0] sm:$0xff] }
 0x25e   :  { %1694 = vmatprep.subr.bf16.mxu1 %v1693_v56  ;;  %v1196_v56 = vld [vmem:[%s3427_s7 + $0x60] sm:$0xff]  ;;  %v1747_v49 = vpack.c.bf16 %v984_v46, %v982_v45  ;;  %v1019_v45 = vld [vmem:[%s3425_s5 + $0x3e8] sm:$0xff]  ;;  %v1021_v46 = vld [vmem:[%s3425_s5 + $0x3f8] sm:$0xff] }
 0x25f   :  { %v1799_v60 = vpack.c.bf16 %v1198_v57, %v1196_v56  ;;  %1798 = vmatprep.subr.bf16.mxu0 %v1797_v27  ;;  %v1236_v27 = vld [vmem:[%s3427_s7 + $0x1a0] sm:$0xff]  ;;  %v1238_v56 = vld [vmem:[%s3427_s7 + $0x1b0] sm:$0xff] }
 0x260   :  { %v3175_v57 = vld [vmem:[%s3424_s4] sm:$0xf] }
 0x261   :  { %1696 = vmatpush1.bf16.msra.mxu1 %v1695_v61  ;;  %v1801_v61 = vpack.c.bf16 %v1203_v59, %v1201_v58  ;;  %1800 = vmatpush1.bf16.msra.mxu0 %v1799_v60  ;;  %v3178_v58 = vsub.s32 1, %v3149_v19  ;;  %v1839_v59 = vpack.c.bf16 %v1238_v56, %v1236_v27  ;;  %v717_v60 = vrot.slane %v3175_v57, %v3164_v54 }
 0x262   :  { %1698 = vmatprep.subr.bf16.mxu1 %v1697_v62  ;;  %v1200_v62 = vld [vmem:[%s3427_s7 + $0x80] sm:$0xff]  ;;  %v1751_v27 = vpack.c.bf16 %v988_v52, %v986_v51  ;;  %v1241_v52 = vld [vmem:[%s3427_s7 + $0x1c8] sm:$0xff] }
 0x263   :  { %v1803_v23 = vpack.c.bf16 %v1202_v63, %v1200_v62  ;;  %1802 = vmatprep.subr.bf16.mxu0 %v1801_v61  ;;  %v721_v61 = vrot.slane %v3175_v57, %v3178_v58  ;;  %v3184_v63 = vstv %s884_s11 }
 0x265   :  { %1700 = vmatpush1.bf16.msra.mxu1 %v1699_v4  ;;  %v1805_v4 = vpack.c.bf16 %v1207_v2, %v1205_v1  ;;  %1804 = vmatpush1.bf16.msra.mxu0 %v1803_v23 }
 0x266   :  { %1702 = vmatprep.subr.bf16.mxu1 %v1701_v5  ;;  %v1204_v5 = vld [vmem:[%s3427_s7 + $0xa0] sm:$0xff] }
 0x267   :  { %v1807_v9 = vpack.c.bf16 %v1206_v7, %v1204_v5  ;;  %1806 = vmatprep.subr.bf16.mxu0 %v1805_v4  ;;  %v958_v4 = vld [vmem:[%s3425_s5 + $0x200] sm:$0xff]  ;;  %v960_v5 = vld [vmem:[%s3425_s5 + $0x210] sm:$0xff] }
 0x269   :  { %1704 = vmatpush1.bf16.msra.mxu1 %v1703_v10  ;;  %v1809_v10 = vpack.c.bf16 %v1211_v31, %v1209_v8  ;;  %1808 = vmatpush1.bf16.msra.mxu0 %v1807_v9  ;;  %v963_v8 = vld [vmem:[%s3425_s5 + $0x228] sm:$0xff]  ;;  %v965_v31 = vld [vmem:[%s3425_s5 + $0x238] sm:$0xff] }
 0x26a   :  { %1706 = vmatprep.subr.bf16.mxu1 %v1705_v11  ;;  %v1208_v11 = vld [vmem:[%s3427_s7 + $0xc0] sm:$0xff] }
 0x26b   :  { %v1811_v15 = vpack.c.bf16 %v1210_v12, %v1208_v11  ;;  %1810 = vmatprep.subr.bf16.mxu0 %v1809_v10  ;;  %v1723_v10 = vpack.c.bf16 %v960_v5, %v958_v4  ;;  %v1725_v12 = vpack.c.bf16 %v965_v31, %v963_v8  ;;  %v996_v4 = vld [vmem:[%s3425_s5 + $0x330] sm:$0xff]  ;;  %v999_v5 = vld [vmem:[%s3425_s5 + $0x348] sm:$0xff] }
 0x26d   :  { %1708 = vmatpush1.bf16.msra.mxu1 %v1707_v16  ;;  %v1813_v16 = vpack.c.bf16 %v1215_v14, %v1213_v13  ;;  %1812 = vmatpush1.bf16.msra.mxu0 %v1811_v15  ;;  %v962_v13 = vld [vmem:[%s3425_s5 + $0x220] sm:$0xff]  ;;  %v964_v14 = vld [vmem:[%s3425_s5 + $0x230] sm:$0xff] }
 0x26e   :  { %1710 = vmatprep.subr.bf16.mxu1 %v1709_v28  ;;  %v1212_v28 = vld [vmem:[%s3427_s7 + $0xe0] sm:$0xff] }
 0x26f   :  { %v1815_v20 = vpack.c.bf16 %v1214_v17, %v1212_v28  ;;  %1814 = vmatprep.subr.bf16.mxu0 %v1813_v16  ;;  %v967_v16 = vld [vmem:[%s3425_s5 + $0x248] sm:$0xff]  ;;  %v969_v28 = vld [vmem:[%s3425_s5 + $0x258] sm:$0xff]  ;;  %v1727_v17 = vpack.c.bf16 %v964_v14, %v962_v13  ;;  %v728_v14 = vsub.s32 3, %v3149_v19 }
 0x270   :  { %v1005_v13 = vld [vmem:[%s3425_s5 + $0x378] sm:$0xff] }
 0x271   :  { %1712 = vmatpush1.bf16.msra.mxu1 %v1711_v21  ;;  %v1817_v21 = vpack.c.bf16 %v1219_v18, %v1217_v0  ;;  %1816 = vmatpush1.bf16.msra.mxu0 %v1815_v20  ;;  %v1729_v0 = vpack.c.bf16 %v969_v28, %v967_v16  ;;  %v966_v18 = vld [vmem:[%s3425_s5 + $0x240] sm:$0xff]  ;;  %v968_v20 = vld [vmem:[%s3425_s5 + $0x250] sm:$0xff] }
 0x272   :  { %1714 = vmatprep.subr.bf16.mxu1 %v1713_v22  ;;  %v1216_v22 = vld [vmem:[%s3427_s7 + $0x100] sm:$0xff] }
 0x273   :  { %v1819_v26 = vpack.c.bf16 %v1218_v24, %v1216_v22  ;;  %1818 = vmatprep.subr.bf16.mxu0 %v1817_v21  ;;  %v971_v21 = vld [vmem:[%s3425_s5 + $0x268] sm:$0xff]  ;;  %v973_v22 = vld [vmem:[%s3425_s5 + $0x278] sm:$0xff]  ;;  %v1731_v24 = vpack.c.bf16 %v968_v20, %v966_v18  ;;  %v1002_v28 = vld [vmem:[%s3425_s5 + $0x360] sm:$0xff]  ;;  %v729_v20 = vrot.slane %v3175_v57, %v728_v14 }
 0x274   :  { %v1007_v18 = vld [vmem:[%s3425_s5 + $0x388] sm:$0xff] }
 0x275   :  { %1716 = vmatpush1.bf16.msra.mxu1 %v1715_v29  ;;  %v1821_v29 = vpack.c.bf16 %v1223_v25, %v1221_v33  ;;  %1820 = vmatpush1.bf16.msra.mxu0 %v1819_v26  ;;  %v1733_v33 = vpack.c.bf16 %v973_v22, %v971_v21  ;;  %v970_v25 = vld [vmem:[%s3425_s5 + $0x260] sm:$0xff]  ;;  %v972_v26 = vld [vmem:[%s3425_s5 + $0x270] sm:$0xff] }
 0x276   :  { %1718 = vmatprep.subr.bf16.mxu1 %v1717_v35  ;;  %v1220_v35 = vld [vmem:[%s3427_s7 + $0x120] sm:$0xff] }
 0x277   :  { %v1823_v37 = vpack.c.bf16 %v1222_v30, %v1220_v35  ;;  %1822 = vmatprep.subr.bf16.mxu0 %v1821_v29  ;;  %v975_v29 = vld [vmem:[%s3425_s5 + $0x288] sm:$0xff]  ;;  %v977_v35 = vld [vmem:[%s3425_s5 + $0x298] sm:$0xff]  ;;  %v1735_v30 = vpack.c.bf16 %v972_v26, %v970_v25  ;;  %v1008_v25 = vld [vmem:[%s3425_s5 + $0x390] sm:$0xff] }
 0x279   :  { %1720 = vmatpush1.bf16.msra.mxu1 %v1719_v34  ;;  %v1825_v34 = vpack.c.bf16 %v1227_v6, %v1225_v32  ;;  %1824 = vmatpush1.bf16.msra.mxu0 %v1823_v37  ;;  %v1737_v32 = vpack.c.bf16 %v977_v35, %v975_v29  ;;  %v974_v6 = vld [vmem:[%s3425_s5 + $0x280] sm:$0xff]  ;;  %v976_v37 = vld [vmem:[%s3425_s5 + $0x290] sm:$0xff]  ;;  %v1011_v35 = vld [vmem:[%s3425_s5 + $0x3a8] sm:$0xff] }
 0x27a   :  { %1722 = vmatprep.subr.bf16.mxu1 %v1721_v36  ;;  %v1224_v36 = vld [vmem:[%s3427_s7 + $0x140] sm:$0xff] }
 0x27b   :  { %v1827_v3 = vpack.c.bf16 %v1226_v39, %v1224_v36  ;;  %1826 = vmatprep.subr.bf16.mxu0 %v1825_v34  ;;  %v979_v34 = vld [vmem:[%s3425_s5 + $0x2a8] sm:$0xff]  ;;  %v981_v36 = vld [vmem:[%s3425_s5 + $0x2b8] sm:$0xff]  ;;  %v1739_v39 = vpack.c.bf16 %v976_v37, %v974_v6 }
 0x27c   :  { %v1741_v38 = vpack.c.bf16 %v981_v36, %v979_v34  ;;  %v1010_v36 = vld [vmem:[%s3425_s5 + $0x3a0] sm:$0xff] }
 0x27d   :  { %1828 = vmatpush1.bf16.msra.mxu0 %v1827_v3  ;;  %v980_v3 = vld [vmem:[%s3425_s5 + $0x2b0] sm:$0xff] }
 0x27e   :  { %1830 = vmatprep.subr.bf16.mxu0 %v1829_v42  ;;  %v985_v42 = vld [vmem:[%s3425_s5 + $0x2d8] sm:$0xff]  ;;  %v1743_v43 = vpack.c.bf16 %v980_v3, %v978_v40 }
 0x27f   :  { %v1745_v44 = vpack.c.bf16 %v985_v42, %v983_v41  ;;  %v1017_v40 = vld [vmem:[%s3425_s5 + $0x3d8] sm:$0xff] }
 0x281   :  { %1832 = vmatpush1.bf16.msra.mxu0 %v1831_v47  ;;  %v987_v47 = vld [vmem:[%s3425_s5 + $0x2e8] sm:$0xff] }
 0x282   :  { %1834 = vmatprep.subr.bf16.mxu0 %v1833_v48  ;;  %v989_v48 = vld [vmem:[%s3425_s5 + $0x2f8] sm:$0xff] }
 0x283   :  { %v1749_v50 = vpack.c.bf16 %v989_v48, %v987_v47  ;;  %v1781_v48 = vpack.c.bf16 %v1021_v46, %v1019_v45 }
 0x285   :  { %1836 = vmatpush1.bf16.msra.mxu0 %v1835_v53  ;;  %v991_v53 = vld [vmem:[%s3425_s5 + $0x308] sm:$0xff] }
 0x286   :  { %1838 = vmatprep.subr.bf16.mxu0 %v1837_v55  ;;  %v993_v55 = vld [vmem:[%s3425_s5 + $0x318] sm:$0xff] }
 0x287   :  { %v1753_v56 = vpack.c.bf16 %v993_v55, %v991_v53  ;;  %v1243_v53 = vld [vmem:[%s3427_s7 + $0x1d8] sm:$0xff] }
 0x288   :  { %v1841_v55 = vpack.c.bf16 %v1243_v53, %v1241_v52 }
 0x289   :  { %1840 = vmatpush1.bf16.msra.mxu0 %v1839_v59  ;;  %v990_v59 = vld [vmem:[%s3425_s5 + $0x300] sm:$0xff] }
 0x28a   :  { %1842 = vmatprep.subr.bf16.mxu0 %v1841_v55 }
 0x2dd   :  { %v804_v62 = vpop.f32.mrb[18].mxu1 }
 0x2de   :  { %v805_v1 = vadd.f32 %v804_v62, %v717_v60  ;;  %v806_v2 = vpop.f32.mrb[19].mxu1  ;;  %v992_v60 = vld [vmem:[%s3425_s5 + $0x310] sm:$0xff]  ;;  %v997_v62 = vld [vmem:[%s3425_s5 + $0x338] sm:$0xff] }
 0x2df   :  { %v807_v23 = vadd.f32 %v806_v2, %v721_v61  ;;  %v995_v61 = vld [vmem:[%s3425_s5 + $0x328] sm:$0xff] }
 0x2e0   :  { %v886_v7 = vmul.f32 %v3184_v63, %v805_v1  ;;  %vm880_vm2 = vcmp.ge.f32.partialorder %v805_v1, 0.0  ;;  %v1757_v2 = vpack.c.bf16 %v997_v62, %v995_v61  ;;  %v1247_v61 = vld [vmem:[%s3427_s7 + $0x1f8] sm:$0xff] }
 0x2e1   :  { %v887_v9 = vmul.f32 %v3184_v63, %v807_v23  ;;  %vm881_vm3 = vcmp.ge.f32.partialorder %v807_v23, 0.0 }
 0x2e2   :  { %v890_v15 = vsel %vm880_vm2, %v805_v1, %v886_v7  ;;  %v1755_v1 = vpack.c.bf16 %v992_v60, %v990_v59  ;;  %v1001_v7 = vld [vmem:[%s3425_s5 + $0x358] sm:$0xff]  ;;  %v1245_v60 = vld [vmem:[%s3427_s7 + $0x1e8] sm:$0xff] }
 0x2e3   :  { %v891_v11 = vsel %vm881_vm3, %v807_v23, %v887_v9  ;;  %v994_v23 = vld [vmem:[%s3425_s5 + $0x320] sm:$0xff]  ;;  %v1761_v31 = vpack.c.bf16 %v1001_v7, %v999_v5  ;;  %v1845_v62 = vpack.c.bf16 %v1247_v61, %v1245_v60 }
 0x2e4   :  { %1098 = vmatprep.mubr.f32.mxu1 %v891_v11  ;;  %v1759_v8 = vpack.c.bf16 %v996_v4, %v994_v23  ;;  %v998_v9 = vld [vmem:[%s3425_s5 + $0x340] sm:$0xff]  ;;  %v724_v11 = vsub.s32 2, %v3149_v19  ;;  %v1009_v19 = vld [vmem:[%s3425_s5 + $0x398] sm:$0xff] }
 0x2e5   :  { %1099 = vmatmul.mubr.f32.vlgmr.msra.gmra.mrb[22].mxu1 %v890_v15  ;;  %v1022_v4 = vld [vmem:[%s3426_s6] sm:$0x3] }
 0x2e6   :  { %1724 = vmatpush1.bf16.msra.mxu1 %v1723_v10  ;;  %v1000_v10 = vld [vmem:[%s3425_s5 + $0x350] sm:$0xff]  ;;  %v1027_v5 = vrot.slane %v1022_v4, %v3164_v54  ;;  %v1031_v7 = vrot.slane %v1022_v4, %v3178_v58 }
 0x2e7   :  { %1726 = vmatprep.subr.bf16.mxu1 %v1725_v12  ;;  %v1003_v12 = vld [vmem:[%s3425_s5 + $0x368] sm:$0xff]  ;;  %v1763_v15 = vpack.c.bf16 %v1000_v10, %v998_v9 }
 0x2e8   :  { %v1765_v16 = vpack.c.bf16 %v1005_v13, %v1003_v12 }
 0x2ea   :  { %1728 = vmatpush1.bf16.msra.mxu1 %v1727_v17  ;;  %v1004_v17 = vld [vmem:[%s3425_s5 + $0x370] sm:$0xff] }
 0x2eb   :  { %1730 = vmatprep.subr.bf16.mxu1 %v1729_v0  ;;  %v725_v0 = vrot.slane %v3175_v57, %v724_v11  ;;  %v1767_v21 = vpack.c.bf16 %v1004_v17, %v1002_v28  ;;  %v1013_v57 = vld [vmem:[%s3425_s5 + $0x3b8] sm:$0xff] }
 0x2ec   :  { %v1773_v34 = vpack.c.bf16 %v1013_v57, %v1011_v35 }
 0x2ee   :  { %1732 = vmatpush1.bf16.msra.mxu1 %v1731_v24  ;;  %v1769_v24 = vpack.c.bf16 %v1009_v19, %v1007_v18 }
 0x2ef   :  { %1734 = vmatprep.subr.bf16.mxu1 %v1733_v33  ;;  %v1006_v33 = vld [vmem:[%s3425_s5 + $0x380] sm:$0xff] }
 0x2f0   :  { %v1771_v6 = vpack.c.bf16 %v1008_v25, %v1006_v33 }
 0x2f2   :  { %1736 = vmatpush1.bf16.msra.mxu1 %v1735_v30 }
 0x2f3   :  { %1738 = vmatprep.subr.bf16.mxu1 %v1737_v32 }
 0x2f6   :  { %1740 = vmatpush1.bf16.msra.mxu1 %v1739_v39  ;;  %v1012_v39 = vld [vmem:[%s3425_s5 + $0x3b0] sm:$0xff] }
 0x2f7   :  { %1742 = vmatprep.subr.bf16.mxu1 %v1741_v38  ;;  %v1015_v38 = vld [vmem:[%s3425_s5 + $0x3c8] sm:$0xff]  ;;  %v1775_v41 = vpack.c.bf16 %v1012_v39, %v1010_v36 }
 0x2f8   :  { %v1777_v42 = vpack.c.bf16 %v1017_v40, %v1015_v38 }
 0x2fa   :  { %1744 = vmatpush1.bf16.msra.mxu1 %v1743_v43  ;;  %v1014_v43 = vld [vmem:[%s3425_s5 + $0x3c0] sm:$0xff] }
 0x2fb   :  { %1746 = vmatprep.subr.bf16.mxu1 %v1745_v44  ;;  %v1016_v44 = vld [vmem:[%s3425_s5 + $0x3d0] sm:$0xff] }
 0x2fc   :  { %v1779_v47 = vpack.c.bf16 %v1016_v44, %v1014_v43 }
 0x2fe   :  { %1748 = vmatpush1.bf16.msra.mxu1 %v1747_v49  ;;  %v1018_v49 = vld [vmem:[%s3425_s5 + $0x3e0] sm:$0xff] }
 0x2ff   :  { %1750 = vmatprep.subr.bf16.mxu1 %v1749_v50  ;;  %v1020_v50 = vld [vmem:[%s3425_s5 + $0x3f0] sm:$0xff] }
 0x300   :  { %v1783_v51 = vpack.c.bf16 %v1020_v50, %v1018_v49 }
 0x302   :  { %1752 = vmatpush1.bf16.msra.mxu1 %v1751_v27  ;;  %v1240_v27 = vld [vmem:[%s3427_s7 + $0x1c0] sm:$0xff] }
 0x303   :  { %1754 = vmatprep.subr.bf16.mxu1 %v1753_v56  ;;  %v1242_v56 = vld [vmem:[%s3427_s7 + $0x1d0] sm:$0xff] }
 0x304   :  { %v1843_v59 = vpack.c.bf16 %v1242_v56, %v1240_v27 }
 0x306   :  { %1756 = vmatpush1.bf16.msra.mxu1 %v1755_v1  ;;  %1844 = vmatpush1.bf16.msra.mxu0 %v1843_v59  ;;  %v1244_v1 = vld [vmem:[%s3427_s7 + $0x1e0] sm:$0xff] }
 0x307   :  { %1758 = vmatprep.subr.bf16.mxu1 %v1757_v2  ;;  %v1246_v2 = vld [vmem:[%s3427_s7 + $0x1f0] sm:$0xff]  ;;  %1846 = vmatprep.subr.bf16.mxu0 %v1845_v62 }
 0x308   :  { %v1847_v23 = vpack.c.bf16 %v1246_v2, %v1244_v1 }
 0x30a   :  { %1760 = vmatpush1.bf16.msra.mxu1 %v1759_v8  ;;  %1848 = vmatpush1.bf16.msra.mxu0 %v1847_v23 }
 0x30b   :  { %1762 = vmatprep.subr.bf16.mxu1 %v1761_v31  ;;  %v1179_v31 = vstv %s1340_s22 }
 0x30e   :  { %1764 = vmatpush1.bf16.msra.mxu1 %v1763_v15 }
 0x30f   :  { %v875_v22 = vpop.f32.mrb[20].mxu1  ;;  %1766 = vmatprep.subr.bf16.mxu1 %v1765_v16  ;;  %v1248_v16 = vld [vmem:[%s3428_s8] sm:$0x3] }
 0x310   :  { %v876_v26 = vadd.f32 %v875_v22, %v725_v0  ;;  %v877_v29 = vpop.f32.mrb[21].mxu1  ;;  %v1253_v28 = vrot.slane %v1248_v16, %v3164_v54  ;;  %v1257_v17 = vrot.slane %v1248_v16, %v3178_v58 }
 0x311   :  { %v878_v30 = vadd.f32 %v877_v29, %v729_v20 }
 0x312   :  { %vm882_vm4 = vcmp.ge.f32.partialorder %v876_v26, 0.0  ;;  %v888_v32 = vmul.f32 %v3184_v63, %v876_v26  ;;  %1768 = vmatpush1.bf16.msra.mxu1 %v1767_v21 }
 0x313   :  { %v889_v37 = vmul.f32 %v3184_v63, %v878_v30  ;;  %1770 = vmatprep.subr.bf16.mxu1 %v1769_v24  ;;  %vm883_vm5 = vcmp.ge.f32.partialorder %v878_v30, 0.0 }
 0x314   :  { %v892_v63 = vsel %vm882_vm4, %v876_v26, %v888_v32 }
 0x315   :  { %v893_v3 = vsel %vm883_vm5, %v878_v30, %v889_v37 }
 0x316   :  { %1772 = vmatpush1.bf16.msra.mxu1 %v1771_v6  ;;  %1169 = vmatprep.mubr.f32.mxu1 %v893_v3 }
 0x317   :  { %1774 = vmatprep.subr.bf16.mxu1 %v1773_v34 }
 0x31a   :  { %1776 = vmatpush1.bf16.msra.mxu1 %v1775_v41 }
 0x31b   :  { %1778 = vmatprep.subr.bf16.mxu1 %v1777_v42 }
 0x31e   :  { %1780 = vmatpush1.bf16.msra.mxu1 %v1779_v47 }
 0x31f   :  { %1782 = vmatprep.subr.bf16.mxu1 %v1781_v48 }
 0x322   :  { %1784 = vmatpush1.bf16.msra.mxu1 %v1783_v51 }
 0x325   :  { %1170 = vmatmul.mubr.f32.vlgmr.msra.gmra.mrb[22].mxu1 %v892_v63 }
 0x3f8   :  { %v1171_v8 = vpop.f32.mrb[22].mxu1 }
 0x3f9   :  { %v1874_v9 = vadd.f32 %v1171_v8, %v1027_v5  ;;  %v1173_v10 = vpop.f32.mrb[23].mxu1 }
 0x3fa   :  { %v1875_v11 = vadd.f32 %v1173_v10, %v1031_v7 }
 0x3fb   :  { %v1180_v12 = vmul.f32 %v1874_v9, %v1179_v31  ;;  %vm1176_vm6 = vcmp.ge.f32.partialorder %v1874_v9, 0.0 }
 0x3fc   :  { %v1181_v13 = vmul.f32 %v1875_v11, %v1179_v31  ;;  %vm1177_vm7 = vcmp.ge.f32.partialorder %v1875_v11, 0.0 }
 0x3fd   :  { %v1182_v15 = vsel %vm1176_vm6, %v1874_v9, %v1180_v12 }
 0x3fe   :  { %v1183_v14 = vsel %vm1177_vm7, %v1875_v11, %v1181_v13 }
 0x3ff   :  { %1324 = vmatprep.mubr.f32.mxu0 %v1183_v14 }
 0x400   :  { %1325 = vmatmul.mubr.f32.vlgmr.msra.gmra.mrb[50].mxu0 %v1182_v15 }
 0x4d3   :  { %v1326_v0 = vpop.f32.mrb[50].mxu0 }
 0x4d4   :  { %v1327_v18 = vadd.f32 %v1326_v0, %v1253_v28  ;;  %v1328_v19 = vpop.f32.mrb[51].mxu0 }
 0x4d5   :  { %v1329_v20 = vadd.f32 %v1328_v19, %v1257_v17 }
 0x4d6   :  { %1331 = vst [vmem:[%s3429_s9] sm:$0x3f] %v1327_v18 }
 0x4d7   :  { %1332 = vst [vmem:[%s3429_s9 + $0x8] sm:$0x3f] %v1329_v20 }
 0x4d8   :  { %1337 = vsyncpa [#allocation3], 1 }

</bundles_post_ra>
